<compile_context>
chip_gen: v6e
topology: v6e:2x2x1
jax: 0.10.0
libtpu: 0.0.40
codegen_flags: <defaults>
</compile_context>

<pallas_src>
import math

import jax
import jax.numpy as jnp
from jax.experimental import pallas as pl
from jax.experimental.pallas import tpu as pltpu  # noqa: F401  (TPU backend)

# ---------------- model hyper-parameters (small, consistent with the module) ----
B = 2            # batch
LQ = 8           # target sequence length
LK = 16          # memory sequence length
D_MODEL = 32     # d_model
NHEAD = 4        # heads
D_K = D_MODEL // NHEAD
D_FF = 64        # dim_feedforward
NUM_LAYERS = 2   # decoder layers
EPS = 1e-5       # nn.LayerNorm default eps


# ----------------------------- Pallas kernel --------------------------------
def decoder_kernel(tgt_ref, mem_ref, w_ref, v_ref, out_ref):
    # w_ref: (L, D, 384) bf16  lanes = [sa_qkv(96)|sa_o|ca_q|ca_kv(64)|ca_o|ff1(64)|ff2^T(64)]
    # v_ref: (L, 16, 128) f32  rows  = [b_sa_qkv, b_sa_o, b_ca_q, b_ca_kv, b_ca_o,
    #                                   b_ff1, b_ff2, n1_g, n1_b, n2_g, n2_b, n3_g,
    #                                   n3_b, fn_g, fn_b, pad]
    x = tgt_ref[...]                      # (B*LQ, D) f32
    mem = mem_ref[...]                    # (B*LK, D) f32
    D = D_MODEL

    def log2(v):
        return int(math.log2(v))

    def make_attn_consts(lk):
        """Compile-time-shaped 0/1 masks for the (head+batch)-folded attention."""
        n = B * lk                        # keys per head block
        rows = NHEAD * n                  # folded key axis length
        i32 = jnp.int32
        # head-block mask for K/V rows: block h owns lanes [h*D_K, (h+1)*D_K)
        r_i = jax.lax.broadcasted_iota(i32, (rows, D), 0)
        d_i = jax.lax.broadcasted_iota(i32, (rows, D), 1)
        hblk = jnp.where((r_i >> log2(n)) == (d_i >> log2(D_K)), 1.0, 0.0)
        # batch-validity mask: query batch == key batch
        q_i = jax.lax.broadcasted_iota(i32, (B * LQ, rows), 0)
        c_i = jax.lax.broadcasted_iota(i32, (B * LQ, rows), 1)
        bval = jnp.where((q_i >> log2(LQ)) == ((c_i & (n - 1)) >> log2(lk)), 1.0, 0.0)
        # block-diagonal ones: same (head, batch) group <=> same contiguous lk block
        g_i = jax.lax.broadcasted_iota(i32, (rows, rows), 0)
        g_j = jax.lax.broadcasted_iota(i32, (rows, rows), 1)
        gsum = jnp.where((g_i >> log2(lk)) == (g_j >> log2(lk)), 1.0, 0.0)
        return hblk, bval, 1.0 - bval, gsum

    consts_self = make_attn_consts(LQ)
    consts_cross = make_attn_consts(LK)

    def proj(a, w):                       # f32 activations -> bf16 MXU -> f32 acc
        return jnp.dot(a.astype(jnp.bfloat16), w, preferred_element_type=jnp.float32)

    def proj_nt(a, w_t):                  # contract last dims: a(m,k) x w_t(n,k)
        return jax.lax.dot_general(a.astype(jnp.bfloat16), w_t,
                                   (((1,), (1,)), ((), ())),
                                   preferred_element_type=jnp.float32)

    def layer_norm(v, g, b):
        mu = jnp.mean(v, axis=-1, keepdims=True)
        var = jnp.mean(v * v, axis=-1, keepdims=True) - mu * mu
        return (v - mu) * jax.lax.rsqrt(var + EPS) * g + b

    def attention(q, k, v, consts):
        """q: (B*LQ, D); k, v: (B*lk, D), all f32 with heads in disjoint D_K lane
        groups.  Heads are packed along the key axis (masked K/V blocks) and batches
        are folded; the whole multi-head multi-batch attention is 4 matmuls + 1 exp."""
        hblk, bval, inv_bval, gsum = consts
        kb = jnp.concatenate([k] * NHEAD, axis=0) * hblk       # (NHEAD*B*lk, D)
        vb = jnp.concatenate([v] * NHEAD, axis=0) * hblk
        # all heads'/batches' scores in one NT matmul (K transpose hoisted here);
        # the 1/sqrt(d_k) scale is already folded into the q projection.
        s = jax.lax.dot_general(q, kb, (((1,), (1,)), ((), ())),
                                preferred_element_type=jnp.float32)
        s_max = jnp.max(s, axis=-1, keepdims=True)              # per-row constant
        p = jnp.exp(s - s_max) * bval                           # cross-batch -> 0
        # grouped softmax denominator (per lk block) broadcast via block-ones matmul;
        # inv_bval keeps the all-zero cross-batch groups at 1 (avoids 0*inf).
        denom = jnp.dot(p, gsum, preferred_element_type=jnp.float32) + inv_bval
        p = p * pl.reciprocal(denom, approx=True)
        return jnp.dot(p, vb, preferred_element_type=jnp.float32)   # (B*LQ, D)

    for l in range(NUM_LAYERS):            # static unroll over layers
        # ---------------- self-attention + residual + norm1 ----------------
        qkv = proj(x, w_ref[l, :, 0:3 * D]) + v_ref[l, 0:1, 0:3 * D]
        ctx = attention(qkv[:, 0:D], qkv[:, D:2 * D], qkv[:, 2 * D:3 * D], consts_self)
        sa = proj(ctx, w_ref[l, :, 3 * D:4 * D]) + v_ref[l, 1:2, 0:D]
        x = layer_norm(x + sa, v_ref[l, 7:8, 0:D], v_ref[l, 8:9, 0:D])

        # ---------------- cross-attention + residual + norm2 ----------------
        q = proj(x, w_ref[l, :, 4 * D:5 * D]) + v_ref[l, 2:3, 0:D]
        kv = proj(mem, w_ref[l, :, 5 * D:7 * D]) + v_ref[l, 3:4, 0:2 * D]
        ctx = attention(q, kv[:, 0:D], kv[:, D:2 * D], consts_cross)
        ca = proj(ctx, w_ref[l, :, 7 * D:8 * D]) + v_ref[l, 4:5, 0:D]
        x = layer_norm(x + ca, v_ref[l, 9:10, 0:D], v_ref[l, 10:11, 0:D])

        # ---------------- feed-forward (relu) + residual + norm3 ------------
        h1 = jnp.maximum(proj(x, w_ref[l, :, 8 * D:8 * D + D_FF])
                         + v_ref[l, 5:6, 0:D_FF], 0.0)
        ff = (proj_nt(h1, w_ref[l, :, 8 * D + D_FF:8 * D + 2 * D_FF])
              + v_ref[l, 6:7, 0:D])
        x = layer_norm(x + ff, v_ref[l, 11:12, 0:D], v_ref[l, 12:13, 0:D])

    # final LayerNorm of the Decoder — single lane-dense store
    out_ref[...] = layer_norm(x, v_ref[0, 13:14, 0:D], v_ref[0, 14:15, 0:D])


# ------------------------------ wrapper --------------------------------------
@jax.jit
def decoder_forward(tgt, memory, wslab, vslab):
    """tgt: (B, LQ, D), memory: (B, LK, D), wslab/vslab from pack_params()."""
    tgt2 = tgt.reshape(B * LQ, D_MODEL)       # free reshapes in the XLA wrapper
    mem2 = memory.reshape(B * LK, D_MODEL)
    out = pl.pallas_call(
        decoder_kernel,
        out_shape=jax.ShapeDtypeStruct((B * LQ, D_MODEL), jnp.float32),
        # gridless: whole working set (~60 KB) is VMEM-resident for one invocation
    )(tgt2, mem2, wslab, vslab)
    return out.reshape(B, LQ, D_MODEL)


# --------------------------- parameters --------------------------------------
def init_params(key):
    """Deterministic synthetic 'logical' parameters. Weights stored (in, out)."""
    L = NUM_LAYERS
    ks = iter(jax.random.split(key, 64))

    def w(shape, scale=0.05):
        return scale * jax.random.normal(next(ks), shape, dtype=jnp.float32)

    def zeros(shape):
        return jnp.zeros(shape, dtype=jnp.float32)

    def ones(shape):
        return jnp.ones(shape, dtype=jnp.float32)

    return dict(
        sa_wq=w((L, D_MODEL, D_MODEL)), sa_bq=w((L, 1, D_MODEL), 0.01),
        sa_wk=w((L, D_MODEL, D_MODEL)), sa_bk=w((L, 1, D_MODEL), 0.01),
        sa_wv=w((L, D_MODEL, D_MODEL)), sa_bv=w((L, 1, D_MODEL), 0.01),
        sa_wo=w((L, D_MODEL, D_MODEL)), sa_bo=w((L, 1, D_MODEL), 0.01),
        ca_wq=w((L, D_MODEL, D_MODEL)), ca_bq=w((L, 1, D_MODEL), 0.01),
        ca_wk=w((L, D_MODEL, D_MODEL)), ca_bk=w((L, 1, D_MODEL), 0.01),
        ca_wv=w((L, D_MODEL, D_MODEL)), ca_bv=w((L, 1, D_MODEL), 0.01),
        ca_wo=w((L, D_MODEL, D_MODEL)), ca_bo=w((L, 1, D_MODEL), 0.01),
        ff_w1=w((L, D_MODEL, D_FF)),    ff_b1=w((L, 1, D_FF), 0.01),
        ff_w2=w((L, D_FF, D_MODEL)),    ff_b2=w((L, 1, D_MODEL), 0.01),
        n1_g=ones((L, 1, D_MODEL)), n1_b=zeros((L, 1, D_MODEL)),
        n2_g=ones((L, 1, D_MODEL)), n2_b=zeros((L, 1, D_MODEL)),
        n3_g=ones((L, 1, D_MODEL)), n3_b=zeros((L, 1, D_MODEL)),
        fn_g=ones((1, D_MODEL)), fn_b=zeros((1, D_MODEL)),
    )


def pack_params(p):
    """Pack the 28 logical parameter arrays into 2 kernel inputs (all prep offline).

    wslab (L, D, 384) bf16 : [sa_qkv(96)|sa_o|ca_q|ca_kv(64)|ca_o|ff1(64)|ff2^T(64)]
                             (q-projection weights pre-scaled by 1/sqrt(d_k))
    vslab (L, 16, 128) f32 : one vector per sublane row, lane 0-aligned (see kernel).
    """
    L = NUM_LAYERS
    scale = 1.0 / math.sqrt(D_K)

    w_sa_qkv = jnp.concatenate([p['sa_wq'] * scale, p['sa_wk'], p['sa_wv']], axis=-1)
    w_ca_kv = jnp.concatenate([p['ca_wk'], p['ca_wv']], axis=-1)
    w_ff2_t = jnp.swapaxes(p['ff_w2'], 1, 2)                       # (L, D, D_FF)
    wslab = jnp.concatenate(
        [w_sa_qkv, p['sa_wo'], p['ca_wq'] * scale, w_ca_kv,
         p['ca_wo'], p['ff_w1'], w_ff2_t], axis=-1).astype(jnp.bfloat16)

    def row(vec):                          # (L, 1, W) -> (L, 1, 128) zero-padded
        return jnp.pad(vec, ((0, 0), (0, 0), (0, 128 - vec.shape[-1])))

    b_sa_qkv = jnp.concatenate([p['sa_bq'] * scale, p['sa_bk'], p['sa_bv']], axis=-1)
    b_ca_kv = jnp.concatenate([p['ca_bk'], p['ca_bv']], axis=-1)
    fn_g = jnp.broadcast_to(p['fn_g'][None], (L, 1, D_MODEL))
    fn_b = jnp.broadcast_to(p['fn_b'][None], (L, 1, D_MODEL))
    rows = [b_sa_qkv, p['sa_bo'], p['ca_bq'] * scale, b_ca_kv, p['ca_bo'],
            p['ff_b1'], p['ff_b2'],
            p['n1_g'], p['n1_b'], p['n2_g'], p['n2_b'], p['n3_g'], p['n3_b'],
            fn_g, fn_b, jnp.zeros((L, 1, D_MODEL), jnp.float32)]
    vslab = jnp.concatenate([row(r) for r in rows], axis=1)        # (L, 16, 128)
    return wslab, vslab


# ---------------------------- pure-JAX reference -----------------------------
def decoder_reference(tgt, memory, p):
    def layer_norm(v, g, b):
        mu = jnp.mean(v, axis=-1, keepdims=True)
        var = jnp.mean((v - mu) ** 2, axis=-1, keepdims=True)
        return (v - mu) / jnp.sqrt(var + EPS) * g + b

    def mha(q_in, kv_in, wq, bq, wk, bk, wv, bv, wo, bo):
        Bq, Lq, _ = q_in.shape
        Lk = kv_in.shape[1]
        q = (q_in @ wq + bq).reshape(Bq, Lq, NHEAD, D_K).transpose(0, 2, 1, 3)
        k = (kv_in @ wk + bk).reshape(Bq, Lk, NHEAD, D_K).transpose(0, 2, 1, 3)
        v = (kv_in @ wv + bv).reshape(Bq, Lk, NHEAD, D_K).transpose(0, 2, 1, 3)
        s = jnp.einsum("bhqd,bhkd->bhqk", q, k) / math.sqrt(D_K)
        pr = jax.nn.softmax(s, axis=-1)
        ctx = jnp.einsum("bhqk,bhkd->bhqd", pr, v)
        ctx = ctx.transpose(0, 2, 1, 3).reshape(Bq, Lq, D_MODEL)
        return ctx @ wo + bo

    x = tgt
    for l in range(NUM_LAYERS):
        sa = mha(x, x, p['sa_wq'][l], p['sa_bq'][l], p['sa_wk'][l], p['sa_bk'][l],
                 p['sa_wv'][l], p['sa_bv'][l], p['sa_wo'][l], p['sa_bo'][l])
        x = layer_norm(x + sa, p['n1_g'][l], p['n1_b'][l])
        ca = mha(x, memory, p['ca_wq'][l], p['ca_bq'][l], p['ca_wk'][l], p['ca_bk'][l],
                 p['ca_wv'][l], p['ca_bv'][l], p['ca_wo'][l], p['ca_bo'][l])
        x = layer_norm(x + ca, p['n2_g'][l], p['n2_b'][l])
        h1 = jnp.maximum(x @ p['ff_w1'][l] + p['ff_b1'][l], 0.0)
        ff = h1 @ p['ff_w2'][l] + p['ff_b2'][l]
        x = layer_norm(x + ff, p['n3_g'][l], p['n3_b'][l])
    return layer_norm(x, p['fn_g'], p['fn_b'])


# ------------------------------------ main ------------------------------------
if __name__ == "__main__":
    key = jax.random.PRNGKey(0)
    k_tgt, k_mem, k_par = jax.random.split(key, 3)

    tgt = jax.random.normal(k_tgt, (B, LQ, D_MODEL), dtype=jnp.float32)
    memory = jax.random.normal(k_mem, (B, LK, D_MODEL), dtype=jnp.float32)
    params = init_params(k_par)
    wslab, vslab = pack_params(params)

    out = jax.block_until_ready(decoder_forward(tgt, memory, wslab, vslab))
    ref = jax.block_until_ready(decoder_reference(tgt, memory, params))

    assert out.shape == (B, LQ, D_MODEL)
    err = float(jnp.max(jnp.abs(out - ref)))
    # bf16 MXU operands + approx softmax reciprocal give ~1e-3-level differences
    # vs. the default-precision f32 reference; real bugs would be O(0.1-1).
    assert jnp.allclose(out, ref, atol=1e-2, rtol=1e-2), f"max abs err {err}"

    # TODO(synk): optional tgt_mask / memory_mask (None in this spec) are not
    # implemented; dropout is identity (eval mode).
    print("KERNEL_OK")
</pallas_src>

<mosaic_0001>
module attributes {stable_mosaic.version = 11 : i64} {
  func.func @decoder_kernel(%arg0: memref<16x32xf32, #tpu.memory_space<vmem>>, %arg1: memref<32x32xf32, #tpu.memory_space<vmem>>, %arg2: memref<2x32x384xbf16, #tpu.memory_space<vmem>>, %arg3: memref<2x16x128xf32, #tpu.memory_space<vmem>>, %arg4: memref<16x32xf32, #tpu.memory_space<vmem>>) attributes {dimension_semantics = [], scalar_prefetch = 0 : i64, scratch_operands = 0 : i64, tpu.core_type = #tpu.core_type<tc>} {
    %c0 = arith.constant 0 : index
    %c0_0 = arith.constant 0 : index
    %0 = vector.load %arg0[%c0, %c0_0] : memref<16x32xf32, #tpu.memory_space<vmem>>, vector<16x32xf32>
    %c0_1 = arith.constant 0 : index
    %c0_2 = arith.constant 0 : index
    %1 = vector.load %arg1[%c0_1, %c0_2] : memref<32x32xf32, #tpu.memory_space<vmem>>, vector<32x32xf32>
    %2 = tpu.iota {dimensions = array<i32: 0>} : vector<64x32xi32>
    %3 = tpu.iota {dimensions = array<i32: 1>} : vector<64x32xi32>
    %c4_i32 = arith.constant 4 : i32
    %4 = vector.broadcast %c4_i32 : i32 to vector<64x32xi32>
    %5 = arith.shrsi %2, %4 : vector<64x32xi32>
    %c3_i32 = arith.constant 3 : i32
    %6 = vector.broadcast %c3_i32 : i32 to vector<64x32xi32>
    %7 = arith.shrsi %3, %6 : vector<64x32xi32>
    %8 = arith.cmpi eq, %5, %7 : vector<64x32xi32>
    %cst = arith.constant 1.000000e+00 : f32
    %cst_3 = arith.constant 0.000000e+00 : f32
    %9 = vector.broadcast %cst : f32 to vector<64x32xf32>
    %10 = vector.broadcast %cst_3 : f32 to vector<64x32xf32>
    %11 = arith.select %8, %9, %10 : vector<64x32xi1>, vector<64x32xf32>
    %12 = tpu.iota {dimensions = array<i32: 0>} : vector<16x64xi32>
    %13 = tpu.iota {dimensions = array<i32: 1>} : vector<16x64xi32>
    %c3_i32_4 = arith.constant 3 : i32
    %14 = vector.broadcast %c3_i32_4 : i32 to vector<16x64xi32>
    %15 = arith.shrsi %12, %14 : vector<16x64xi32>
    %c15_i32 = arith.constant 15 : i32
    %16 = vector.broadcast %c15_i32 : i32 to vector<16x64xi32>
    %17 = arith.andi %13, %16 : vector<16x64xi32>
    %c3_i32_5 = arith.constant 3 : i32
    %18 = vector.broadcast %c3_i32_5 : i32 to vector<16x64xi32>
    %19 = arith.shrsi %17, %18 : vector<16x64xi32>
    %20 = arith.cmpi eq, %15, %19 : vector<16x64xi32>
    %cst_6 = arith.constant 1.000000e+00 : f32
    %cst_7 = arith.constant 0.000000e+00 : f32
    %21 = vector.broadcast %cst_6 : f32 to vector<16x64xf32>
    %22 = vector.broadcast %cst_7 : f32 to vector<16x64xf32>
    %23 = arith.select %20, %21, %22 : vector<16x64xi1>, vector<16x64xf32>
    %24 = tpu.iota {dimensions = array<i32: 0>} : vector<64x64xi32>
    %25 = tpu.iota {dimensions = array<i32: 1>} : vector<64x64xi32>
    %c3_i32_8 = arith.constant 3 : i32
    %26 = vector.broadcast %c3_i32_8 : i32 to vector<64x64xi32>
    %27 = arith.shrsi %24, %26 : vector<64x64xi32>
    %c3_i32_9 = arith.constant 3 : i32
    %28 = vector.broadcast %c3_i32_9 : i32 to vector<64x64xi32>
    %29 = arith.shrsi %25, %28 : vector<64x64xi32>
    %30 = arith.cmpi eq, %27, %29 : vector<64x64xi32>
    %cst_10 = arith.constant 1.000000e+00 : f32
    %cst_11 = arith.constant 0.000000e+00 : f32
    %31 = vector.broadcast %cst_10 : f32 to vector<64x64xf32>
    %32 = vector.broadcast %cst_11 : f32 to vector<64x64xf32>
    %33 = arith.select %30, %31, %32 : vector<64x64xi1>, vector<64x64xf32>
    %cst_12 = arith.constant 1.000000e+00 : f32
    %34 = vector.broadcast %cst_12 : f32 to vector<16x64xf32>
    %35 = arith.subf %34, %23 : vector<16x64xf32>
    %36 = tpu.iota {dimensions = array<i32: 0>} : vector<128x32xi32>
    %37 = tpu.iota {dimensions = array<i32: 1>} : vector<128x32xi32>
    %c5_i32 = arith.constant 5 : i32
    %38 = vector.broadcast %c5_i32 : i32 to vector<128x32xi32>
    %39 = arith.shrsi %36, %38 : vector<128x32xi32>
    %c3_i32_13 = arith.constant 3 : i32
    %40 = vector.broadcast %c3_i32_13 : i32 to vector<128x32xi32>
    %41 = arith.shrsi %37, %40 : vector<128x32xi32>
    %42 = arith.cmpi eq, %39, %41 : vector<128x32xi32>
    %cst_14 = arith.constant 1.000000e+00 : f32
    %cst_15 = arith.constant 0.000000e+00 : f32
    %43 = vector.broadcast %cst_14 : f32 to vector<128x32xf32>
    %44 = vector.broadcast %cst_15 : f32 to vector<128x32xf32>
    %45 = arith.select %42, %43, %44 : vector<128x32xi1>, vector<128x32xf32>
    %46 = tpu.iota {dimensions = array<i32: 0>} : vector<16x128xi32>
    %47 = tpu.iota {dimensions = array<i32: 1>} : vector<16x128xi32>
    %c3_i32_16 = arith.constant 3 : i32
    %48 = vector.broadcast %c3_i32_16 : i32 to vector<16x128xi32>
    %49 = arith.shrsi %46, %48 : vector<16x128xi32>
    %c31_i32 = arith.constant 31 : i32
    %50 = vector.broadcast %c31_i32 : i32 to vector<16x128xi32>
    %51 = arith.andi %47, %50 : vector<16x128xi32>
    %c4_i32_17 = arith.constant 4 : i32
    %52 = vector.broadcast %c4_i32_17 : i32 to vector<16x128xi32>
    %53 = arith.shrsi %51, %52 : vector<16x128xi32>
    %54 = arith.cmpi eq, %49, %53 : vector<16x128xi32>
    %cst_18 = arith.constant 1.000000e+00 : f32
    %cst_19 = arith.constant 0.000000e+00 : f32
    %55 = vector.broadcast %cst_18 : f32 to vector<16x128xf32>
    %56 = vector.broadcast %cst_19 : f32 to vector<16x128xf32>
    %57 = arith.select %54, %55, %56 : vector<16x128xi1>, vector<16x128xf32>
    %58 = tpu.iota {dimensions = array<i32: 0>} : vector<128x128xi32>
    %59 = tpu.iota {dimensions = array<i32: 1>} : vector<128x128xi32>
    %c4_i32_20 = arith.constant 4 : i32
    %60 = vector.broadcast %c4_i32_20 : i32 to vector<128x128xi32>
    %61 = arith.shrsi %58, %60 : vector<128x128xi32>
    %c4_i32_21 = arith.constant 4 : i32
    %62 = vector.broadcast %c4_i32_21 : i32 to vector<128x128xi32>
    %63 = arith.shrsi %59, %62 : vector<128x128xi32>
    %64 = arith.cmpi eq, %61, %63 : vector<128x128xi32>
    %cst_22 = arith.constant 1.000000e+00 : f32
    %cst_23 = arith.constant 0.000000e+00 : f32
    %65 = vector.broadcast %cst_22 : f32 to vector<128x128xf32>
    %66 = vector.broadcast %cst_23 : f32 to vector<128x128xf32>
    %67 = arith.select %64, %65, %66 : vector<128x128xi1>, vector<128x128xf32>
    %cst_24 = arith.constant 1.000000e+00 : f32
    %68 = vector.broadcast %cst_24 : f32 to vector<16x128xf32>
    %69 = arith.subf %68, %57 : vector<16x128xf32>
    %c0_25 = arith.constant 0 : index
    %c0_26 = arith.constant 0 : index
    %c0_27 = arith.constant 0 : index
    %70 = vector.load %arg2[%c0_25, %c0_26, %c0_27] : memref<2x32x384xbf16, #tpu.memory_space<vmem>>, vector<1x32x96xbf16>
    %71 = vector.shape_cast %70 : vector<1x32x96xbf16> to vector<32x96xbf16>
    %72 = arith.truncf %0 : vector<16x32xf32> to vector<16x32xbf16>
    %cst_28 = arith.constant dense<0.000000e+00> : vector<16x96xf32>
    %73 = tpu.matmul %72, %71, %cst_28 {dimension_numbers = #tpu.dot_dimension_numbers<[1], [0], [0], [1], [0, 0, 1, 1], [], []>} : vector<16x32xbf16>, vector<32x96xbf16>, vector<16x96xf32> -> vector<16x96xf32>
    %c0_29 = arith.constant 0 : index
    %c0_30 = arith.constant 0 : index
    %c0_31 = arith.constant 0 : index
    %74 = vector.load %arg3[%c0_29, %c0_30, %c0_31] : memref<2x16x128xf32, #tpu.memory_space<vmem>>, vector<1x1x96xf32>
    %75 = vector.shape_cast %74 : vector<1x1x96xf32> to vector<1x96xf32>
    %76 = vector.broadcast %75 : vector<1x96xf32> to vector<16x96xf32>
    %77 = arith.addf %73, %76 : vector<16x96xf32>
    %78 = vector.extract_strided_slice %77 {offsets = [0, 0], sizes = [16, 32], strides = [1, 1]} : vector<16x96xf32> to vector<16x32xf32>
    %79 = vector.extract_strided_slice %77 {offsets = [0, 32], sizes = [16, 32], strides = [1, 1]} : vector<16x96xf32> to vector<16x32xf32>
    %80 = vector.extract_strided_slice %77 {offsets = [0, 64], sizes = [16, 32], strides = [1, 1]} : vector<16x96xf32> to vector<16x32xf32>
    %81 = tpu.concatenate %79, %79, %79, %79 in 0 : vector<16x32xf32>, vector<16x32xf32>, vector<16x32xf32>, vector<16x32xf32> -> vector<64x32xf32>
    %82 = arith.mulf %81, %11 : vector<64x32xf32>
    %83 = tpu.concatenate %80, %80, %80, %80 in 0 : vector<16x32xf32>, vector<16x32xf32>, vector<16x32xf32>, vector<16x32xf32> -> vector<64x32xf32>
    %84 = arith.mulf %83, %11 : vector<64x32xf32>
    %cst_32 = arith.constant dense<0.000000e+00> : vector<16x64xf32>
    %85 = tpu.matmul %78, %82, %cst_32 {dimension_numbers = #tpu.dot_dimension_numbers<[1], [1], [0], [0], [0, 0, 1, 0], [], []>} : vector<16x32xf32>, vector<64x32xf32>, vector<16x64xf32> -> vector<16x64xf32>
    %cst_33 = arith.constant dense<0xFF800000> : vector<16xf32>
    %86 = vector.multi_reduction <maximumf>, %85, %cst_33 [1] : vector<16x64xf32> to vector<16xf32>
    %87 = vector.shape_cast %86 : vector<16xf32> to vector<16x1xf32>
    %88 = vector.broadcast %87 : vector<16x1xf32> to vector<16x64xf32>
    %89 = arith.subf %85, %88 : vector<16x64xf32>
    %90 = math.exp %89 : vector<16x64xf32>
    %91 = arith.mulf %90, %23 : vector<16x64xf32>
    %cst_34 = arith.constant dense<0.000000e+00> : vector<16x64xf32>
    %92 = tpu.matmul %91, %33, %cst_34 {dimension_numbers = #tpu.dot_dimension_numbers<[1], [0], [0], [1], [0, 0, 1, 1], [], []>} : vector<16x64xf32>, vector<64x64xf32>, vector<16x64xf32> -> vector<16x64xf32>
    %93 = arith.addf %92, %35 : vector<16x64xf32>
    %94 = tpu.reciprocal %93 {approx = true} : vector<16x64xf32> -> vector<16x64xf32>
    %95 = arith.mulf %91, %94 : vector<16x64xf32>
    %cst_35 = arith.constant dense<0.000000e+00> : vector<16x32xf32>
    %96 = tpu.matmul %95, %84, %cst_35 {dimension_numbers = #tpu.dot_dimension_numbers<[1], [0], [0], [1], [0, 0, 1, 1], [], []>} : vector<16x64xf32>, vector<64x32xf32>, vector<16x32xf32> -> vector<16x32xf32>
    %c0_36 = arith.constant 0 : index
    %c0_37 = arith.constant 0 : index
    %c96 = arith.constant 96 : index
    %97 = vector.load %arg2[%c0_36, %c0_37, %c96] : memref<2x32x384xbf16, #tpu.memory_space<vmem>>, vector<1x32x32xbf16>
    %98 = vector.shape_cast %97 : vector<1x32x32xbf16> to vector<32x32xbf16>
    %99 = arith.truncf %96 : vector<16x32xf32> to vector<16x32xbf16>
    %cst_38 = arith.constant dense<0.000000e+00> : vector<16x32xf32>
    %100 = tpu.matmul %99, %98, %cst_38 {dimension_numbers = #tpu.dot_dimension_numbers<[1], [0], [0], [1], [0, 0, 1, 1], [], []>} : vector<16x32xbf16>, vector<32x32xbf16>, vector<16x32xf32> -> vector<16x32xf32>
    %c0_39 = arith.constant 0 : index
    %c1 = arith.constant 1 : index
    %c0_40 = arith.constant 0 : index
    %101 = vector.load %arg3[%c0_39, %c1, %c0_40] : memref<2x16x128xf32, #tpu.memory_space<vmem>>, vector<1x1x32xf32>
    %102 = vector.shape_cast %101 : vector<1x1x32xf32> to vector<1x32xf32>
    %103 = vector.broadcast %102 : vector<1x32xf32> to vector<16x32xf32>
    %104 = arith.addf %100, %103 : vector<16x32xf32>
    %105 = arith.addf %0, %104 : vector<16x32xf32>
    %c0_41 = arith.constant 0 : index
    %c7 = arith.constant 7 : index
    %c0_42 = arith.constant 0 : index
    %106 = vector.load %arg3[%c0_41, %c7, %c0_42] : memref<2x16x128xf32, #tpu.memory_space<vmem>>, vector<1x1x32xf32>
    %107 = vector.shape_cast %106 : vector<1x1x32xf32> to vector<1x32xf32>
    %c0_43 = arith.constant 0 : index
    %c8 = arith.constant 8 : index
    %c0_44 = arith.constant 0 : index
    %108 = vector.load %arg3[%c0_43, %c8, %c0_44] : memref<2x16x128xf32, #tpu.memory_space<vmem>>, vector<1x1x32xf32>
    %109 = vector.shape_cast %108 : vector<1x1x32xf32> to vector<1x32xf32>
    %cst_45 = arith.constant dense<0.000000e+00> : vector<16xf32>
    %110 = vector.multi_reduction <add>, %105, %cst_45 [1] : vector<16x32xf32> to vector<16xf32>
    %111 = vector.shape_cast %110 : vector<16xf32> to vector<16x1xf32>
    %cst_46 = arith.constant 3.200000e+01 : f32
    %112 = vector.broadcast %cst_46 : f32 to vector<16x1xf32>
    %113 = arith.divf %111, %112 : vector<16x1xf32>
    %114 = arith.mulf %105, %105 : vector<16x32xf32>
    %cst_47 = arith.constant dense<0.000000e+00> : vector<16xf32>
    %115 = vector.multi_reduction <add>, %114, %cst_47 [1] : vector<16x32xf32> to vector<16xf32>
    %116 = vector.shape_cast %115 : vector<16xf32> to vector<16x1xf32>
    %cst_48 = arith.constant 3.200000e+01 : f32
    %117 = vector.broadcast %cst_48 : f32 to vector<16x1xf32>
    %118 = arith.divf %116, %117 : vector<16x1xf32>
    %119 = arith.mulf %113, %113 : vector<16x1xf32>
    %120 = arith.subf %118, %119 : vector<16x1xf32>
    %121 = vector.broadcast %113 : vector<16x1xf32> to vector<16x32xf32>
    %122 = arith.subf %105, %121 : vector<16x32xf32>
    %cst_49 = arith.constant 9.99999974E-6 : f32
    %123 = vector.broadcast %cst_49 : f32 to vector<16x1xf32>
    %124 = arith.addf %120, %123 : vector<16x1xf32>
    %125 = math.rsqrt %124 : vector<16x1xf32>
    %126 = vector.broadcast %125 : vector<16x1xf32> to vector<16x32xf32>
    %127 = arith.mulf %122, %126 : vector<16x32xf32>
    %128 = vector.broadcast %107 : vector<1x32xf32> to vector<16x32xf32>
    %129 = arith.mulf %127, %128 : vector<16x32xf32>
    %130 = vector.broadcast %109 : vector<1x32xf32> to vector<16x32xf32>
    %131 = arith.addf %129, %130 : vector<16x32xf32>
    %c0_50 = arith.constant 0 : index
    %c0_51 = arith.constant 0 : index
    %c128 = arith.constant 128 : index
    %132 = vector.load %arg2[%c0_50, %c0_51, %c128] : memref<2x32x384xbf16, #tpu.memory_space<vmem>>, vector<1x32x32xbf16>
    %133 = vector.shape_cast %132 : vector<1x32x32xbf16> to vector<32x32xbf16>
    %134 = arith.truncf %131 : vector<16x32xf32> to vector<16x32xbf16>
    %cst_52 = arith.constant dense<0.000000e+00> : vector<16x32xf32>
    %135 = tpu.matmul %134, %133, %cst_52 {dimension_numbers = #tpu.dot_dimension_numbers<[1], [0], [0], [1], [0, 0, 1, 1], [], []>} : vector<16x32xbf16>, vector<32x32xbf16>, vector<16x32xf32> -> vector<16x32xf32>
    %c0_53 = arith.constant 0 : index
    %c2 = arith.constant 2 : index
    %c0_54 = arith.constant 0 : index
    %136 = vector.load %arg3[%c0_53, %c2, %c0_54] : memref<2x16x128xf32, #tpu.memory_space<vmem>>, vector<1x1x32xf32>
    %137 = vector.shape_cast %136 : vector<1x1x32xf32> to vector<1x32xf32>
    %138 = vector.broadcast %137 : vector<1x32xf32> to vector<16x32xf32>
    %139 = arith.addf %135, %138 : vector<16x32xf32>
    %c0_55 = arith.constant 0 : index
    %c0_56 = arith.constant 0 : index
    %c160 = arith.constant 160 : index
    %140 = vector.load %arg2[%c0_55, %c0_56, %c160] : memref<2x32x384xbf16, #tpu.memory_space<vmem>>, vector<1x32x64xbf16>
    %141 = vector.shape_cast %140 : vector<1x32x64xbf16> to vector<32x64xbf16>
    %142 = arith.truncf %1 : vector<32x32xf32> to vector<32x32xbf16>
    %cst_57 = arith.constant dense<0.000000e+00> : vector<32x64xf32>
    %143 = tpu.matmul %142, %141, %cst_57 {dimension_numbers = #tpu.dot_dimension_numbers<[1], [0], [0], [1], [0, 0, 1, 1], [], []>} : vector<32x32xbf16>, vector<32x64xbf16>, vector<32x64xf32> -> vector<32x64xf32>
    %c0_58 = arith.constant 0 : index
    %c3 = arith.constant 3 : index
    %c0_59 = arith.constant 0 : index
    %144 = vector.load %arg3[%c0_58, %c3, %c0_59] : memref<2x16x128xf32, #tpu.memory_space<vmem>>, vector<1x1x64xf32>
    %145 = vector.shape_cast %144 : vector<1x1x64xf32> to vector<1x64xf32>
    %146 = vector.broadcast %145 : vector<1x64xf32> to vector<32x64xf32>
    %147 = arith.addf %143, %146 : vector<32x64xf32>
    %148 = vector.extract_strided_slice %147 {offsets = [0, 0], sizes = [32, 32], strides = [1, 1]} : vector<32x64xf32> to vector<32x32xf32>
    %149 = vector.extract_strided_slice %147 {offsets = [0, 32], sizes = [32, 32], strides = [1, 1]} : vector<32x64xf32> to vector<32x32xf32>
    %150 = tpu.concatenate %148, %148, %148, %148 in 0 : vector<32x32xf32>, vector<32x32xf32>, vector<32x32xf32>, vector<32x32xf32> -> vector<128x32xf32>
    %151 = arith.mulf %150, %45 : vector<128x32xf32>
    %152 = tpu.concatenate %149, %149, %149, %149 in 0 : vector<32x32xf32>, vector<32x32xf32>, vector<32x32xf32>, vector<32x32xf32> -> vector<128x32xf32>
    %153 = arith.mulf %152, %45 : vector<128x32xf32>
    %cst_60 = arith.constant dense<0.000000e+00> : vector<16x128xf32>
    %154 = tpu.matmul %139, %151, %cst_60 {dimension_numbers = #tpu.dot_dimension_numbers<[1], [1], [0], [0], [0, 0, 1, 0], [], []>} : vector<16x32xf32>, vector<128x32xf32>, vector<16x128xf32> -> vector<16x128xf32>
    %cst_61 = arith.constant dense<0xFF800000> : vector<16xf32>
    %155 = vector.multi_reduction <maximumf>, %154, %cst_61 [1] : vector<16x128xf32> to vector<16xf32>
    %156 = vector.shape_cast %155 : vector<16xf32> to vector<16x1xf32>
    %157 = vector.broadcast %156 : vector<16x1xf32> to vector<16x128xf32>
    %158 = arith.subf %154, %157 : vector<16x128xf32>
    %159 = math.exp %158 : vector<16x128xf32>
    %160 = arith.mulf %159, %57 : vector<16x128xf32>
    %cst_62 = arith.constant dense<0.000000e+00> : vector<16x128xf32>
    %161 = tpu.matmul %160, %67, %cst_62 {dimension_numbers = #tpu.dot_dimension_numbers<[1], [0], [0], [1], [0, 0, 1, 1], [], []>} : vector<16x128xf32>, vector<128x128xf32>, vector<16x128xf32> -> vector<16x128xf32>
    %162 = arith.addf %161, %69 : vector<16x128xf32>
    %163 = tpu.reciprocal %162 {approx = true} : vector<16x128xf32> -> vector<16x128xf32>
    %164 = arith.mulf %160, %163 : vector<16x128xf32>
    %cst_63 = arith.constant dense<0.000000e+00> : vector<16x32xf32>
    %165 = tpu.matmul %164, %153, %cst_63 {dimension_numbers = #tpu.dot_dimension_numbers<[1], [0], [0], [1], [0, 0, 1, 1], [], []>} : vector<16x128xf32>, vector<128x32xf32>, vector<16x32xf32> -> vector<16x32xf32>
    %c0_64 = arith.constant 0 : index
    %c0_65 = arith.constant 0 : index
    %c224 = arith.constant 224 : index
    %166 = vector.load %arg2[%c0_64, %c0_65, %c224] : memref<2x32x384xbf16, #tpu.memory_space<vmem>>, vector<1x32x32xbf16>
    %167 = vector.shape_cast %166 : vector<1x32x32xbf16> to vector<32x32xbf16>
    %168 = arith.truncf %165 : vector<16x32xf32> to vector<16x32xbf16>
    %cst_66 = arith.constant dense<0.000000e+00> : vector<16x32xf32>
    %169 = tpu.matmul %168, %167, %cst_66 {dimension_numbers = #tpu.dot_dimension_numbers<[1], [0], [0], [1], [0, 0, 1, 1], [], []>} : vector<16x32xbf16>, vector<32x32xbf16>, vector<16x32xf32> -> vector<16x32xf32>
    %c0_67 = arith.constant 0 : index
    %c4 = arith.constant 4 : index
    %c0_68 = arith.constant 0 : index
    %170 = vector.load %arg3[%c0_67, %c4, %c0_68] : memref<2x16x128xf32, #tpu.memory_space<vmem>>, vector<1x1x32xf32>
    %171 = vector.shape_cast %170 : vector<1x1x32xf32> to vector<1x32xf32>
    %172 = vector.broadcast %171 : vector<1x32xf32> to vector<16x32xf32>
    %173 = arith.addf %169, %172 : vector<16x32xf32>
    %174 = arith.addf %131, %173 : vector<16x32xf32>
    %c0_69 = arith.constant 0 : index
    %c9 = arith.constant 9 : index
    %c0_70 = arith.constant 0 : index
    %175 = vector.load %arg3[%c0_69, %c9, %c0_70] : memref<2x16x128xf32, #tpu.memory_space<vmem>>, vector<1x1x32xf32>
    %176 = vector.shape_cast %175 : vector<1x1x32xf32> to vector<1x32xf32>
    %c0_71 = arith.constant 0 : index
    %c10 = arith.constant 10 : index
    %c0_72 = arith.constant 0 : index
    %177 = vector.load %arg3[%c0_71, %c10, %c0_72] : memref<2x16x128xf32, #tpu.memory_space<vmem>>, vector<1x1x32xf32>
    %178 = vector.shape_cast %177 : vector<1x1x32xf32> to vector<1x32xf32>
    %cst_73 = arith.constant dense<0.000000e+00> : vector<16xf32>
    %179 = vector.multi_reduction <add>, %174, %cst_73 [1] : vector<16x32xf32> to vector<16xf32>
    %180 = vector.shape_cast %179 : vector<16xf32> to vector<16x1xf32>
    %cst_74 = arith.constant 3.200000e+01 : f32
    %181 = vector.broadcast %cst_74 : f32 to vector<16x1xf32>
    %182 = arith.divf %180, %181 : vector<16x1xf32>
    %183 = arith.mulf %174, %174 : vector<16x32xf32>
    %cst_75 = arith.constant dense<0.000000e+00> : vector<16xf32>
    %184 = vector.multi_reduction <add>, %183, %cst_75 [1] : vector<16x32xf32> to vector<16xf32>
    %185 = vector.shape_cast %184 : vector<16xf32> to vector<16x1xf32>
    %cst_76 = arith.constant 3.200000e+01 : f32
    %186 = vector.broadcast %cst_76 : f32 to vector<16x1xf32>
    %187 = arith.divf %185, %186 : vector<16x1xf32>
    %188 = arith.mulf %182, %182 : vector<16x1xf32>
    %189 = arith.subf %187, %188 : vector<16x1xf32>
    %190 = vector.broadcast %182 : vector<16x1xf32> to vector<16x32xf32>
    %191 = arith.subf %174, %190 : vector<16x32xf32>
    %cst_77 = arith.constant 9.99999974E-6 : f32
    %192 = vector.broadcast %cst_77 : f32 to vector<16x1xf32>
    %193 = arith.addf %189, %192 : vector<16x1xf32>
    %194 = math.rsqrt %193 : vector<16x1xf32>
    %195 = vector.broadcast %194 : vector<16x1xf32> to vector<16x32xf32>
    %196 = arith.mulf %191, %195 : vector<16x32xf32>
    %197 = vector.broadcast %176 : vector<1x32xf32> to vector<16x32xf32>
    %198 = arith.mulf %196, %197 : vector<16x32xf32>
    %199 = vector.broadcast %178 : vector<1x32xf32> to vector<16x32xf32>
    %200 = arith.addf %198, %199 : vector<16x32xf32>
    %c0_78 = arith.constant 0 : index
    %c0_79 = arith.constant 0 : index
    %c256 = arith.constant 256 : index
    %201 = vector.load %arg2[%c0_78, %c0_79, %c256] : memref<2x32x384xbf16, #tpu.memory_space<vmem>>, vector<1x32x64xbf16>
    %202 = vector.shape_cast %201 : vector<1x32x64xbf16> to vector<32x64xbf16>
    %203 = arith.truncf %200 : vector<16x32xf32> to vector<16x32xbf16>
    %cst_80 = arith.constant dense<0.000000e+00> : vector<16x64xf32>
    %204 = tpu.matmul %203, %202, %cst_80 {dimension_numbers = #tpu.dot_dimension_numbers<[1], [0], [0], [1], [0, 0, 1, 1], [], []>} : vector<16x32xbf16>, vector<32x64xbf16>, vector<16x64xf32> -> vector<16x64xf32>
    %c0_81 = arith.constant 0 : index
    %c5 = arith.constant 5 : index
    %c0_82 = arith.constant 0 : index
    %205 = vector.load %arg3[%c0_81, %c5, %c0_82] : memref<2x16x128xf32, #tpu.memory_space<vmem>>, vector<1x1x64xf32>
    %206 = vector.shape_cast %205 : vector<1x1x64xf32> to vector<1x64xf32>
    %207 = vector.broadcast %206 : vector<1x64xf32> to vector<16x64xf32>
    %208 = arith.addf %204, %207 : vector<16x64xf32>
    %cst_83 = arith.constant 0.000000e+00 : f32
    %209 = vector.broadcast %cst_83 : f32 to vector<16x64xf32>
    %210 = arith.maximumf %208, %209 : vector<16x64xf32>
    %c0_84 = arith.constant 0 : index
    %c0_85 = arith.constant 0 : index
    %c320 = arith.constant 320 : index
    %211 = vector.load %arg2[%c0_84, %c0_85, %c320] : memref<2x32x384xbf16, #tpu.memory_space<vmem>>, vector<1x32x64xbf16>
    %212 = vector.shape_cast %211 : vector<1x32x64xbf16> to vector<32x64xbf16>
    %213 = arith.truncf %210 : vector<16x64xf32> to vector<16x64xbf16>
    %cst_86 = arith.constant dense<0.000000e+00> : vector<16x32xf32>
    %214 = tpu.matmul %213, %212, %cst_86 {dimension_numbers = #tpu.dot_dimension_numbers<[1], [1], [0], [0], [0, 0, 1, 0], [], []>} : vector<16x64xbf16>, vector<32x64xbf16>, vector<16x32xf32> -> vector<16x32xf32>
    %c0_87 = arith.constant 0 : index
    %c6 = arith.constant 6 : index
    %c0_88 = arith.constant 0 : index
    %215 = vector.load %arg3[%c0_87, %c6, %c0_88] : memref<2x16x128xf32, #tpu.memory_space<vmem>>, vector<1x1x32xf32>
    %216 = vector.shape_cast %215 : vector<1x1x32xf32> to vector<1x32xf32>
    %217 = vector.broadcast %216 : vector<1x32xf32> to vector<16x32xf32>
    %218 = arith.addf %214, %217 : vector<16x32xf32>
    %219 = arith.addf %200, %218 : vector<16x32xf32>
    %c0_89 = arith.constant 0 : index
    %c11 = arith.constant 11 : index
    %c0_90 = arith.constant 0 : index
    %220 = vector.load %arg3[%c0_89, %c11, %c0_90] : memref<2x16x128xf32, #tpu.memory_space<vmem>>, vector<1x1x32xf32>
    %221 = vector.shape_cast %220 : vector<1x1x32xf32> to vector<1x32xf32>
    %c0_91 = arith.constant 0 : index
    %c12 = arith.constant 12 : index
    %c0_92 = arith.constant 0 : index
    %222 = vector.load %arg3[%c0_91, %c12, %c0_92] : memref<2x16x128xf32, #tpu.memory_space<vmem>>, vector<1x1x32xf32>
    %223 = vector.shape_cast %222 : vector<1x1x32xf32> to vector<1x32xf32>
    %cst_93 = arith.constant dense<0.000000e+00> : vector<16xf32>
    %224 = vector.multi_reduction <add>, %219, %cst_93 [1] : vector<16x32xf32> to vector<16xf32>
    %225 = vector.shape_cast %224 : vector<16xf32> to vector<16x1xf32>
    %cst_94 = arith.constant 3.200000e+01 : f32
    %226 = vector.broadcast %cst_94 : f32 to vector<16x1xf32>
    %227 = arith.divf %225, %226 : vector<16x1xf32>
    %228 = arith.mulf %219, %219 : vector<16x32xf32>
    %cst_95 = arith.constant dense<0.000000e+00> : vector<16xf32>
    %229 = vector.multi_reduction <add>, %228, %cst_95 [1] : vector<16x32xf32> to vector<16xf32>
    %230 = vector.shape_cast %229 : vector<16xf32> to vector<16x1xf32>
    %cst_96 = arith.constant 3.200000e+01 : f32
    %231 = vector.broadcast %cst_96 : f32 to vector<16x1xf32>
    %232 = arith.divf %230, %231 : vector<16x1xf32>
    %233 = arith.mulf %227, %227 : vector<16x1xf32>
    %234 = arith.subf %232, %233 : vector<16x1xf32>
    %235 = vector.broadcast %227 : vector<16x1xf32> to vector<16x32xf32>
    %236 = arith.subf %219, %235 : vector<16x32xf32>
    %cst_97 = arith.constant 9.99999974E-6 : f32
    %237 = vector.broadcast %cst_97 : f32 to vector<16x1xf32>
    %238 = arith.addf %234, %237 : vector<16x1xf32>
    %239 = math.rsqrt %238 : vector<16x1xf32>
    %240 = vector.broadcast %239 : vector<16x1xf32> to vector<16x32xf32>
    %241 = arith.mulf %236, %240 : vector<16x32xf32>
    %242 = vector.broadcast %221 : vector<1x32xf32> to vector<16x32xf32>
    %243 = arith.mulf %241, %242 : vector<16x32xf32>
    %244 = vector.broadcast %223 : vector<1x32xf32> to vector<16x32xf32>
    %245 = arith.addf %243, %244 : vector<16x32xf32>
    %c1_98 = arith.constant 1 : index
    %c0_99 = arith.constant 0 : index
    %c0_100 = arith.constant 0 : index
    %246 = vector.load %arg2[%c1_98, %c0_99, %c0_100] : memref<2x32x384xbf16, #tpu.memory_space<vmem>>, vector<1x32x96xbf16>
    %247 = vector.shape_cast %246 : vector<1x32x96xbf16> to vector<32x96xbf16>
    %248 = arith.truncf %245 : vector<16x32xf32> to vector<16x32xbf16>
    %cst_101 = arith.constant dense<0.000000e+00> : vector<16x96xf32>
    %249 = tpu.matmul %248, %247, %cst_101 {dimension_numbers = #tpu.dot_dimension_numbers<[1], [0], [0], [1], [0, 0, 1, 1], [], []>} : vector<16x32xbf16>, vector<32x96xbf16>, vector<16x96xf32> -> vector<16x96xf32>
    %c1_102 = arith.constant 1 : index
    %c0_103 = arith.constant 0 : index
    %c0_104 = arith.constant 0 : index
    %250 = vector.load %arg3[%c1_102, %c0_103, %c0_104] : memref<2x16x128xf32, #tpu.memory_space<vmem>>, vector<1x1x96xf32>
    %251 = vector.shape_cast %250 : vector<1x1x96xf32> to vector<1x96xf32>
    %252 = vector.broadcast %251 : vector<1x96xf32> to vector<16x96xf32>
    %253 = arith.addf %249, %252 : vector<16x96xf32>
    %254 = vector.extract_strided_slice %253 {offsets = [0, 0], sizes = [16, 32], strides = [1, 1]} : vector<16x96xf32> to vector<16x32xf32>
    %255 = vector.extract_strided_slice %253 {offsets = [0, 32], sizes = [16, 32], strides = [1, 1]} : vector<16x96xf32> to vector<16x32xf32>
    %256 = vector.extract_strided_slice %253 {offsets = [0, 64], sizes = [16, 32], strides = [1, 1]} : vector<16x96xf32> to vector<16x32xf32>
    %257 = tpu.concatenate %255, %255, %255, %255 in 0 : vector<16x32xf32>, vector<16x32xf32>, vector<16x32xf32>, vector<16x32xf32> -> vector<64x32xf32>
    %258 = arith.mulf %257, %11 : vector<64x32xf32>
    %259 = tpu.concatenate %256, %256, %256, %256 in 0 : vector<16x32xf32>, vector<16x32xf32>, vector<16x32xf32>, vector<16x32xf32> -> vector<64x32xf32>
    %260 = arith.mulf %259, %11 : vector<64x32xf32>
    %cst_105 = arith.constant dense<0.000000e+00> : vector<16x64xf32>
    %261 = tpu.matmul %254, %258, %cst_105 {dimension_numbers = #tpu.dot_dimension_numbers<[1], [1], [0], [0], [0, 0, 1, 0], [], []>} : vector<16x32xf32>, vector<64x32xf32>, vector<16x64xf32> -> vector<16x64xf32>
    %cst_106 = arith.constant dense<0xFF800000> : vector<16xf32>
    %262 = vector.multi_reduction <maximumf>, %261, %cst_106 [1] : vector<16x64xf32> to vector<16xf32>
    %263 = vector.shape_cast %262 : vector<16xf32> to vector<16x1xf32>
    %264 = vector.broadcast %263 : vector<16x1xf32> to vector<16x64xf32>
    %265 = arith.subf %261, %264 : vector<16x64xf32>
    %266 = math.exp %265 : vector<16x64xf32>
    %267 = arith.mulf %266, %23 : vector<16x64xf32>
    %cst_107 = arith.constant dense<0.000000e+00> : vector<16x64xf32>
    %268 = tpu.matmul %267, %33, %cst_107 {dimension_numbers = #tpu.dot_dimension_numbers<[1], [0], [0], [1], [0, 0, 1, 1], [], []>} : vector<16x64xf32>, vector<64x64xf32>, vector<16x64xf32> -> vector<16x64xf32>
    %269 = arith.addf %268, %35 : vector<16x64xf32>
    %270 = tpu.reciprocal %269 {approx = true} : vector<16x64xf32> -> vector<16x64xf32>
    %271 = arith.mulf %267, %270 : vector<16x64xf32>
    %cst_108 = arith.constant dense<0.000000e+00> : vector<16x32xf32>
    %272 = tpu.matmul %271, %260, %cst_108 {dimension_numbers = #tpu.dot_dimension_numbers<[1], [0], [0], [1], [0, 0, 1, 1], [], []>} : vector<16x64xf32>, vector<64x32xf32>, vector<16x32xf32> -> vector<16x32xf32>
    %c1_109 = arith.constant 1 : index
    %c0_110 = arith.constant 0 : index
    %c96_111 = arith.constant 96 : index
    %273 = vector.load %arg2[%c1_109, %c0_110, %c96_111] : memref<2x32x384xbf16, #tpu.memory_space<vmem>>, vector<1x32x32xbf16>
    %274 = vector.shape_cast %273 : vector<1x32x32xbf16> to vector<32x32xbf16>
    %275 = arith.truncf %272 : vector<16x32xf32> to vector<16x32xbf16>
    %cst_112 = arith.constant dense<0.000000e+00> : vector<16x32xf32>
    %276 = tpu.matmul %275, %274, %cst_112 {dimension_numbers = #tpu.dot_dimension_numbers<[1], [0], [0], [1], [0, 0, 1, 1], [], []>} : vector<16x32xbf16>, vector<32x32xbf16>, vector<16x32xf32> -> vector<16x32xf32>
    %c1_113 = arith.constant 1 : index
    %c1_114 = arith.constant 1 : index
    %c0_115 = arith.constant 0 : index
    %277 = vector.load %arg3[%c1_113, %c1_114, %c0_115] : memref<2x16x128xf32, #tpu.memory_space<vmem>>, vector<1x1x32xf32>
    %278 = vector.shape_cast %277 : vector<1x1x32xf32> to vector<1x32xf32>
    %279 = vector.broadcast %278 : vector<1x32xf32> to vector<16x32xf32>
    %280 = arith.addf %276, %279 : vector<16x32xf32>
    %281 = arith.addf %245, %280 : vector<16x32xf32>
    %c1_116 = arith.constant 1 : index
    %c7_117 = arith.constant 7 : index
    %c0_118 = arith.constant 0 : index
    %282 = vector.load %arg3[%c1_116, %c7_117, %c0_118] : memref<2x16x128xf32, #tpu.memory_space<vmem>>, vector<1x1x32xf32>
    %283 = vector.shape_cast %282 : vector<1x1x32xf32> to vector<1x32xf32>
    %c1_119 = arith.constant 1 : index
    %c8_120 = arith.constant 8 : index
    %c0_121 = arith.constant 0 : index
    %284 = vector.load %arg3[%c1_119, %c8_120, %c0_121] : memref<2x16x128xf32, #tpu.memory_space<vmem>>, vector<1x1x32xf32>
    %285 = vector.shape_cast %284 : vector<1x1x32xf32> to vector<1x32xf32>
    %cst_122 = arith.constant dense<0.000000e+00> : vector<16xf32>
    %286 = vector.multi_reduction <add>, %281, %cst_122 [1] : vector<16x32xf32> to vector<16xf32>
    %287 = vector.shape_cast %286 : vector<16xf32> to vector<16x1xf32>
    %cst_123 = arith.constant 3.200000e+01 : f32
    %288 = vector.broadcast %cst_123 : f32 to vector<16x1xf32>
    %289 = arith.divf %287, %288 : vector<16x1xf32>
    %290 = arith.mulf %281, %281 : vector<16x32xf32>
    %cst_124 = arith.constant dense<0.000000e+00> : vector<16xf32>
    %291 = vector.multi_reduction <add>, %290, %cst_124 [1] : vector<16x32xf32> to vector<16xf32>
    %292 = vector.shape_cast %291 : vector<16xf32> to vector<16x1xf32>
    %cst_125 = arith.constant 3.200000e+01 : f32
    %293 = vector.broadcast %cst_125 : f32 to vector<16x1xf32>
    %294 = arith.divf %292, %293 : vector<16x1xf32>
    %295 = arith.mulf %289, %289 : vector<16x1xf32>
    %296 = arith.subf %294, %295 : vector<16x1xf32>
    %297 = vector.broadcast %289 : vector<16x1xf32> to vector<16x32xf32>
    %298 = arith.subf %281, %297 : vector<16x32xf32>
    %cst_126 = arith.constant 9.99999974E-6 : f32
    %299 = vector.broadcast %cst_126 : f32 to vector<16x1xf32>
    %300 = arith.addf %296, %299 : vector<16x1xf32>
    %301 = math.rsqrt %300 : vector<16x1xf32>
    %302 = vector.broadcast %301 : vector<16x1xf32> to vector<16x32xf32>
    %303 = arith.mulf %298, %302 : vector<16x32xf32>
    %304 = vector.broadcast %283 : vector<1x32xf32> to vector<16x32xf32>
    %305 = arith.mulf %303, %304 : vector<16x32xf32>
    %306 = vector.broadcast %285 : vector<1x32xf32> to vector<16x32xf32>
    %307 = arith.addf %305, %306 : vector<16x32xf32>
    %c1_127 = arith.constant 1 : index
    %c0_128 = arith.constant 0 : index
    %c128_129 = arith.constant 128 : index
    %308 = vector.load %arg2[%c1_127, %c0_128, %c128_129] : memref<2x32x384xbf16, #tpu.memory_space<vmem>>, vector<1x32x32xbf16>
    %309 = vector.shape_cast %308 : vector<1x32x32xbf16> to vector<32x32xbf16>
    %310 = arith.truncf %307 : vector<16x32xf32> to vector<16x32xbf16>
    %cst_130 = arith.constant dense<0.000000e+00> : vector<16x32xf32>
    %311 = tpu.matmul %310, %309, %cst_130 {dimension_numbers = #tpu.dot_dimension_numbers<[1], [0], [0], [1], [0, 0, 1, 1], [], []>} : vector<16x32xbf16>, vector<32x32xbf16>, vector<16x32xf32> -> vector<16x32xf32>
    %c1_131 = arith.constant 1 : index
    %c2_132 = arith.constant 2 : index
    %c0_133 = arith.constant 0 : index
    %312 = vector.load %arg3[%c1_131, %c2_132, %c0_133] : memref<2x16x128xf32, #tpu.memory_space<vmem>>, vector<1x1x32xf32>
    %313 = vector.shape_cast %312 : vector<1x1x32xf32> to vector<1x32xf32>
    %314 = vector.broadcast %313 : vector<1x32xf32> to vector<16x32xf32>
    %315 = arith.addf %311, %314 : vector<16x32xf32>
    %c1_134 = arith.constant 1 : index
    %c0_135 = arith.constant 0 : index
    %c160_136 = arith.constant 160 : index
    %316 = vector.load %arg2[%c1_134, %c0_135, %c160_136] : memref<2x32x384xbf16, #tpu.memory_space<vmem>>, vector<1x32x64xbf16>
    %317 = vector.shape_cast %316 : vector<1x32x64xbf16> to vector<32x64xbf16>
    %318 = arith.truncf %1 : vector<32x32xf32> to vector<32x32xbf16>
    %cst_137 = arith.constant dense<0.000000e+00> : vector<32x64xf32>
    %319 = tpu.matmul %318, %317, %cst_137 {dimension_numbers = #tpu.dot_dimension_numbers<[1], [0], [0], [1], [0, 0, 1, 1], [], []>} : vector<32x32xbf16>, vector<32x64xbf16>, vector<32x64xf32> -> vector<32x64xf32>
    %c1_138 = arith.constant 1 : index
    %c3_139 = arith.constant 3 : index
    %c0_140 = arith.constant 0 : index
    %320 = vector.load %arg3[%c1_138, %c3_139, %c0_140] : memref<2x16x128xf32, #tpu.memory_space<vmem>>, vector<1x1x64xf32>
    %321 = vector.shape_cast %320 : vector<1x1x64xf32> to vector<1x64xf32>
    %322 = vector.broadcast %321 : vector<1x64xf32> to vector<32x64xf32>
    %323 = arith.addf %319, %322 : vector<32x64xf32>
    %324 = vector.extract_strided_slice %323 {offsets = [0, 0], sizes = [32, 32], strides = [1, 1]} : vector<32x64xf32> to vector<32x32xf32>
    %325 = vector.extract_strided_slice %323 {offsets = [0, 32], sizes = [32, 32], strides = [1, 1]} : vector<32x64xf32> to vector<32x32xf32>
    %326 = tpu.concatenate %324, %324, %324, %324 in 0 : vector<32x32xf32>, vector<32x32xf32>, vector<32x32xf32>, vector<32x32xf32> -> vector<128x32xf32>
    %327 = arith.mulf %326, %45 : vector<128x32xf32>
    %328 = tpu.concatenate %325, %325, %325, %325 in 0 : vector<32x32xf32>, vector<32x32xf32>, vector<32x32xf32>, vector<32x32xf32> -> vector<128x32xf32>
    %329 = arith.mulf %328, %45 : vector<128x32xf32>
    %cst_141 = arith.constant dense<0.000000e+00> : vector<16x128xf32>
    %330 = tpu.matmul %315, %327, %cst_141 {dimension_numbers = #tpu.dot_dimension_numbers<[1], [1], [0], [0], [0, 0, 1, 0], [], []>} : vector<16x32xf32>, vector<128x32xf32>, vector<16x128xf32> -> vector<16x128xf32>
    %cst_142 = arith.constant dense<0xFF800000> : vector<16xf32>
    %331 = vector.multi_reduction <maximumf>, %330, %cst_142 [1] : vector<16x128xf32> to vector<16xf32>
    %332 = vector.shape_cast %331 : vector<16xf32> to vector<16x1xf32>
    %333 = vector.broadcast %332 : vector<16x1xf32> to vector<16x128xf32>
    %334 = arith.subf %330, %333 : vector<16x128xf32>
    %335 = math.exp %334 : vector<16x128xf32>
    %336 = arith.mulf %335, %57 : vector<16x128xf32>
    %cst_143 = arith.constant dense<0.000000e+00> : vector<16x128xf32>
    %337 = tpu.matmul %336, %67, %cst_143 {dimension_numbers = #tpu.dot_dimension_numbers<[1], [0], [0], [1], [0, 0, 1, 1], [], []>} : vector<16x128xf32>, vector<128x128xf32>, vector<16x128xf32> -> vector<16x128xf32>
    %338 = arith.addf %337, %69 : vector<16x128xf32>
    %339 = tpu.reciprocal %338 {approx = true} : vector<16x128xf32> -> vector<16x128xf32>
    %340 = arith.mulf %336, %339 : vector<16x128xf32>
    %cst_144 = arith.constant dense<0.000000e+00> : vector<16x32xf32>
    %341 = tpu.matmul %340, %329, %cst_144 {dimension_numbers = #tpu.dot_dimension_numbers<[1], [0], [0], [1], [0, 0, 1, 1], [], []>} : vector<16x128xf32>, vector<128x32xf32>, vector<16x32xf32> -> vector<16x32xf32>
    %c1_145 = arith.constant 1 : index
    %c0_146 = arith.constant 0 : index
    %c224_147 = arith.constant 224 : index
    %342 = vector.load %arg2[%c1_145, %c0_146, %c224_147] : memref<2x32x384xbf16, #tpu.memory_space<vmem>>, vector<1x32x32xbf16>
    %343 = vector.shape_cast %342 : vector<1x32x32xbf16> to vector<32x32xbf16>
    %344 = arith.truncf %341 : vector<16x32xf32> to vector<16x32xbf16>
    %cst_148 = arith.constant dense<0.000000e+00> : vector<16x32xf32>
    %345 = tpu.matmul %344, %343, %cst_148 {dimension_numbers = #tpu.dot_dimension_numbers<[1], [0], [0], [1], [0, 0, 1, 1], [], []>} : vector<16x32xbf16>, vector<32x32xbf16>, vector<16x32xf32> -> vector<16x32xf32>
    %c1_149 = arith.constant 1 : index
    %c4_150 = arith.constant 4 : index
    %c0_151 = arith.constant 0 : index
    %346 = vector.load %arg3[%c1_149, %c4_150, %c0_151] : memref<2x16x128xf32, #tpu.memory_space<vmem>>, vector<1x1x32xf32>
    %347 = vector.shape_cast %346 : vector<1x1x32xf32> to vector<1x32xf32>
    %348 = vector.broadcast %347 : vector<1x32xf32> to vector<16x32xf32>
    %349 = arith.addf %345, %348 : vector<16x32xf32>
    %350 = arith.addf %307, %349 : vector<16x32xf32>
    %c1_152 = arith.constant 1 : index
    %c9_153 = arith.constant 9 : index
    %c0_154 = arith.constant 0 : index
    %351 = vector.load %arg3[%c1_152, %c9_153, %c0_154] : memref<2x16x128xf32, #tpu.memory_space<vmem>>, vector<1x1x32xf32>
    %352 = vector.shape_cast %351 : vector<1x1x32xf32> to vector<1x32xf32>
    %c1_155 = arith.constant 1 : index
    %c10_156 = arith.constant 10 : index
    %c0_157 = arith.constant 0 : index
    %353 = vector.load %arg3[%c1_155, %c10_156, %c0_157] : memref<2x16x128xf32, #tpu.memory_space<vmem>>, vector<1x1x32xf32>
    %354 = vector.shape_cast %353 : vector<1x1x32xf32> to vector<1x32xf32>
    %cst_158 = arith.constant dense<0.000000e+00> : vector<16xf32>
    %355 = vector.multi_reduction <add>, %350, %cst_158 [1] : vector<16x32xf32> to vector<16xf32>
    %356 = vector.shape_cast %355 : vector<16xf32> to vector<16x1xf32>
    %cst_159 = arith.constant 3.200000e+01 : f32
    %357 = vector.broadcast %cst_159 : f32 to vector<16x1xf32>
    %358 = arith.divf %356, %357 : vector<16x1xf32>
    %359 = arith.mulf %350, %350 : vector<16x32xf32>
    %cst_160 = arith.constant dense<0.000000e+00> : vector<16xf32>
    %360 = vector.multi_reduction <add>, %359, %cst_160 [1] : vector<16x32xf32> to vector<16xf32>
    %361 = vector.shape_cast %360 : vector<16xf32> to vector<16x1xf32>
    %cst_161 = arith.constant 3.200000e+01 : f32
    %362 = vector.broadcast %cst_161 : f32 to vector<16x1xf32>
    %363 = arith.divf %361, %362 : vector<16x1xf32>
    %364 = arith.mulf %358, %358 : vector<16x1xf32>
    %365 = arith.subf %363, %364 : vector<16x1xf32>
    %366 = vector.broadcast %358 : vector<16x1xf32> to vector<16x32xf32>
    %367 = arith.subf %350, %366 : vector<16x32xf32>
    %cst_162 = arith.constant 9.99999974E-6 : f32
    %368 = vector.broadcast %cst_162 : f32 to vector<16x1xf32>
    %369 = arith.addf %365, %368 : vector<16x1xf32>
    %370 = math.rsqrt %369 : vector<16x1xf32>
    %371 = vector.broadcast %370 : vector<16x1xf32> to vector<16x32xf32>
    %372 = arith.mulf %367, %371 : vector<16x32xf32>
    %373 = vector.broadcast %352 : vector<1x32xf32> to vector<16x32xf32>
    %374 = arith.mulf %372, %373 : vector<16x32xf32>
    %375 = vector.broadcast %354 : vector<1x32xf32> to vector<16x32xf32>
    %376 = arith.addf %374, %375 : vector<16x32xf32>
    %c1_163 = arith.constant 1 : index
    %c0_164 = arith.constant 0 : index
    %c256_165 = arith.constant 256 : index
    %377 = vector.load %arg2[%c1_163, %c0_164, %c256_165] : memref<2x32x384xbf16, #tpu.memory_space<vmem>>, vector<1x32x64xbf16>
    %378 = vector.shape_cast %377 : vector<1x32x64xbf16> to vector<32x64xbf16>
    %379 = arith.truncf %376 : vector<16x32xf32> to vector<16x32xbf16>
    %cst_166 = arith.constant dense<0.000000e+00> : vector<16x64xf32>
    %380 = tpu.matmul %379, %378, %cst_166 {dimension_numbers = #tpu.dot_dimension_numbers<[1], [0], [0], [1], [0, 0, 1, 1], [], []>} : vector<16x32xbf16>, vector<32x64xbf16>, vector<16x64xf32> -> vector<16x64xf32>
    %c1_167 = arith.constant 1 : index
    %c5_168 = arith.constant 5 : index
    %c0_169 = arith.constant 0 : index
    %381 = vector.load %arg3[%c1_167, %c5_168, %c0_169] : memref<2x16x128xf32, #tpu.memory_space<vmem>>, vector<1x1x64xf32>
    %382 = vector.shape_cast %381 : vector<1x1x64xf32> to vector<1x64xf32>
    %383 = vector.broadcast %382 : vector<1x64xf32> to vector<16x64xf32>
    %384 = arith.addf %380, %383 : vector<16x64xf32>
    %cst_170 = arith.constant 0.000000e+00 : f32
    %385 = vector.broadcast %cst_170 : f32 to vector<16x64xf32>
    %386 = arith.maximumf %384, %385 : vector<16x64xf32>
    %c1_171 = arith.constant 1 : index
    %c0_172 = arith.constant 0 : index
    %c320_173 = arith.constant 320 : index
    %387 = vector.load %arg2[%c1_171, %c0_172, %c320_173] : memref<2x32x384xbf16, #tpu.memory_space<vmem>>, vector<1x32x64xbf16>
    %388 = vector.shape_cast %387 : vector<1x32x64xbf16> to vector<32x64xbf16>
    %389 = arith.truncf %386 : vector<16x64xf32> to vector<16x64xbf16>
    %cst_174 = arith.constant dense<0.000000e+00> : vector<16x32xf32>
    %390 = tpu.matmul %389, %388, %cst_174 {dimension_numbers = #tpu.dot_dimension_numbers<[1], [1], [0], [0], [0, 0, 1, 0], [], []>} : vector<16x64xbf16>, vector<32x64xbf16>, vector<16x32xf32> -> vector<16x32xf32>
    %c1_175 = arith.constant 1 : index
    %c6_176 = arith.constant 6 : index
    %c0_177 = arith.constant 0 : index
    %391 = vector.load %arg3[%c1_175, %c6_176, %c0_177] : memref<2x16x128xf32, #tpu.memory_space<vmem>>, vector<1x1x32xf32>
    %392 = vector.shape_cast %391 : vector<1x1x32xf32> to vector<1x32xf32>
    %393 = vector.broadcast %392 : vector<1x32xf32> to vector<16x32xf32>
    %394 = arith.addf %390, %393 : vector<16x32xf32>
    %395 = arith.addf %376, %394 : vector<16x32xf32>
    %c1_178 = arith.constant 1 : index
    %c11_179 = arith.constant 11 : index
    %c0_180 = arith.constant 0 : index
    %396 = vector.load %arg3[%c1_178, %c11_179, %c0_180] : memref<2x16x128xf32, #tpu.memory_space<vmem>>, vector<1x1x32xf32>
    %397 = vector.shape_cast %396 : vector<1x1x32xf32> to vector<1x32xf32>
    %c1_181 = arith.constant 1 : index
    %c12_182 = arith.constant 12 : index
    %c0_183 = arith.constant 0 : index
    %398 = vector.load %arg3[%c1_181, %c12_182, %c0_183] : memref<2x16x128xf32, #tpu.memory_space<vmem>>, vector<1x1x32xf32>
    %399 = vector.shape_cast %398 : vector<1x1x32xf32> to vector<1x32xf32>
    %cst_184 = arith.constant dense<0.000000e+00> : vector<16xf32>
    %400 = vector.multi_reduction <add>, %395, %cst_184 [1] : vector<16x32xf32> to vector<16xf32>
    %401 = vector.shape_cast %400 : vector<16xf32> to vector<16x1xf32>
    %cst_185 = arith.constant 3.200000e+01 : f32
    %402 = vector.broadcast %cst_185 : f32 to vector<16x1xf32>
    %403 = arith.divf %401, %402 : vector<16x1xf32>
    %404 = arith.mulf %395, %395 : vector<16x32xf32>
    %cst_186 = arith.constant dense<0.000000e+00> : vector<16xf32>
    %405 = vector.multi_reduction <add>, %404, %cst_186 [1] : vector<16x32xf32> to vector<16xf32>
    %406 = vector.shape_cast %405 : vector<16xf32> to vector<16x1xf32>
    %cst_187 = arith.constant 3.200000e+01 : f32
    %407 = vector.broadcast %cst_187 : f32 to vector<16x1xf32>
    %408 = arith.divf %406, %407 : vector<16x1xf32>
    %409 = arith.mulf %403, %403 : vector<16x1xf32>
    %410 = arith.subf %408, %409 : vector<16x1xf32>
    %411 = vector.broadcast %403 : vector<16x1xf32> to vector<16x32xf32>
    %412 = arith.subf %395, %411 : vector<16x32xf32>
    %cst_188 = arith.constant 9.99999974E-6 : f32
    %413 = vector.broadcast %cst_188 : f32 to vector<16x1xf32>
    %414 = arith.addf %410, %413 : vector<16x1xf32>
    %415 = math.rsqrt %414 : vector<16x1xf32>
    %416 = vector.broadcast %415 : vector<16x1xf32> to vector<16x32xf32>
    %417 = arith.mulf %412, %416 : vector<16x32xf32>
    %418 = vector.broadcast %397 : vector<1x32xf32> to vector<16x32xf32>
    %419 = arith.mulf %417, %418 : vector<16x32xf32>
    %420 = vector.broadcast %399 : vector<1x32xf32> to vector<16x32xf32>
    %421 = arith.addf %419, %420 : vector<16x32xf32>
    %c0_189 = arith.constant 0 : index
    %c13 = arith.constant 13 : index
    %c0_190 = arith.constant 0 : index
    %422 = vector.load %arg3[%c0_189, %c13, %c0_190] : memref<2x16x128xf32, #tpu.memory_space<vmem>>, vector<1x1x32xf32>
    %423 = vector.shape_cast %422 : vector<1x1x32xf32> to vector<1x32xf32>
    %c0_191 = arith.constant 0 : index
    %c14 = arith.constant 14 : index
    %c0_192 = arith.constant 0 : index
    %424 = vector.load %arg3[%c0_191, %c14, %c0_192] : memref<2x16x128xf32, #tpu.memory_space<vmem>>, vector<1x1x32xf32>
    %425 = vector.shape_cast %424 : vector<1x1x32xf32> to vector<1x32xf32>
    %cst_193 = arith.constant dense<0.000000e+00> : vector<16xf32>
    %426 = vector.multi_reduction <add>, %421, %cst_193 [1] : vector<16x32xf32> to vector<16xf32>
    %427 = vector.shape_cast %426 : vector<16xf32> to vector<16x1xf32>
    %cst_194 = arith.constant 3.200000e+01 : f32
    %428 = vector.broadcast %cst_194 : f32 to vector<16x1xf32>
    %429 = arith.divf %427, %428 : vector<16x1xf32>
    %430 = arith.mulf %421, %421 : vector<16x32xf32>
    %cst_195 = arith.constant dense<0.000000e+00> : vector<16xf32>
    %431 = vector.multi_reduction <add>, %430, %cst_195 [1] : vector<16x32xf32> to vector<16xf32>
    %432 = vector.shape_cast %431 : vector<16xf32> to vector<16x1xf32>
    %cst_196 = arith.constant 3.200000e+01 : f32
    %433 = vector.broadcast %cst_196 : f32 to vector<16x1xf32>
    %434 = arith.divf %432, %433 : vector<16x1xf32>
    %435 = arith.mulf %429, %429 : vector<16x1xf32>
    %436 = arith.subf %434, %435 : vector<16x1xf32>
    %437 = vector.broadcast %429 : vector<16x1xf32> to vector<16x32xf32>
    %438 = arith.subf %421, %437 : vector<16x32xf32>
    %cst_197 = arith.constant 9.99999974E-6 : f32
    %439 = vector.broadcast %cst_197 : f32 to vector<16x1xf32>
    %440 = arith.addf %436, %439 : vector<16x1xf32>
    %441 = math.rsqrt %440 : vector<16x1xf32>
    %442 = vector.broadcast %441 : vector<16x1xf32> to vector<16x32xf32>
    %443 = arith.mulf %438, %442 : vector<16x32xf32>
    %444 = vector.broadcast %423 : vector<1x32xf32> to vector<16x32xf32>
    %445 = arith.mulf %443, %444 : vector<16x32xf32>
    %446 = vector.broadcast %425 : vector<1x32xf32> to vector<16x32xf32>
    %447 = arith.addf %445, %446 : vector<16x32xf32>
    %c0_198 = arith.constant 0 : index
    %c0_199 = arith.constant 0 : index
    %448 = vector.load %arg4[%c0_198, %c0_199] : memref<16x32xf32, #tpu.memory_space<vmem>>, vector<16x32xf32>
    tpu.vector_store %arg4[%c0_198, %c0_199], %447 {strides = array<i32>} : memref<16x32xf32, #tpu.memory_space<vmem>>, vector<16x32xf32>,
    return
  }
}

</mosaic_0001>

<bundles_post_ra>
// kernel: decoder_forward.1
= control target key start
LH: loop header
LB: loop body
LE: loop exit
PB: predicated region body
PF: predicated region fallthrough
CT: control target
= control target key end

     0   :  { %9 = vsyncpa [#allocation3], 0  ;;  %s5558_s0 = inlined_call_operand.hbm [shape: f32[16,32], index: 0, kind: input, shape index: {}]   ;;  %s5559_s1 = inlined_call_operand.hbm [shape: f32[32,32], index: 1, kind: input, shape index: {}]   ;;  %s5560_s2 = inlined_call_operand.hbm [shape: bf16[2,32,384], index: 2, kind: input, shape index: {}]   ;;  %s5561_s3 = inlined_call_operand.hbm [shape: f32[2,16,128], index: 3, kind: input, shape index: {}]   ;;  %s5562_s4 = inlined_call_operand.hbm [shape: f32[16,32], index: 4, kind: output, shape index: {}]  }
   0x1   :  { %10 = vsyncpa [#allocation6], 0 }
   0x2   :  { %11 = vsyncpa [#allocation9], 0 }
   0x3   :  { %12 = vsyncpa [#allocation4], 0  ;;  %s4082_s15 = smov [#allocation5]   ;;  %s4083_s17 = smov [#allocation2]  }
   0x4   :  { %s30_s16 = sshll.u32 %s4082_s15, 4  ;;  %s18_s18 = sshll.u32 %s4083_s17, 4  ;;  %s31_s16 = int_to_ptr.vmem [resolvable:$true] %s30_s16  ;;  %s19_s18 = int_to_ptr.vmem [resolvable:$true] %s18_s18 }
   0x5   :  { %s3982_s19 = scalar_lea.vmem %s31_s16, 512  ;;  %p3987_p1 = scmp.lt.s32.totalorder %s31_s16, %s31_s16 }
   0x6   :  { %p3983_p0 = scmp.ne.s32.totalorder %s31_s16, %s3982_s19  ;;  %p3988_p2 = scmp.lt.s32.totalorder %s3982_s19, %s3982_s19 }
   0x8   :  { %p3989_p3 = por %p3988_p2, %p3987_p1 }
   0xa   :  { %p3990_p4 = pnand %p3989_p3, %p3983_p0 }
   0xc   :  { %3993 = shalt.err (!%p3990_p4)
}
   0xd   :  { %s4084_s20 = smov 128   ;;  %s4085_s21 = smov 8  }
   0xe   :  { %36 = dma.hbm_to_vmem [thread:$0]  %s5559_s1, 512, %s31_s16, [#allocation6], %s4084_s20, %s4084_s20, %s4085_s21  }
   0xf   :  { %s4002_s24 = scalar_lea.vmem %s19_s18, 256  ;;  %p4007_p6 = scmp.lt.s32.totalorder %s19_s18, %s19_s18 }
  0x10   :  { %p4003_p5 = scmp.ne.s32.totalorder %s19_s18, %s4002_s24  ;;  %p4008_p7 = scmp.lt.s32.totalorder %s4002_s24, %s4002_s24 }
  0x12   :  { %p4009_p8 = por %p4008_p7, %p4007_p6 }
  0x14   :  { %p4010_p9 = pnand %p4009_p8, %p4003_p5 }
  0x16   :  { %4013 = shalt.err (!%p4010_p9)
}
  0x17   :  { %24 = dma.hbm_to_vmem [thread:$0]  %s5558_s0, 256, %s19_s18, [#allocation3], %s4084_s20, %s4084_s20, %s4085_s21  }
  0x18   :  { %s4086_s27 = smov [#allocation7]  }
  0x19   :  { %s42_s28 = sshll.u32 %s4086_s27, 4  ;;  %s43_s28 = int_to_ptr.vmem [resolvable:$true] %s42_s28 }
  0x1a   :  { %s4022_s29 = scalar_lea.vmem %s43_s28, 1536  ;;  %p4027_p11 = scmp.lt.s32.totalorder %s43_s28, %s43_s28 }
  0x1b   :  { %p4023_p10 = scmp.ne.s32.totalorder %s43_s28, %s4022_s29  ;;  %p4028_p12 = scmp.lt.s32.totalorder %s4022_s29, %s4022_s29 }
  0x1d   :  { %p4029_p13 = por %p4028_p12, %p4027_p11 }
  0x1f   :  { %p4030_p0 = pnand %p4029_p13, %p4023_p10 }
  0x21   :  { %4033 = shalt.err (!%p4030_p0)
}
  0x22   :  { %s4087_s1 = smov 192   ;;  %s4088_s30 = smov 12  }
  0x23   :  { %48 = dma.hbm_to_vmem [thread:$0]  %s5560_s2, 1536, %s43_s28, [#allocation6], %s4087_s1, %s4087_s1, %s4088_s30  }
  0x24   :  { %s4089_s7 = smov [#allocation8]  }
  0x25   :  { %s54_s8 = sshll.u32 %s4089_s7, 4  ;;  %s55_s8 = int_to_ptr.vmem [resolvable:$true] %s54_s8 }
  0x26   :  { %s4042_s0 = scalar_lea.vmem %s55_s8, 512  ;;  %p4047_p2 = scmp.lt.s32.totalorder %s55_s8, %s55_s8 }
  0x27   :  { %p4043_p1 = scmp.ne.s32.totalorder %s55_s8, %s4042_s0  ;;  %p4048_p3 = scmp.lt.s32.totalorder %s4042_s0, %s4042_s0 }
  0x29   :  { %p4049_p4 = por %p4048_p3, %p4047_p2 }
  0x2b   :  { %p4050_p5 = pnand %p4049_p4, %p4043_p1 }
  0x2d   :  { %4053 = shalt.err (!%p4050_p5)
}
  0x2e   :  { %60 = dma.hbm_to_vmem [thread:$0]  %s5561_s3, 512, %s55_s8, [#allocation9], %s4084_s20, %s4084_s20, %s4085_s21  }
  0x2f   :  { %4074 = dma.done.wait [#allocation3], 256  }
  0x30   :  { %4075 = vsyncadd [#allocation3], 4294967040 }
  0x31   :  { %4076 = dma.done.wait [#allocation6], 2048  }
  0x32   :  { %4077 = vsyncadd [#allocation6], 4294965248 }
  0x33   :  { %4078 = dma.done.wait [#allocation9], 512  }
  0x34   :  { %4079 = vsyncadd [#allocation9], 4294966784  ;;  %v80_v0 = vlaneseq  ;;  %v5575_v1 = vmov 0.0   ;;  %vm5600_vm0 = vmmov 0   ;;  %v4173_v13 = vld [vmem:[#allocation7 + $0x18] ss:$12 sps:$4 sm:$0xff]  }
  0x35   :  { %3451 = vmatprep.subr.bf16.mxu1 %v5575_v1  ;;  %3455 = vmatprep.mubr.msk.bf16.mxu1 %vm5600_vm0, %v5575_v1  ;;  %v4175_v14 = vld [vmem:[#allocation7] ss:$12 sps:$4 sm:$0xff]   ;;  %v4184_v15 = vld [vmem:[#allocation2] sm:$0xff]  ;;  %v4186_v16 = vld [vmem:[#allocation2 + $0x8] sm:$0xff]  ;;  %s4092_s2 = smov 32   ;;  %vm5599_vm6 = vcmask 261120  }
  0x36   :  { %v4146_v2 = vshrl.u32 %v80_v0, 7  ;;  %v4148_v3 = vand.u32 127, %v80_v0  ;;  %3452 = vmatpush3.bf16.msra.mxu1 %v4173_v13  ;;  %v257_v25 = vpack.c.bf16 %v4186_v16, %v4184_v15  ;;  %v3071_v35 = vld [vmem:[#allocation8] ss:$0 sm:$0xff]  ;;  %s4093_s3 = smov 96   ;;  %vm5598_vm10 = vcmask 523264  }
  0x37   :  { %3453 = vmatprep.subr.bf16.mxu1 %v5575_v1  ;;  %s4094_s11 = smov 64   ;;  %s4096_s12 = smov [#allocation10]  }
  0x38   :  { %v4151_v4 = vadd.s32 40, %v4146_v2  ;;  %v4154_v5 = vshra.s32 %v4148_v3, 3  ;;  %v4157_v6 = vadd.s32 56, %v4146_v2  ;;  %v4160_v7 = vadd.s32 32, %v4146_v2  ;;  %s3057_s13 = sshll.u32 %s4096_s12, 4  ;;  %s3058_s13 = int_to_ptr.vmem [resolvable:$true] %s3057_s13 }
  0x39   :  { %v4163_v8 = vadd.s32 48, %v4146_v2  ;;  %v4168_v11 = vadd.s32 16, %v4146_v2  ;;  %v4171_v12 = vadd.s32 24, %v4146_v2  ;;  %v5565_v23 = vshra.s32 %v4146_v2, 4  ;;  %s4054_s14 = scalar_lea.vmem %s3058_s13, 256  ;;  %p4059_p7 = scmp.lt.s32.totalorder %s3058_s13, %s3058_s13 }
  0x3a   :  { %v5570_v9 = vshra.s32 %v4151_v4, 4  ;;  %v5572_v10 = vshra.s32 %v4157_v6, 4  ;;  %v5569_v19 = vshra.s32 %v4160_v7, 4  ;;  %v4211_v24 = vadd.s32 8, %v4146_v2  ;;  %3454 = vmatpush3.bf16.msra.mxu1 %v4175_v14  ;;  %p4055_p6 = scmp.ne.s32.totalorder %s3058_s13, %s4054_s14  ;;  %p4060_p8 = scmp.lt.s32.totalorder %s4054_s14, %s4054_s14 }
  0x3b   :  { %v5571_v20 = vshra.s32 %v4163_v8, 4  ;;  %v5567_v21 = vshra.s32 %v4168_v11, 4  ;;  %v5568_v22 = vshra.s32 %v4171_v12, 4  ;;  %vm100_vm8 = vcmp.eq.s32.totalorder %v5565_v23, %v4154_v5 }
  0x3c   :  { %vm105_vm1 = vcmp.eq.s32.totalorder %v5570_v9, %v4154_v5  ;;  %vm107_vm2 = vcmp.eq.s32.totalorder %v5572_v10, %v4154_v5  ;;  %vm104_vm3 = vcmp.eq.s32.totalorder %v5569_v19, %v4154_v5  ;;  %v5566_v29 = vshra.s32 %v4211_v24, 4  ;;  %p4061_p9 = por %p4060_p8, %p4059_p7 }
  0x3d   :  { %v4189_v17 = vsel %vm105_vm1, 1.0, %v5575_v1  ;;  %v4192_v18 = vsel %vm107_vm2, 1.0, %v5575_v1  ;;  %vm106_vm4 = vcmp.eq.s32.totalorder %v5571_v20, %v4154_v5  ;;  %v4216_v26 = vsel %vm104_vm3, 1.0, %v5575_v1  ;;  %3456 = vmatmul.mubr.msk.bf16.vlgmr.msra.gmra.mxu1 %vm5599_vm6, %v257_v25 }
  0x3e   :  { %338 = vrot.lane.b32.xlu1 %v4189_v17, %s4092_s2  ;;  %342 = vrot.lane.b32.xlu0 %v4192_v18, %s4092_s2  ;;  %v4219_v27 = vsel %vm106_vm4, 1.0, %v5575_v1  ;;  %vm102_vm5 = vcmp.eq.s32.totalorder %v5567_v21, %v4154_v5  ;;  %vm103_vm7 = vcmp.eq.s32.totalorder %v5568_v22, %v4154_v5  ;;  %vm101_vm9 = vcmp.eq.s32.totalorder %v5566_v29, %v4154_v5  ;;  %p4062_p10 = pnand %p4061_p9, %p4055_p6 }
  0x3f   :  { %v4226_v28 = vsel %vm102_vm5, 1.0, %v5575_v1  ;;  %v4238_v30 = vsel %vm103_vm7, 1.0, %v5575_v1  ;;  %v4251_v31 = vsel %vm100_vm8, 1.0, %v5575_v1  ;;  %v4254_v32 = vsel %vm101_vm9, 1.0, %v5575_v1 }
  0x42   :  { %336 = vrot.lane.b32.xlu1 %v4216_v26, %s4092_s2  ;;  %340 = vrot.lane.b32.xlu0 %v4219_v27, %s4092_s2 }
  0x46   :  { %332 = vrot.lane.b32.xlu1 %v4226_v28, %s4092_s2  ;;  %334 = vrot.lane.b32.xlu0 %v4238_v30, %s4092_s2 }
  0x4a   :  { %328 = vrot.lane.b32.xlu1 %v4251_v31, %s4092_s2  ;;  %330 = vrot.lane.b32.xlu0 %v4254_v32, %s4092_s2 }
  0xb0   :  { %v4260_v33 = vpop.permute.xlu1 %338  ;;  %v4262_v34 = vpop.permute.xlu0 %342 }
  0xb1   :  { %5649 = vst [vmem:[#allocation15_spill] sm:$0xff] %v4260_v33 }
  0xb4   :  { %v4264_v36 = vpop.permute.xlu1 %336  ;;  %v4268_v39 = vpop.permute.xlu0 %340 }
  0xb5   :  { %5650 = vst [vmem:[#allocation16_spill] sm:$0xff] %v4264_v36 }
  0xb8   :  { %v4277_v44 = vpop.permute.xlu1 %332  ;;  %v4285_v48 = vpop.permute.xlu0 %334 }
  0xb9   :  { %5651 = vst [vmem:[#allocation17_spill] sm:$0xff] %v4277_v44 }
  0xbc   :  { %v4291_v51 = vpop.permute.xlu1 %328  ;;  %v4299_v54 = vpop.permute.xlu0 %330 }
  0xbd   :  { %5652 = vst [vmem:[#allocation18_spill] sm:$0xff] %v4291_v51  ;;  %5653 = vst [vmem:[#allocation19_spill] sm:$0xff] %v4299_v54 }
  0xfd   :  { %v313_v37 = vpop.f32.mrf.mxu1 }
  0xfe   :  { %v4266_v38 = vadd.f32 %v3071_v35, %v313_v37 }
  0xff   :  { %v3457_v40 = vpop.f32.mrf.mxu1 }
 0x100   :  { %3475 = vmatprep.mubr.msk.f32.mxu1 %vm5599_vm6, %v4266_v38  ;;  %v358_v41 = vmul.f32 %v4268_v39, %v4266_v38  ;;  %v356_v46 = vmul.f32 %v4264_v36, %v4266_v38  ;;  %v354_v49 = vmul.f32 %v4277_v44, %v4266_v38  ;;  %v352_v52 = vmul.f32 %v4291_v51, %v4266_v38 }
 0x101   :  { %v316_v42 = vpop.f32.mrf.mxu1  ;;  %v129_v40 = vshra.s32 %v4157_v6, 3 }
 0x102   :  { %v4274_v43 = vadd.f32 %v3071_v35, %v316_v42  ;;  %412 = vrot.lane.b32.xlu1 %v358_v41, %s4093_s3  ;;  %v128_v42 = vshra.s32 %v4163_v8, 3  ;;  %v3150_v41 = vld [vmem:[#allocation8 + $0x6] ss:$0 sm:$0xff] }
 0x103   :  { %v3458_v45 = vpop.f32.mrf.mxu1  ;;  %vm4331_vm11 = vcmp.eq.s32.totalorder %v129_v40, %v4154_v5 }
 0x104   :  { %v359_v47 = vmul.f32 %v4262_v34, %v4274_v43  ;;  %v357_v50 = vmul.f32 %v4260_v33, %v4274_v43  ;;  %v355_v53 = vmul.f32 %v4285_v48, %v4274_v43  ;;  %v353_v55 = vmul.f32 %v4299_v54, %v4274_v43 }
 0x105   :  { %v5573_v45 = vmov 1.0   ;;  %vm4345_vm12 = vcmp.eq.s32.totalorder %v128_v42, %v4154_v5 }
 0x106   :  { %408 = vrot.lane.b32.xlu1 %v356_v46, %s4093_s3  ;;  %414 = vrot.lane.b32.xlu0 %v359_v47, %s4093_s3  ;;  %v127_v47 = vshra.s32 %v4151_v4, 3 }
 0x107   :  { %3478 = vmatprep.subr.msk.mxu0 %vm4331_vm11, %v5573_v45 }
 0x108   :  { %3479 = vmatpush3.msk.msra.mxu0 %vm4331_vm11, %v5573_v45  ;;  %vm4357_vm13 = vcmp.eq.s32.totalorder %v127_v47, %v4154_v5 }
 0x109   :  { %3480 = vmatprep.subr.msk.mxu0 %vm4345_vm12, %v5573_v45 }
 0x10a   :  { %404 = vrot.lane.b32.xlu1 %v354_v49, %s4093_s3  ;;  %410 = vrot.lane.b32.xlu0 %v357_v50, %s4093_s3  ;;  %v126_v49 = vshra.s32 %v4160_v7, 3 }
 0x10b   :  { %3481 = vmatpush3.msk.msra.mxu0 %vm4345_vm12, %v5573_v45 }
 0x10c   :  { %3482 = vmatprep.subr.msk.mxu0 %vm4357_vm13, %v5573_v45  ;;  %vm4371_vm14 = vcmp.eq.s32.totalorder %v126_v49, %v4154_v5 }
 0x10d   :  { %3483 = vmatpush3.msk.msra.mxu0 %vm4357_vm13, %v5573_v45 }
 0x10e   :  { %400 = vrot.lane.b32.xlu1 %v352_v52, %s4093_s3  ;;  %406 = vrot.lane.b32.xlu0 %v355_v53, %s4093_s3  ;;  %v125_v52 = vshra.s32 %v4171_v12, 3  ;;  %v124_v53 = vshra.s32 %v4168_v11, 3 }
 0x10f   :  { %3484 = vmatprep.subr.msk.mxu0 %vm4371_vm14, %v5573_v45 }
 0x110   :  { %3485 = vmatpush3.msk.msra.mxu0 %vm4371_vm14, %v5573_v45  ;;  %vm4385_vm15 = vcmp.eq.s32.totalorder %v125_v52, %v4154_v5  ;;  %vm4399_vm1 = vcmp.eq.s32.totalorder %v124_v53, %v4154_v5 }
 0x111   :  { %3486 = vmatprep.subr.msk.mxu0 %vm4385_vm15, %v5573_v45 }
 0x112   :  { %402 = vrot.lane.b32.xlu0 %v353_v55, %s4093_s3  ;;  %3487 = vmatpush3.msk.msra.mxu0 %vm4385_vm15, %v5573_v45  ;;  %v4404_v55 = vshra.s32 %v4211_v24, 3 }
 0x113   :  { %3488 = vmatprep.subr.msk.mxu0 %vm4399_vm1, %v5573_v45 }
 0x114   :  { %3489 = vmatpush3.msk.msra.mxu0 %vm4399_vm1, %v5573_v45  ;;  %vm5597_vm2 = vcmp.eq.s32.totalorder %v4404_v55, %v4154_v5 }
 0x115   :  { %3490 = vmatprep.subr.msk.mxu0 %vm5597_vm2, %v5573_v45 }
 0x116   :  { %3491 = vmatpush3.msk.msra.mxu0 %vm5597_vm2, %v5573_v45 }
 0x174   :  { %v413_v57 = vpop.permute.xlu1 %412 }
 0x178   :  { %v415_v56 = vpop.permute.xlu0 %414  ;;  %v409_v59 = vpop.permute.xlu1 %408 }
 0x179   :  { %3459 = vmatprep.subr.msk.mxu1 %vm5599_vm6, %v415_v56 }
 0x17a   :  { %3460 = vmatpush3.xpose.msk.msra.mxu1 %vm5599_vm6, %v415_v56 }
 0x17b   :  { %3461 = vmatprep.subr.msk.mxu1 %vm5599_vm6, %v413_v57 }
 0x17c   :  { %v411_v58 = vpop.permute.xlu0 %410  ;;  %v405_v61 = vpop.permute.xlu1 %404 }
 0x17e   :  { %3462 = vmatpush3.xpose.msk.msra.mxu1 %vm5599_vm6, %v413_v57 }
 0x17f   :  { %3463 = vmatprep.subr.msk.mxu1 %vm5599_vm6, %v411_v58 }
 0x180   :  { %v407_v60 = vpop.permute.xlu0 %406  ;;  %v401_v63 = vpop.permute.xlu1 %400 }
 0x182   :  { %3464 = vmatpush3.xpose.msk.msra.mxu1 %vm5599_vm6, %v411_v58 }
 0x183   :  { %3465 = vmatprep.subr.msk.mxu1 %vm5599_vm6, %v409_v59 }
 0x184   :  { %v403_v62 = vpop.permute.xlu0 %402 }
 0x186   :  { %3466 = vmatpush3.xpose.msk.msra.mxu1 %vm5599_vm6, %v409_v59 }
 0x187   :  { %3467 = vmatprep.subr.msk.mxu1 %vm5599_vm6, %v407_v60 }
 0x18a   :  { %3468 = vmatpush3.xpose.msk.msra.mxu1 %vm5599_vm6, %v407_v60 }
 0x18b   :  { %3469 = vmatprep.subr.msk.mxu1 %vm5599_vm6, %v405_v61 }
 0x18e   :  { %3470 = vmatpush3.xpose.msk.msra.mxu1 %vm5599_vm6, %v405_v61 }
 0x18f   :  { %3471 = vmatprep.subr.msk.mxu1 %vm5599_vm6, %v403_v62 }
 0x192   :  { %3472 = vmatpush3.xpose.msk.msra.mxu1 %vm5599_vm6, %v403_v62 }
 0x193   :  { %3473 = vmatprep.subr.msk.mxu1 %vm5599_vm6, %v401_v63 }
 0x196   :  { %3474 = vmatpush3.xpose.msk.msra.mxu1 %vm5599_vm6, %v401_v63  ;;  %v118_v63 = vand.u32 15, %v4148_v3 }
 0x197   :  { %3516 = vmatprep.subr.bf16.mxu1 %v5575_v1 }
 0x198   :  { %v119_v40 = vshra.s32 %v118_v63, 3 }
 0x199   :  { %3476 = vmatmul.mubr.msk.f32.vlgmr.msra.gmra.mxu1 %vm5599_vm6, %v4274_v43 }
 0x19a   :  { %3520 = vmatprep.mubr.msk.bf16.mxu1 %vm5600_vm0, %v5575_v1  ;;  %vm121_vm5 = vcmp.eq.s32.totalorder %v4404_v55, %v119_v40 }
 0x259   :  { %v3477_v0 = vpop.f32.mrf.mxu1 }
 0x25a   :  { %v517_v25 = vsel %vm5598_vm10, %v3477_v0, -inf }
 0x25b   :  { %518 = vmax.xlane.f32.xlu1 %v517_v25  ;;  %v504_v35 = vpop.f32.mrf.mxu1 }
 0x25c   :  { %v514_v37 = vsel %vm5598_vm10, %v504_v35, -inf }
 0x25d   :  { %515 = vmax.xlane.f32.xlu0 %v514_v37 }
 0x26c   :  { %372 = vrot.lane.b32.xlu1 %v4219_v27, %s4094_s11 }
 0x270   :  { %368 = vrot.lane.b32.xlu1 %v4216_v26, %s4094_s11 }
 0x273   :  { %374 = vrot.lane.b32.xlu0 %v4192_v18, %s4094_s11 }
 0x274   :  { %364 = vrot.lane.b32.xlu1 %v4226_v28, %s4094_s11  ;;  %v4417_v28 = vshra.s32 %v4146_v2, 3 }
 0x276   :  { %vm5596_vm3 = vcmp.eq.s32.totalorder %v4417_v28, %v4154_v5  ;;  %vm120_vm4 = vcmp.eq.s32.totalorder %v4417_v28, %v119_v40 }
 0x277   :  { %370 = vrot.lane.b32.xlu0 %v4189_v17, %s4094_s11  ;;  %3492 = vmatprep.subr.msk.mxu0 %vm5596_vm3, %v5573_v45 }
 0x278   :  { %360 = vrot.lane.b32.xlu1 %v4251_v31, %s4094_s11  ;;  %3493 = vmatpush3.msk.msra.mxu0 %vm5596_vm3, %v5573_v45 }
 0x27b   :  { %366 = vrot.lane.b32.xlu0 %v4238_v30, %s4094_s11 }
 0x27f   :  { %362 = vrot.lane.b32.xlu0 %v4254_v32, %s4094_s11 }
 0x2e4   :  { %v519_v17 = vpop.xlane.xlu1 %518 }
 0x2e5   :  { %v521_v31 = vsub.f32 %v3477_v0, %v519_v17 }
 0x2e6   :  { %v516_v56 = vpop.xlane.xlu0 %515 }
 0x2e7   :  { %v524_v57 = vmul.f32 1.442695, %v521_v31  ;;  %v520_v58 = vsub.f32 %v504_v35, %v516_v56  ;;  %v4483_v31 = vsel %vm120_vm4, 1.0, %v5575_v1 }
 0x2e8   :  { %v4443_v59 = vpop.permute.xlu1 %372  ;;  %5674 = vst [vmem:[#allocation28_spill] sm:$0xff] %v4483_v31 }
 0x2e9   :  { %5666 = vst [vmem:[#allocation20_spill] sm:$0xff] %v4443_v59  ;;  %v522_v60 = vmul.f32 1.442695, %v520_v58  ;;  %v390_v61 = vmul.f32 %v4443_v59, %v4266_v38  ;;  %3914 = vpow2.f32 %v524_v57  ;;  %v4489_v58 = vsel %vm121_vm5, 1.0, %v5575_v1 }
 0x2ea   :  { %v4447_v30 = vpop.permute.xlu0 %374  ;;  %5675 = vst [vmem:[#allocation29_spill] sm:$0xff] %v4489_v58 }
 0x2eb   :  { %5667 = vst [vmem:[#allocation21_spill] sm:$0xff] %v4447_v30  ;;  %3916 = vpow2.f32 %v522_v60  ;;  %v391_v62 = vmul.f32 %v4447_v30, %v4274_v43  ;;  %633 = vrot.lane.b32.xlu1 %v390_v61, %s4094_s11  ;;  %v157_v30 = vshra.s32 %v4211_v24, 5 }
 0x2ec   :  { %v4452_v32 = vpop.permute.xlu1 %368 }
 0x2ed   :  { %5668 = vst [vmem:[#allocation22_spill] sm:$0xff] %v4452_v32  ;;  %v388_v0 = vmul.f32 %v4452_v32, %v4266_v38  ;;  %635 = vrot.lane.b32.xlu0 %v391_v62, %s4094_s11  ;;  %v156_v32 = vshra.s32 %v4146_v2, 5 }
 0x2ee   :  { %v4458_v25 = vpop.permute.xlu0 %370 }
 0x2ef   :  { %5669 = vst [vmem:[#allocation23_spill] sm:$0xff] %v4458_v25  ;;  %v389_v35 = vmul.f32 %v4458_v25, %v4274_v43  ;;  %629 = vrot.lane.b32.xlu1 %v388_v0, %s4094_s11  ;;  %v159_v25 = vshra.s32 %v4171_v12, 5 }
 0x2f0   :  { %v4463_v37 = vpop.permute.xlu1 %364 }
 0x2f1   :  { %5670 = vst [vmem:[#allocation24_spill] sm:$0xff] %v4463_v37  ;;  %v386_v42 = vmul.f32 %v4463_v37, %v4266_v38  ;;  %631 = vrot.lane.b32.xlu0 %v389_v35, %s4094_s11  ;;  %v158_v37 = vshra.s32 %v4168_v11, 5 }
 0x2f2   :  { %v4468_v47 = vpop.permute.xlu0 %366 }
 0x2f3   :  { %5671 = vst [vmem:[#allocation25_spill] sm:$0xff] %v4468_v47  ;;  %v387_v49 = vmul.f32 %v4468_v47, %v4274_v43  ;;  %625 = vrot.lane.b32.xlu1 %v386_v42, %s4094_s11  ;;  %v161_v47 = vshra.s32 %v4151_v4, 5 }
 0x2f4   :  { %v4474_v52 = vpop.permute.xlu1 %360 }
 0x2f5   :  { %5672 = vst [vmem:[#allocation26_spill] sm:$0xff] %v4474_v52  ;;  %v384_v53 = vmul.f32 %v4474_v52, %v4266_v38  ;;  %627 = vrot.lane.b32.xlu0 %v387_v49, %s4094_s11  ;;  %v5564_v49 = vsub.f32 1.0, %v4489_v58  ;;  %v160_v52 = vshra.s32 %v4160_v7, 5 }
 0x2f6   :  { %v4480_v17 = vpop.permute.xlu0 %362  ;;  %v3915_v56 = vpop.eup %3914 }
 0x2f7   :  { %5673 = vst [vmem:[#allocation27_spill] sm:$0xff] %v4480_v17  ;;  %v385_v57 = vmul.f32 %v4480_v17, %v4274_v43  ;;  %621 = vrot.lane.b32.xlu1 %v384_v53, %s4094_s11  ;;  %v527_v61 = vmul.f32 %v3915_v56, %v4489_v58  ;;  %v5563_v53 = vsub.f32 1.0, %v4483_v31  ;;  %v162_v17 = vshra.s32 %v4163_v8, 5 }
 0x2f8   :  { %v3917_v60 = vpop.eup %3916 }
 0x2f9   :  { %623 = vrot.lane.b32.xlu0 %v385_v57, %s4094_s11  ;;  %v526_v38 = vmul.f32 %v3917_v60, %v4483_v31  ;;  %v163_v31 = vshra.s32 %v4157_v6, 5 }
 0x2fb   :  { %3494 = vmatprep.mubr.msk.f32.mxu0 %vm5598_vm10, %v526_v38  ;;  %732 = vrot.lane.b32.xlu1 %v4175_v14, %s4092_s2 }
 0x2fc   :  { %3495 = vmatmul.mubr.msk.f32.vlgmr.msra.gmra.mxu0 %vm5598_vm10, %v527_v61 }
 0x2fd   :  { %734 = vrot.lane.b32.xlu0 %v4173_v13, %s4092_s2 }
 0x35d   :  { %v634_v43 = vpop.permute.xlu1 %633 }
 0x35f   :  { %v636_v62 = vpop.permute.xlu0 %635 }
 0x360   :  { %3497 = vmatprep.subr.mxu0 %v636_v62 }
 0x361   :  { %v630_v63 = vpop.permute.xlu1 %629  ;;  %3498 = vmatpush3.msra.mxu0 %v636_v62 }
 0x362   :  { %3499 = vmatprep.subr.mxu0 %v634_v43 }
 0x363   :  { %3500 = vmatpush3.msra.mxu0 %v634_v43  ;;  %v632_v0 = vpop.permute.xlu0 %631 }
 0x364   :  { %3501 = vmatprep.subr.mxu0 %v632_v0 }
 0x365   :  { %3502 = vmatpush3.msra.mxu0 %v632_v0  ;;  %v626_v35 = vpop.permute.xlu1 %625 }
 0x366   :  { %3503 = vmatprep.subr.mxu0 %v630_v63 }
 0x367   :  { %3504 = vmatpush3.msra.mxu0 %v630_v63  ;;  %v628_v40 = vpop.permute.xlu0 %627 }
 0x368   :  { %3505 = vmatprep.subr.mxu0 %v628_v40 }
 0x369   :  { %3506 = vmatpush3.msra.mxu0 %v628_v40  ;;  %v622_v13 = vpop.permute.xlu1 %621 }
 0x36a   :  { %3507 = vmatprep.subr.mxu0 %v626_v35 }
 0x36b   :  { %3508 = vmatpush3.msra.mxu0 %v626_v35  ;;  %v624_v14 = vpop.permute.xlu0 %623 }
 0x36c   :  { %3509 = vmatprep.subr.mxu0 %v624_v14 }
 0x36d   :  { %3510 = vmatpush3.msra.mxu0 %v624_v14  ;;  %v733_v40 = vpop.permute.xlu1 %732  ;;  %v4512_v14 = vld [vmem:[#allocation7 + $0x1c] ss:$12 sps:$4 sm:$0xff]  }
 0x36e   :  { %3511 = vmatprep.subr.mxu0 %v622_v13  ;;  %904 = vrot.lane.b32.xlu0 %v4512_v14, %s4093_s3 }
 0x36f   :  { %3512 = vmatpush3.msra.mxu0 %v622_v13  ;;  %v735_v42 = vpop.permute.xlu0 %734  ;;  %v4514_v13 = vld [vmem:[#allocation7 + $0x4] ss:$12 sps:$4 sm:$0xff]  }
 0x370   :  { %3517 = vmatpush3.bf16.msra.mxu1 %v735_v42  ;;  %3524 = vmatprep.subr.bf16.mxu0 %v5575_v1 }
 0x371   :  { %3518 = vmatprep.subr.bf16.mxu1 %v5575_v1  ;;  %902 = vrot.lane.b32.xlu1 %v4514_v13, %s4093_s3 }
 0x374   :  { %3519 = vmatpush3.bf16.msra.mxu1 %v733_v40  ;;  %v3097_v40 = vld [vmem:[#allocation8 + $0x1] ss:$0 sm:$0xff] }
 0x3bc   :  { %v3496_v56 = vpop.f32.mrf.mxu0 }
 0x3bd   :  { %v606_v57 = vadd.f32 %v3496_v56, %v5564_v49 }
 0x3be   :  { %v600_v60 = vpop.f32.mrf.mxu0 }
 0x3bf   :  { %v601_v43 = vadd.f32 %v600_v60, %v5563_v53  ;;  %3918 = vrcp.f32 %v606_v57  ;;  %v76_v60 = vld [vmem:[#allocation5] sm:$0xff] }
 0x3c1   :  { %3920 = vrcp.f32 %v601_v43  ;;  %v77_v43 = vld [vmem:[#allocation5 + $0x8] sm:$0xff] }
 0x3cc   :  { %v3919_v62 = vpop.eup %3918 }
 0x3cd   :  { %v612_v35 = vmul.f32 %v3919_v62, %v527_v61  ;;  %v4524_v62 = vpack.c.bf16 %v77_v43, %v76_v60 }
 0x3ce   :  { %v3921_v63 = vpop.eup %3920 }
 0x3cf   :  { %v611_v0 = vmul.f32 %v3921_v63, %v526_v38  ;;  %5676 = vst [vmem:[#allocation30_spill] sm:$0xff] %v4524_v62  ;;  %v78_v63 = vld [vmem:[#allocation5 + $0x10] sm:$0xff] }
 0x3d1   :  { %3513 = vmatprep.mubr.msk.f32.mxu0 %vm5598_vm10, %v611_v0  ;;  %v79_v0 = vld [vmem:[#allocation5 + $0x18] sm:$0xff] }
 0x3d2   :  { %3514 = vmatmul.mubr.msk.f32.vlgmr.msra.gmra.mxu0 %vm5598_vm10, %v612_v35  ;;  %v4528_v35 = vpack.c.bf16 %v79_v0, %v78_v63 }
 0x3d3   :  { %3528 = vmatprep.mubr.msk.bf16.mxu0 %vm5600_vm0, %v5575_v1  ;;  %3525 = vmatpush3.bf16.msra.mxu0 %v4512_v14 }
 0x3d4   :  { %3526 = vmatprep.subr.bf16.mxu0 %v5575_v1  ;;  %5677 = vst [vmem:[#allocation31_spill] sm:$0xff] %v4528_v35 }
 0x3d7   :  { %3527 = vmatpush3.bf16.msra.mxu0 %v4514_v13 }
 0x3e0   :  { %v905_v56 = vpop.permute.xlu0 %904 }
 0x3e1   :  { %3532 = vmatprep.subr.bf16.mxu1 %v905_v56 }
 0x3e3   :  { %v903_v57 = vpop.permute.xlu1 %902 }
 0x492   :  { %v3515_v38 = vpop.f32.mrf.mxu0 }
 0x494   :  { %v717_v61 = vpop.f32.mrf.mxu0 }
 0x495   :  { %v726_v42 = vpack.c.bf16 %v3515_v38, %v717_v61 }
 0x497   :  { %3521 = vmatmul.mubr.msk.bf16.vlgmr.msra.gmra.mxu1 %vm5599_vm6, %v726_v42 }
 0x498   :  { %3533 = vmatpush3.bf16.msra.mxu1 %v905_v56  ;;  %3536 = vmatprep.mubr.msk.bf16.mxu1 %vm5599_vm6, %v4524_v62 }
 0x499   :  { %3534 = vmatprep.subr.bf16.mxu1 %v903_v57 }
 0x49c   :  { %3535 = vmatpush3.bf16.msra.mxu1 %v903_v57 }
 0x49f   :  { %3537 = vmatmul.mubr.msk.bf16.vlgmr.msra.gmra.mxu1 %vm5599_vm6, %v4528_v35 }
 0x557   :  { %v775_v38 = vpop.f32.mrf.mxu1 }
 0x558   :  { %v776_v61 = vadd.f32 %v3097_v40, %v775_v38 }
 0x559   :  { %v3522_v42 = vpop.f32.mrf.mxu1 }
 0x55a   :  { %v782_v60 = vadd.f32 %v776_v61, %v4184_v15  ;;  %v4539_v15 = vadd.s32 120, %v4146_v2 }
 0x55b   :  { %v778_v43 = vpop.f32.mrf.mxu1 }
 0x55c   :  { %v779_v56 = vadd.f32 %v3097_v40, %v778_v43  ;;  %v786_v53 = vsel %vm5599_vm6, %v782_v60, 0.0  ;;  %v795_v49 = vmul.f32 %v782_v60, %v782_v60  ;;  %v171_v40 = vshra.s32 %v4539_v15, 5 }
 0x55d   :  { %787 = vadd.xlane.f32.xlu0 %v786_v53  ;;  %v3523_v23 = vpop.f32.mrf.mxu1  ;;  %v3105_v53 = vld [vmem:[#allocation8 + $0x3] ss:$0 sm:$0xff] }
 0x55e   :  { %v783_v63 = vadd.f32 %v779_v56, %v4186_v16  ;;  %v797_v57 = vsel %vm5599_vm6, %v795_v49, 0.0  ;;  %vm187_vm7 = vcmp.eq.s32.totalorder %v171_v40, %v4154_v5 }
 0x55f   :  { %v3538_v61 = vpop.f32.mrf.mxu1  ;;  %v4548_v43 = vsel %vm187_vm7, 1.0, %v5575_v1  ;;  %v4556_v1 = vadd.s32 112, %v4146_v2 }
 0x560   :  { %v789_v0 = vsel %vm5599_vm6, %v783_v63, 0.0  ;;  %v796_v29 = vmul.f32 %v783_v63, %v783_v63  ;;  %v4542_v23 = vadd.f32 %v3538_v61, %v3105_v53 }
 0x561   :  { %798 = vadd.xlane.f32.xlu0 %v797_v57  ;;  %790 = vadd.xlane.f32.xlu1 %v789_v0  ;;  %v948_v16 = vpop.f32.mrf.mxu1  ;;  %v216_v33 = vshra.s32 %v4556_v1, 4 }
 0x562   :  { %v800_v38 = vsel %vm5599_vm6, %v796_v29, 0.0  ;;  %v4545_v49 = vadd.f32 %v3105_v53, %v948_v16 }
 0x563   :  { %v3539_v42 = vpop.f32.mrf.mxu1 }
 0x564   :  { %v4550_v29 = vadd.f32 %v3539_v42, %v3105_v53 }
 0x565   :  { %801 = vadd.xlane.f32.xlu0 %v800_v38 }
 0x566   :  { %v978_v56 = vmul.f32 %v4550_v29, %v4548_v43 }
 0x568   :  { %3540 = vmatprep.subr.msk.mxu0 %vm5599_vm6, %v978_v56 }
 0x5e6   :  { %v788_v57 = vpop.xlane.xlu0 %787 }
 0x5e7   :  { %v793_v0 = vmul.f32 0.03125, %v788_v57  ;;  %v4559_v57 = vadd.s32 104, %v4146_v2 }
 0x5e9   :  { %v805_v21 = vmul.f32 %v793_v0, %v793_v0  ;;  %v809_v35 = vsub.f32 %v782_v60, %v793_v0  ;;  %v951_v0 = vpop.f32.mrf.mxu1 }
 0x5ea   :  { %v791_v38 = vpop.xlane.xlu1 %790  ;;  %v799_v61 = vpop.xlane.xlu0 %798 }
 0x5eb   :  { %v794_v40 = vmul.f32 0.03125, %v791_v38  ;;  %v803_v22 = vmul.f32 0.03125, %v799_v61  ;;  %v170_v38 = vshra.s32 %v4556_v1, 5 }
 0x5ed   :  { %v807_v16 = vsub.f32 %v803_v22, %v805_v21  ;;  %v806_v9 = vmul.f32 %v794_v40, %v794_v40  ;;  %v3099_v21 = vld [vmem:[#allocation8 + $0x7] ss:$0 sm:$0xff]  ;;  %v810_v22 = vsub.f32 %v783_v63, %v794_v40  ;;  %vm186_vm8 = vcmp.eq.s32.totalorder %v170_v38, %v4154_v5 }
 0x5ee   :  { %v802_v19 = vpop.xlane.xlu0 %801  ;;  %v4581_v38 = vadd.f32 %v3105_v53, %v951_v0 }
 0x5ef   :  { %v811_v20 = vadd.f32 1e-05, %v807_v16  ;;  %v804_v10 = vmul.f32 0.03125, %v802_v19  ;;  %v169_v19 = vshra.s32 %v4559_v57, 5  ;;  %v5678_v16 = vmov 0.0  }
 0x5f1   :  { %3922 = vrsqrt.f32 %v811_v20  ;;  %v808_v42 = vsub.f32 %v804_v10, %v806_v9  ;;  %v4565_v10 = vadd.s32 96, %v4146_v2  ;;  %vm185_vm9 = vcmp.eq.s32.totalorder %v169_v19, %v4154_v5 }
 0x5f2   :  { %v4592_v19 = vadd.s32 80, %v4146_v2 }
 0x5f3   :  { %v812_v45 = vadd.f32 1e-05, %v808_v42  ;;  %v4568_v42 = vsel %vm186_vm8, 1.0, %v5678_v16  ;;  %v168_v63 = vshra.s32 %v4565_v10, 5 }
 0x5f5   :  { %3924 = vrsqrt.f32 %v812_v45  ;;  %v3100_v45 = vld [vmem:[#allocation8 + $0x8] ss:$0 sm:$0xff]  ;;  %vm184_vm4 = vcmp.eq.s32.totalorder %v168_v63, %v4154_v5  ;;  %v4616_v63 = vadd.s32 64, %v4146_v2 }
 0x5fe   :  { %v3923_v62 = vpop.eup %3922 }
 0x5ff   :  { %v815_v58 = vmul.f32 %v3923_v62, %v809_v35 }
 0x601   :  { %v821_v9 = vmul.f32 %v3099_v21, %v815_v58  ;;  %v4577_v58 = vadd.s32 88, %v4146_v2 }
 0x602   :  { %v3925_v61 = vpop.eup %3924 }
 0x603   :  { %v816_v20 = vmul.f32 %v3925_v61, %v810_v22  ;;  %v4571_v62 = vadd.f32 %v3100_v45, %v821_v9  ;;  %v4586_v22 = vsel %vm185_vm9, 1.0, %v5678_v16  ;;  %v167_v61 = vshra.s32 %v4577_v58, 5 }
 0x604   :  { %v976_v53 = vmul.f32 %v4581_v38, %v4586_v22  ;;  %v166_v9 = vshra.s32 %v4592_v19, 5 }
 0x605   :  { %v822_v60 = vmul.f32 %v3099_v21, %v816_v20  ;;  %v977_v21 = vmul.f32 %v4542_v23, %v4568_v42  ;;  %v4599_v20 = vsel %vm184_vm4, 1.0, %v5678_v16  ;;  %vm183_vm5 = vcmp.eq.s32.totalorder %v167_v61, %v4154_v5 }
 0x606   :  { %vm182_vm7 = vcmp.eq.s32.totalorder %v166_v9, %v4154_v5  ;;  %v164_v61 = vshra.s32 %v4616_v63, 5  ;;  %vm179_vm4 = vcmp.eq.s32.totalorder %v163_v31, %v4154_v5 }
 0x607   :  { %v4573_v35 = vadd.f32 %v3100_v45, %v822_v60  ;;  %v4604_v45 = vadd.s32 72, %v4146_v2  ;;  %v4611_v60 = vsel %vm183_vm5, 1.0, %v5678_v16  ;;  %vm178_vm5 = vcmp.eq.s32.totalorder %v162_v17, %v4154_v5 }
 0x608   :  { %vm180_vm9 = vcmp.eq.s32.totalorder %v164_v61, %v4154_v5 }
 0x609   :  { %v833_v40 = vpack.c.bf16 %v4573_v35, %v4571_v62  ;;  %v165_v0 = vshra.s32 %v4604_v45, 5 }
 0x60b   :  { %3529 = vmatmul.mubr.msk.bf16.vlgmr.msra.gmra.mxu0 %vm5599_vm6, %v833_v40  ;;  %v974_v40 = vmul.f32 %v4550_v29, %v4611_v60  ;;  %vm181_vm8 = vcmp.eq.s32.totalorder %v165_v0, %v4154_v5 }
 0x60c   :  { %3541 = vmatpush3.xpose.msk.msra.mxu0 %vm5599_vm6, %v978_v56  ;;  %v975_v56 = vmul.f32 %v4545_v49, %v4599_v20 }
 0x60d   :  { %3542 = vmatprep.subr.msk.mxu0 %vm5599_vm6, %v977_v21 }
 0x610   :  { %3543 = vmatpush3.xpose.msk.msra.mxu0 %vm5599_vm6, %v977_v21  ;;  %v4623_v21 = vsel %vm182_vm7, 1.0, %v5678_v16  ;;  %vm177_vm7 = vcmp.eq.s32.totalorder %v161_v47, %v4154_v5 }
 0x611   :  { %3544 = vmatprep.subr.msk.mxu0 %vm5599_vm6, %v976_v53  ;;  %v973_v9 = vmul.f32 %v4542_v23, %v4623_v21 }
 0x614   :  { %3545 = vmatpush3.xpose.msk.msra.mxu0 %vm5599_vm6, %v976_v53  ;;  %v4632_v53 = vsel %vm181_vm8, 1.0, %v5678_v16  ;;  %vm176_vm8 = vcmp.eq.s32.totalorder %v160_v52, %v4154_v5 }
 0x615   :  { %3546 = vmatprep.subr.msk.mxu0 %vm5599_vm6, %v975_v56  ;;  %v972_v0 = vmul.f32 %v4581_v38, %v4632_v53 }
 0x618   :  { %3547 = vmatpush3.xpose.msk.msra.mxu0 %vm5599_vm6, %v975_v56  ;;  %v4641_v56 = vsel %vm180_vm9, 1.0, %v5678_v16  ;;  %vm175_vm9 = vcmp.eq.s32.totalorder %v159_v25, %v4154_v5 }
 0x619   :  { %3548 = vmatprep.subr.msk.mxu0 %vm5599_vm6, %v974_v40  ;;  %v971_v61 = vmul.f32 %v4545_v49, %v4641_v56 }
 0x61c   :  { %3549 = vmatpush3.xpose.msk.msra.mxu0 %vm5599_vm6, %v974_v40  ;;  %v4650_v40 = vsel %vm179_vm4, 1.0, %v5678_v16  ;;  %vm174_vm4 = vcmp.eq.s32.totalorder %v158_v37, %v4154_v5 }
 0x61d   :  { %3550 = vmatprep.subr.msk.mxu0 %vm5599_vm6, %v973_v9  ;;  %v970_v31 = vmul.f32 %v4550_v29, %v4650_v40 }
 0x620   :  { %3551 = vmatpush3.xpose.msk.msra.mxu0 %vm5599_vm6, %v973_v9  ;;  %v4659_v9 = vsel %vm178_vm5, 1.0, %v5678_v16  ;;  %vm173_vm5 = vcmp.eq.s32.totalorder %v157_v30, %v4154_v5 }
 0x621   :  { %3552 = vmatprep.subr.msk.mxu0 %vm5599_vm6, %v972_v0  ;;  %v969_v17 = vmul.f32 %v4542_v23, %v4659_v9 }
 0x624   :  { %3553 = vmatpush3.xpose.msk.msra.mxu0 %vm5599_vm6, %v972_v0  ;;  %v4668_v0 = vsel %vm177_vm7, 1.0, %v5678_v16  ;;  %vm172_vm7 = vcmp.eq.s32.totalorder %v156_v32, %v4154_v5  ;;  %v3101_v32 = vld [vmem:[#allocation8 + $0x2] ss:$0 sm:$0xff] }
 0x625   :  { %3554 = vmatprep.subr.msk.mxu0 %vm5599_vm6, %v971_v61  ;;  %v968_v47 = vmul.f32 %v4581_v38, %v4668_v0  ;;  %v4712_v59 = vsel %vm172_vm7, 1.0, %v5678_v16 }
 0x626   :  { %5682 = vst [vmem:[#allocation35_spill] sm:$0xff] %v4712_v59 }
 0x628   :  { %3555 = vmatpush3.xpose.msk.msra.mxu0 %vm5599_vm6, %v971_v61  ;;  %v4677_v61 = vsel %vm176_vm8, 1.0, %v5678_v16 }
 0x629   :  { %3556 = vmatprep.subr.msk.mxu0 %vm5599_vm6, %v970_v31  ;;  %5679 = vst [vmem:[#allocation32_spill] sm:$0xff] %v4677_v61  ;;  %v967_v52 = vmul.f32 %v4545_v49, %v4677_v61 }
 0x62c   :  { %3557 = vmatpush3.xpose.msk.msra.mxu0 %vm5599_vm6, %v970_v31  ;;  %v4686_v31 = vsel %vm175_vm9, 1.0, %v5678_v16 }
 0x62d   :  { %3558 = vmatprep.subr.msk.mxu0 %vm5599_vm6, %v969_v17  ;;  %5680 = vst [vmem:[#allocation33_spill] sm:$0xff] %v4686_v31  ;;  %v966_v25 = vmul.f32 %v4550_v29, %v4686_v31 }
 0x630   :  { %3559 = vmatpush3.xpose.msk.msra.mxu0 %vm5599_vm6, %v969_v17  ;;  %v4695_v17 = vsel %vm174_vm4, 1.0, %v5678_v16 }
 0x631   :  { %3560 = vmatprep.subr.msk.mxu0 %vm5599_vm6, %v968_v47  ;;  %v965_v37 = vmul.f32 %v4542_v23, %v4695_v17 }
 0x634   :  { %3561 = vmatpush3.xpose.msk.msra.mxu0 %vm5599_vm6, %v968_v47  ;;  %v4704_v47 = vsel %vm173_vm5, 1.0, %v5678_v16 }
 0x635   :  { %3562 = vmatprep.subr.msk.mxu0 %vm5599_vm6, %v967_v52  ;;  %5681 = vst [vmem:[#allocation34_spill] sm:$0xff] %v4704_v47  ;;  %v964_v30 = vmul.f32 %v4581_v38, %v4704_v47 }
 0x638   :  { %3563 = vmatpush3.xpose.msk.msra.mxu0 %vm5599_vm6, %v967_v52  ;;  %v963_v52 = vmul.f32 %v4545_v49, %v4712_v59 }
 0x639   :  { %3564 = vmatprep.subr.msk.mxu0 %vm5599_vm6, %v966_v25 }
 0x63c   :  { %3565 = vmatpush3.xpose.msk.msra.mxu0 %vm5599_vm6, %v966_v25 }
 0x63d   :  { %3566 = vmatprep.subr.msk.mxu0 %vm5599_vm6, %v965_v37 }
 0x640   :  { %3567 = vmatpush3.xpose.msk.msra.mxu0 %vm5599_vm6, %v965_v37 }
 0x641   :  { %3568 = vmatprep.subr.msk.mxu0 %vm5599_vm6, %v964_v30 }
 0x644   :  { %3569 = vmatpush3.xpose.msk.msra.mxu0 %vm5599_vm6, %v964_v30  ;;  %v217_v30 = vshra.s32 %v4539_v15, 4 }
 0x645   :  { %3570 = vmatprep.subr.msk.mxu0 %vm5599_vm6, %v963_v52 }
 0x648   :  { %3571 = vmatpush3.xpose.msk.msra.mxu0 %vm5599_vm6, %v963_v52  ;;  %v4728_v52 = vshra.s32 %v4148_v3, 4 }
 0x649   :  { %3645 = vmatprep.subr.bf16.mxu0 %v5678_v16 }
 0x64a   :  { %vm4733_vm8 = vcmp.eq.s32.totalorder %v217_v30, %v4728_v52  ;;  %vm4738_vm9 = vcmp.eq.s32.totalorder %v216_v33, %v4728_v52  ;;  %v213_v33 = vshra.s32 %v4577_v58, 4  ;;  %v211_v30 = vshra.s32 %v4604_v45, 4 }
 0x64b   :  { %v5698_v45 = vmov 0 }
 0x64c   :  { %vm4773_vm7 = vcmp.eq.s32.totalorder %v213_v33, %v4728_v52  ;;  %vm4803_vm2 = vcmp.eq.s32.totalorder %v211_v30, %v4728_v52  ;;  %v5703_v33 = vshra.s32 %v4163_v8, 4  ;;  %v5707_v8 = vmov 0 }
 0x64d   :  { %v5709_v30 = vshra.s32 %v4160_v7, 4  ;;  %v5713_v7 = vmov 0 }
 0x6cb   :  { %v888_v25 = vpop.f32.mrf.mxu0 }
 0x6cc   :  { %v889_v51 = vadd.f32 %v3101_v32, %v888_v25  ;;  %v215_v25 = vshra.s32 %v4559_v57, 4 }
 0x6cd   :  { %v3530_v44 = vpop.f32.mrf.mxu0 }
 0x6ce   :  { %3572 = vmatprep.mubr.msk.f32.mxu0 %vm5599_vm6, %v889_v51  ;;  %v214_v51 = vshra.s32 %v4565_v10, 4  ;;  %vm4750_vm4 = vcmp.eq.s32.totalorder %v215_v25, %v4728_v52  ;;  %v5696_v25 = vmov 0  ;;  %v3180_v44 = vld [vmem:[#allocation8 + $0x11] ss:$0 sm:$0xff] }
 0x6cf   :  { %v891_v37 = vpop.f32.mrf.mxu0  ;;  %v5697_v25 = vsel %vm4803_vm2, 4294967295, %v5696_v25 }
 0x6d0   :  { %v892_v36 = vadd.f32 %v3101_v32, %v891_v37  ;;  %vm4762_vm5 = vcmp.eq.s32.totalorder %v214_v51, %v4728_v52  ;;  %v212_v32 = vshra.s32 %v4592_v19, 4  ;;  %v5694_v37 = vmov 0 }
 0x6d1   :  { %v3531_v54 = vpop.f32.mrf.mxu0  ;;  %v210_v19 = vshra.s32 %v4616_v63, 4  ;;  %v5700_v63 = vshra.s32 %v4157_v6, 4  ;;  %v5701_v51 = vmov 0  ;;  %v5706_v6 = vshra.s32 %v4151_v4, 4 }
 0x6d2   :  { %3573 = vmatmul.mubr.msk.f32.vlgmr.msra.gmra.mxu0 %vm5599_vm6, %v892_v36  ;;  %v5687_v54 = vmov 1.0   ;;  %vm4791_vm3 = vcmp.eq.s32.totalorder %v212_v32, %v4728_v52  ;;  %v5704_v32 = vmov 0  ;;  %v5710_v4 = vmov 0 }
 0x6d3   :  { %3649 = vmatprep.mubr.msk.bf16.mxu0 %vm5600_vm0, %v5678_v16  ;;  %3575 = vmatprep.subr.msk.mxu1 %vm4733_vm8, %v5687_v54  ;;  %v5695_v37 = vsel %vm4791_vm3, 4294967295, %v5694_v37  ;;  %vm4815_vm10 = vcmp.eq.s32.totalorder %v210_v19, %v4728_v52  ;;  %vm4828_vm6 = vcmp.eq.s32.totalorder %v5700_v63, %v4728_v52  ;;  %vm4841_vm0 = vcmp.eq.s32.totalorder %v5703_v33, %v4728_v52 }
 0x6d4   :  { %3576 = vmatpush3.msk.msra.mxu1 %vm4733_vm8, %v5687_v54  ;;  %v5699_v45 = vsel %vm4815_vm10, 4294967295, %v5698_v45  ;;  %v5702_v51 = vsel %vm4828_vm6, 4294967295, %v5701_v51  ;;  %v5705_v32 = vsel %vm4841_vm0, 4294967295, %v5704_v32  ;;  %v5712_v19 = vshra.s32 %v4171_v12, 4 }
 0x6d5   :  { %3577 = vmatprep.subr.msk.mxu1 %vm4738_vm9, %v5687_v54  ;;  %v5715_v63 = vshra.s32 %v4168_v11, 4  ;;  %v5716_v12 = vmov 0  ;;  %v5718_v33 = vshra.s32 %v4211_v24, 4  ;;  %v5719_v11 = vmov 0 }
 0x6d6   :  { %3578 = vmatpush3.msk.msra.mxu1 %vm4738_vm9, %v5687_v54  ;;  %v5722_v24 = vmov 0 }
 0x6d7   :  { %3579 = vmatprep.subr.msk.mxu1 %vm4750_vm4, %v5687_v54 }
 0x6d8   :  { %3580 = vmatpush3.msk.msra.mxu1 %vm4750_vm4, %v5687_v54 }
 0x6d9   :  { %3581 = vmatprep.subr.msk.mxu1 %vm4762_vm5, %v5687_v54 }
 0x6da   :  { %3582 = vmatpush3.msk.msra.mxu1 %vm4762_vm5, %v5687_v54 }
 0x6db   :  { %3583 = vmatprep.subr.msk.mxu1 %vm4773_vm7, %v5687_v54 }
 0x6dc   :  { %3584 = vmatpush3.msk.msra.mxu1 %vm4773_vm7, %v5687_v54 }
 0x6dd   :  { %3585 = vmatprep.subr.msk.mxu1 %vm4791_vm3, %v5687_v54 }
 0x6de   :  { %3586 = vmatpush3.msk.msra.mxu1 %vm4791_vm3, %v5687_v54 }
 0x6df   :  { %3587 = vmatprep.subr.msk.mxu1 %vm4803_vm2, %v5687_v54 }
 0x6e0   :  { %3588 = vmatpush3.msk.msra.mxu1 %vm4803_vm2, %v5687_v54 }
 0x6e1   :  { %3589 = vmatprep.subr.msk.mxu1 %vm4815_vm10, %v5687_v54 }
 0x6e2   :  { %3590 = vmatpush3.msk.msra.mxu1 %vm4815_vm10, %v5687_v54 }
 0x6e3   :  { %3591 = vmatprep.subr.msk.mxu1 %vm4828_vm6, %v5687_v54 }
 0x6e4   :  { %3592 = vmatpush3.msk.msra.mxu1 %vm4828_vm6, %v5687_v54  ;;  %vm4856_vm6 = vcmp.eq.s32.totalorder %v5706_v6, %v4728_v52  ;;  %v5721_v6 = vshra.s32 %v4146_v2, 4 }
 0x6e5   :  { %3593 = vmatprep.subr.msk.mxu1 %vm4841_vm0, %v5687_v54  ;;  %v5708_v8 = vsel %vm4856_vm6, 4294967295, %v5707_v8 }
 0x6e6   :  { %3594 = vmatpush3.msk.msra.mxu1 %vm4841_vm0, %v5687_v54  ;;  %vm4871_vm0 = vcmp.eq.s32.totalorder %v5709_v30, %v4728_v52 }
 0x6e7   :  { %3595 = vmatprep.subr.msk.mxu1 %vm4856_vm6, %v5687_v54  ;;  %v5711_v4 = vsel %vm4871_vm0, 4294967295, %v5710_v4 }
 0x6e8   :  { %3596 = vmatpush3.msk.msra.mxu1 %vm4856_vm6, %v5687_v54  ;;  %vm4886_vm6 = vcmp.eq.s32.totalorder %v5712_v19, %v4728_v52 }
 0x6e9   :  { %3597 = vmatprep.subr.msk.mxu1 %vm4871_vm0, %v5687_v54  ;;  %v5714_v7 = vsel %vm4886_vm6, 4294967295, %v5713_v7 }
 0x6ea   :  { %3598 = vmatpush3.msk.msra.mxu1 %vm4871_vm0, %v5687_v54  ;;  %vm4901_vm0 = vcmp.eq.s32.totalorder %v5715_v63, %v4728_v52 }
 0x6eb   :  { %3599 = vmatprep.subr.msk.mxu1 %vm4886_vm6, %v5687_v54  ;;  %v5717_v12 = vsel %vm4901_vm0, 4294967295, %v5716_v12 }
 0x6ec   :  { %3600 = vmatpush3.msk.msra.mxu1 %vm4886_vm6, %v5687_v54  ;;  %vm4916_vm6 = vcmp.eq.s32.totalorder %v5718_v33, %v4728_v52 }
 0x6ed   :  { %3601 = vmatprep.subr.msk.mxu1 %vm4901_vm0, %v5687_v54  ;;  %v5720_v11 = vsel %vm4916_vm6, 4294967295, %v5719_v11 }
 0x6ee   :  { %3602 = vmatpush3.msk.msra.mxu1 %vm4901_vm0, %v5687_v54  ;;  %vm4931_vm0 = vcmp.eq.s32.totalorder %v5721_v6, %v4728_v52 }
 0x6ef   :  { %3603 = vmatprep.subr.msk.mxu1 %vm4916_vm6, %v5687_v54  ;;  %v5723_v24 = vsel %vm4931_vm0, 4294967295, %v5722_v24 }
 0x6f0   :  { %3604 = vmatpush3.msk.msra.mxu1 %vm4916_vm6, %v5687_v54 }
 0x6f1   :  { %3605 = vmatprep.subr.msk.mxu1 %vm4931_vm0, %v5687_v54 }
 0x6f2   :  { %3606 = vmatpush3.msk.msra.mxu1 %vm4931_vm0, %v5687_v54 }
 0x792   :  { %v3574_v10 = vpop.f32.mrf.mxu0 }
 0x793   :  { %1190 = vmax.xlane.f32.xlu0 %v3574_v10 }
 0x794   :  { %v1179_v58 = vpop.f32.mrf.mxu0 }
 0x795   :  { %1188 = vmax.xlane.f32.xlu1 %v1179_v58 }
 0x7a6   :  { %1025 = vrot.lane.b32.xlu1 %v4548_v43, %s4092_s2 }
 0x7a9   :  { %1023 = vrot.lane.b32.xlu0 %v4568_v42, %s4092_s2 }
 0x7aa   :  { %1021 = vrot.lane.b32.xlu1 %v4586_v22, %s4092_s2 }
 0x7ad   :  { %1017 = vrot.lane.b32.xlu0 %v4611_v60, %s4092_s2 }
 0x7ae   :  { %1019 = vrot.lane.b32.xlu1 %v4599_v20, %s4092_s2 }
 0x7b1   :  { %1013 = vrot.lane.b32.xlu0 %v4632_v53, %s4092_s2 }
 0x7b2   :  { %1015 = vrot.lane.b32.xlu1 %v4623_v21, %s4092_s2 }
 0x7b5   :  { %1009 = vrot.lane.b32.xlu0 %v4650_v40, %s4092_s2 }
 0x7b6   :  { %1011 = vrot.lane.b32.xlu1 %v4641_v56, %s4092_s2 }
 0x7b9   :  { %1005 = vrot.lane.b32.xlu0 %v4668_v0, %s4092_s2 }
 0x7ba   :  { %1007 = vrot.lane.b32.xlu1 %v4659_v9, %s4092_s2 }
 0x7bd   :  { %1001 = vrot.lane.b32.xlu0 %v4686_v31, %s4092_s2 }
 0x7be   :  { %1003 = vrot.lane.b32.xlu1 %v4677_v61, %s4092_s2 }
 0x7c1   :  { %997 = vrot.lane.b32.xlu0 %v4704_v47, %s4092_s2 }
 0x7c2   :  { %999 = vrot.lane.b32.xlu1 %v4695_v17, %s4092_s2 }
 0x7c6   :  { %995 = vrot.lane.b32.xlu1 %v4712_v59, %s4092_s2 }
 0x81c   :  { %v1191_v2 = vpop.xlane.xlu0 %1190 }
 0x81d   :  { %v1193_v52 = vsub.f32 %v3574_v10, %v1191_v2  ;;  %v204_v10 = vand.u32 31, %v4148_v3 }
 0x81e   :  { %v1189_v30 = vpop.xlane.xlu1 %1188 }
 0x81f   :  { %v1196_v19 = vmul.f32 1.442695, %v1193_v52  ;;  %v1192_v63 = vsub.f32 %v1179_v58, %v1189_v30  ;;  %v205_v30 = vshra.s32 %v204_v10, 4 }
 0x820   :  { %v4961_v33 = vpop.permute.xlu0 %1023 }
 0x821   :  { %5724 = vst [vmem:[#allocation36_spill] sm:$0xff] %v4961_v33  ;;  %v1194_v6 = vmul.f32 1.442695, %v1192_v63  ;;  %v1057_v31 = vmul.f32 %v4961_v33, %v4542_v23  ;;  %3926 = vpow2.f32 %v1196_v19  ;;  %vm206_vm0 = vcmp.eq.s32.totalorder %v4417_v28, %v205_v30 }
 0x822   :  { %v4965_v61 = vpop.permute.xlu1 %1025  ;;  %vm207_vm6 = vcmp.eq.s32.totalorder %v4404_v55, %v205_v30 }
 0x823   :  { %3928 = vpow2.f32 %v1194_v6  ;;  %v1058_v47 = vmul.f32 %v4965_v61, %v4550_v29  ;;  %1323 = vrot.lane.b32.xlu1 %v1057_v31, %s4093_s3  ;;  %v4996_v6 = vsel %vm206_vm0, 1.0, %v5678_v16  ;;  %vm5741_vm0 = vmmov 0  }
 0x824   :  { %v4970_v59 = vpop.permute.xlu0 %1017  ;;  %5731 = vst [vmem:[#allocation43_spill] sm:$0xff] %v4996_v6 }
 0x825   :  { %5725 = vst [vmem:[#allocation37_spill] sm:$0xff] %v4970_v59  ;;  %1325 = vrot.lane.b32.xlu0 %v1058_v47, %s4093_s3  ;;  %v1054_v31 = vmul.f32 %v4970_v59, %v4550_v29  ;;  %v5003_v59 = vsel %vm207_vm6, 1.0, %v5678_v16  ;;  %vm5742_vm6 = vcmask 261120  }
 0x826   :  { %v4974_v58 = vpop.permute.xlu1 %1021  ;;  %5732 = vst [vmem:[#allocation44_spill] sm:$0xff] %v5003_v59  ;;  %vm5743_vm10 = vmmov %vm5742_vm6 }
 0x827   :  { %5726 = vst [vmem:[#allocation38_spill] sm:$0xff] %v4974_v58  ;;  %v1056_v2 = vmul.f32 %v4974_v58, %v4581_v38  ;;  %vm5744_vm2 = vmmov %vm5742_vm6 }
 0x828   :  { %v4978_v52 = vpop.permute.xlu0 %1013  ;;  %vm5746_vm3 = vmmov %vm5744_vm2 }
 0x829   :  { %5727 = vst [vmem:[#allocation39_spill] sm:$0xff] %v4978_v52  ;;  %1321 = vrot.lane.b32.xlu0 %v1056_v2, %s4093_s3  ;;  %v1052_v2 = vmul.f32 %v4978_v52, %v4581_v38 }
 0x82a   :  { %v4981_v19 = vpop.permute.xlu1 %1019 }
 0x82b   :  { %5728 = vst [vmem:[#allocation40_spill] sm:$0xff] %v4981_v19  ;;  %v1055_v3 = vmul.f32 %v4981_v19, %v4545_v49 }
 0x82c   :  { %v4988_v47 = vpop.permute.xlu0 %1009 }
 0x82d   :  { %5729 = vst [vmem:[#allocation41_spill] sm:$0xff] %v4988_v47  ;;  %1317 = vrot.lane.b32.xlu0 %v1054_v31, %s4093_s3  ;;  %1319 = vrot.lane.b32.xlu1 %v1055_v3, %s4093_s3 }
 0x82e   :  { %v4993_v63 = vpop.permute.xlu1 %1015  ;;  %v3927_v10 = vpop.eup %3926 }
 0x82f   :  { %5730 = vst [vmem:[#allocation42_spill] sm:$0xff] %v4993_v63  ;;  %v1053_v19 = vmul.f32 %v4993_v63, %v4542_v23  ;;  %v5015_v52 = vmul.f32 %v3927_v10, %v5003_v59  ;;  %v1050_v63 = vmul.f32 %v4988_v47, %v4550_v29 }
 0x830   :  { %v3929_v30 = vpop.eup %3928  ;;  %v5005_v58 = vpop.permute.xlu0 %1005 }
 0x831   :  { %5733 = vst [vmem:[#allocation45_spill] sm:$0xff] %v5005_v58  ;;  %1313 = vrot.lane.b32.xlu0 %v1052_v2, %s4093_s3  ;;  %1315 = vrot.lane.b32.xlu1 %v1053_v19, %s4093_s3  ;;  %v5010_v31 = vmul.f32 %v3929_v30, %v4996_v6  ;;  %v1048_v10 = vmul.f32 %v5005_v58, %v4581_v38 }
 0x832   :  { %v5012_v3 = vpop.permute.xlu1 %1011 }
 0x833   :  { %5734 = vst [vmem:[#allocation46_spill] sm:$0xff] %v5012_v3  ;;  %v1051_v33 = vmul.f32 %v5012_v3, %v4545_v49  ;;  %3607 = vmatprep.mubr.f32.mxu1 %v5010_v31 }
 0x834   :  { %3608 = vmatmul.mubr.f32.vlgmr.msra.gmra.mxu1 %v5015_v52  ;;  %v5025_v19 = vpop.permute.xlu0 %1001 }
 0x835   :  { %1309 = vrot.lane.b32.xlu0 %v1050_v63, %s4093_s3  ;;  %1311 = vrot.lane.b32.xlu1 %v1051_v33, %s4093_s3  ;;  %5735 = vst [vmem:[#allocation47_spill] sm:$0xff] %v5025_v19  ;;  %v1046_v63 = vmul.f32 %v5025_v19, %v4550_v29 }
 0x836   :  { %v5027_v2 = vpop.permute.xlu1 %1007 }
 0x837   :  { %5736 = vst [vmem:[#allocation48_spill] sm:$0xff] %v5027_v2  ;;  %v1049_v30 = vmul.f32 %v5027_v2, %v4542_v23  ;;  %v3145_v2 = vld [vmem:[#allocation8 + $0xa] ss:$0 sm:$0xff] }
 0x838   :  { %v5041_v47 = vpop.permute.xlu0 %997 }
 0x839   :  { %1305 = vrot.lane.b32.xlu0 %v1048_v10, %s4093_s3  ;;  %1307 = vrot.lane.b32.xlu1 %v1049_v30, %s4093_s3  ;;  %5738 = vst [vmem:[#allocation50_spill] sm:$0xff] %v5041_v47  ;;  %v1044_v10 = vmul.f32 %v5041_v47, %v4581_v38 }
 0x83a   :  { %v5035_v3 = vpop.permute.xlu1 %1003 }
 0x83b   :  { %5737 = vst [vmem:[#allocation49_spill] sm:$0xff] %v5035_v3  ;;  %v1047_v33 = vmul.f32 %v5035_v3, %v4545_v49 }
 0x83d   :  { %1301 = vrot.lane.b32.xlu0 %v1046_v63, %s4093_s3  ;;  %1303 = vrot.lane.b32.xlu1 %v1047_v33, %s4093_s3 }
 0x83e   :  { %v5045_v58 = vpop.permute.xlu1 %999 }
 0x83f   :  { %5739 = vst [vmem:[#allocation51_spill] sm:$0xff] %v5045_v58  ;;  %v1045_v30 = vmul.f32 %v5045_v58, %v4542_v23 }
 0x841   :  { %1297 = vrot.lane.b32.xlu0 %v1044_v10, %s4093_s3  ;;  %1299 = vrot.lane.b32.xlu1 %v1045_v30, %s4093_s3 }
 0x842   :  { %v5053_v29 = vpop.permute.xlu1 %995 }
 0x843   :  { %5740 = vst [vmem:[#allocation52_spill] sm:$0xff] %v5053_v29  ;;  %v1043_v3 = vmul.f32 %v5053_v29, %v4545_v49 }
 0x845   :  { %1295 = vrot.lane.b32.xlu1 %v1043_v3, %s4093_s3  ;;  %1426 = vrot.lane.b32.xlu0 %v4512_v14, %s4092_s2 }
 0x849   :  { %1424 = vrot.lane.b32.xlu1 %v4514_v13, %s4092_s2 }
 0x895   :  { %v1324_v23 = vpop.permute.xlu1 %1323 }
 0x897   :  { %v1326_v38 = vpop.permute.xlu0 %1325 }
 0x898   :  { %3610 = vmatprep.subr.mxu1 %v1326_v38 }
 0x899   :  { %3611 = vmatpush3.msra.mxu1 %v1326_v38 }
 0x89a   :  { %3612 = vmatprep.subr.mxu1 %v1324_v23 }
 0x89b   :  { %v1322_v63 = vpop.permute.xlu0 %1321  ;;  %3613 = vmatpush3.msra.mxu1 %v1324_v23 }
 0x89c   :  { %3614 = vmatprep.subr.mxu1 %v1322_v63 }
 0x89d   :  { %3615 = vmatpush3.msra.mxu1 %v1322_v63 }
 0x89f   :  { %v1318_v33 = vpop.permute.xlu0 %1317  ;;  %v1320_v10 = vpop.permute.xlu1 %1319 }
 0x8a0   :  { %3616 = vmatprep.subr.mxu1 %v1320_v10 }
 0x8a1   :  { %3617 = vmatpush3.msra.mxu1 %v1320_v10 }
 0x8a2   :  { %3618 = vmatprep.subr.mxu1 %v1318_v33 }
 0x8a3   :  { %v1314_v49 = vpop.permute.xlu0 %1313  ;;  %3619 = vmatpush3.msra.mxu1 %v1318_v33  ;;  %v1316_v14 = vpop.permute.xlu1 %1315 }
 0x8a4   :  { %3620 = vmatprep.subr.mxu1 %v1316_v14 }
 0x8a5   :  { %3621 = vmatpush3.msra.mxu1 %v1316_v14 }
 0x8a6   :  { %3622 = vmatprep.subr.mxu1 %v1314_v49 }
 0x8a7   :  { %v1310_v13 = vpop.permute.xlu0 %1309  ;;  %3623 = vmatpush3.msra.mxu1 %v1314_v49  ;;  %v1312_v3 = vpop.permute.xlu1 %1311 }
 0x8a8   :  { %3624 = vmatprep.subr.mxu1 %v1312_v3 }
 0x8a9   :  { %3625 = vmatpush3.msra.mxu1 %v1312_v3  ;;  %v5636_v3 = vsub.f32 1.0, %v4996_v6 }
 0x8aa   :  { %3626 = vmatprep.subr.mxu1 %v1310_v13 }
 0x8ab   :  { %v1306_v30 = vpop.permute.xlu0 %1305  ;;  %3627 = vmatpush3.msra.mxu1 %v1310_v13  ;;  %v1308_v38 = vpop.permute.xlu1 %1307  ;;  %v5633_v13 = vsub.f32 1.0, %v5003_v59 }
 0x8ac   :  { %3628 = vmatprep.subr.mxu1 %v1308_v38 }
 0x8ad   :  { %3629 = vmatpush3.msra.mxu1 %v1308_v38 }
 0x8ae   :  { %3630 = vmatprep.subr.mxu1 %v1306_v30 }
 0x8af   :  { %v1302_v23 = vpop.permute.xlu0 %1301  ;;  %3631 = vmatpush3.msra.mxu1 %v1306_v30  ;;  %v1304_v63 = vpop.permute.xlu1 %1303 }
 0x8b0   :  { %3632 = vmatprep.subr.mxu1 %v1304_v63 }
 0x8b1   :  { %3633 = vmatpush3.msra.mxu1 %v1304_v63 }
 0x8b2   :  { %3634 = vmatprep.subr.mxu1 %v1302_v23 }
 0x8b3   :  { %v1298_v33 = vpop.permute.xlu0 %1297  ;;  %3635 = vmatpush3.msra.mxu1 %v1302_v23  ;;  %v1300_v10 = vpop.permute.xlu1 %1299 }
 0x8b4   :  { %3636 = vmatprep.subr.mxu1 %v1300_v10 }
 0x8b5   :  { %3637 = vmatpush3.msra.mxu1 %v1300_v10 }
 0x8b6   :  { %3638 = vmatprep.subr.mxu1 %v1298_v33 }
 0x8b7   :  { %3639 = vmatpush3.msra.mxu1 %v1298_v33  ;;  %v1296_v49 = vpop.permute.xlu1 %1295  ;;  %v1427_v14 = vpop.permute.xlu0 %1426 }
 0x8b8   :  { %3640 = vmatprep.subr.mxu1 %v1296_v49  ;;  %3646 = vmatpush3.bf16.msra.mxu0 %v1427_v14 }
 0x8b9   :  { %3641 = vmatpush3.msra.mxu1 %v1296_v49  ;;  %3647 = vmatprep.subr.bf16.mxu0 %v5678_v16 }
 0x8ba   :  { %3653 = vmatprep.subr.bf16.mxu1 %v5678_v16 }
 0x8bb   :  { %v1425_v29 = vpop.permute.xlu1 %1424 }
 0x8bc   :  { %3648 = vmatpush3.bf16.msra.mxu0 %v1425_v29 }
 0x8bd   :  { %3661 = vmatprep.subr.bf16.mxu0 %v5678_v16 }
 0x8f4   :  { %v3609_v30 = vpop.f32.mrf.mxu1 }
 0x8f5   :  { %v1272_v38 = vadd.f32 %v3609_v30, %v5633_v13 }
 0x8f6   :  { %v1266_v23 = vpop.f32.mrf.mxu1 }
 0x8f7   :  { %v1267_v63 = vadd.f32 %v1266_v23, %v5636_v3  ;;  %3930 = vrcp.f32 %v1272_v38 }
 0x8f9   :  { %3932 = vrcp.f32 %v1267_v63 }
 0x904   :  { %v3931_v33 = vpop.eup %3930 }
 0x905   :  { %v1278_v14 = vmul.f32 %v3931_v33, %v5015_v52 }
 0x906   :  { %v3933_v10 = vpop.eup %3932 }
 0x907   :  { %v1277_v49 = vmul.f32 %v3933_v10, %v5010_v31  ;;  %v3142_v31 = vld [vmem:[#allocation8 + $0x4] ss:$0 sm:$0xff] }
 0x909   :  { %3642 = vmatprep.mubr.f32.mxu1 %v1277_v49 }
 0x90a   :  { %3643 = vmatmul.mubr.f32.vlgmr.msra.gmra.mxu1 %v1278_v14 }
 0x90b   :  { %3657 = vmatprep.mubr.msk.bf16.mxu1 %vm5741_vm0, %v5678_v16 }
 0x9ca   :  { %v3644_v30 = vpop.f32.mrf.mxu1 }
 0x9cc   :  { %v1409_v13 = vpop.f32.mrf.mxu1 }
 0x9cd   :  { %v1418_v23 = vpack.c.bf16 %v3644_v30, %v1409_v13 }
 0x9cf   :  { %3650 = vmatmul.mubr.msk.bf16.vlgmr.msra.gmra.mxu0 %vm5742_vm6, %v1418_v23  ;;  %vm5745_vm6 = vmmov %vm5744_vm2 }
 0x9d0   :  { %3665 = vmatprep.mubr.msk.bf16.mxu0 %vm5741_vm0, %v5678_v16 }
 0xa8f   :  { %v1467_v38 = vpop.f32.mrf.mxu0 }
 0xa90   :  { %v1468_v52 = vadd.f32 %v3142_v31, %v1467_v38 }
 0xa91   :  { %v3651_v63 = vpop.f32.mrf.mxu0 }
 0xa92   :  { %v1474_v33 = vadd.f32 %v1468_v52, %v4571_v62  ;;  %v3906_v62 = vld [vmem:[#allocation7 + $0x20] ss:$12 sps:$4 sm:$0xff]   ;;  %v3907_v52 = vld [vmem:[#allocation7 + $0x8] ss:$12 sps:$4 sm:$0xff]  }
 0xa93   :  { %v1470_v10 = vpop.f32.mrf.mxu0  ;;  %3654 = vmatpush3.bf16.msra.mxu1 %v3906_v62 }
 0xa94   :  { %v1471_v49 = vadd.f32 %v3142_v31, %v1470_v10  ;;  %v1478_v29 = vsel %vm5743_vm10, %v1474_v33, 0.0  ;;  %v1486_v14 = vmul.f32 %v1474_v33, %v1474_v33  ;;  %3655 = vmatprep.subr.bf16.mxu1 %v5678_v16  ;;  %vm5747_vm10 = vcmask 523264  }
 0xa95   :  { %1479 = vadd.xlane.f32.xlu0 %v1478_v29  ;;  %v3652_v3 = vpop.f32.mrf.mxu0 }
 0xa96   :  { %v1475_v13 = vadd.f32 %v1471_v49, %v4573_v35  ;;  %v1488_v30 = vsel %vm5744_vm2, %v1486_v14, 0.0 }
 0xa97   :  { %3656 = vmatpush3.bf16.msra.mxu1 %v3907_v52 }
 0xa98   :  { %v1481_v23 = vsel %vm5745_vm6, %v1475_v13, 0.0  ;;  %v1487_v59 = vmul.f32 %v1475_v13, %v1475_v13  ;;  %3669 = vmatprep.subr.bf16.mxu1 %v5678_v16 }
 0xa99   :  { %1489 = vadd.xlane.f32.xlu0 %v1488_v30  ;;  %1482 = vadd.xlane.f32.xlu1 %v1481_v23 }
 0xa9a   :  { %v1491_v38 = vsel %vm5746_vm3, %v1487_v59, 0.0  ;;  %vm5748_vm3 = vmmov %vm5747_vm10 }
 0xa9b   :  { %vm5749_vm6 = vmmov %vm5748_vm3 }
 0xa9d   :  { %1492 = vadd.xlane.f32.xlu0 %v1491_v38 }
 0xaaa   :  { %1596 = vrot.lane.b32.xlu1 %v3906_v62, %s4094_s11 }
 0xab3   :  { %1594 = vrot.lane.b32.xlu0 %v3907_v52, %s4094_s11 }
 0xb1e   :  { %v1480_v35 = vpop.xlane.xlu0 %1479 }
 0xb1f   :  { %v1484_v3 = vmul.f32 0.03125, %v1480_v35 }
 0xb21   :  { %v1496_v10 = vmul.f32 %v1484_v3, %v1484_v3  ;;  %v1500_v35 = vsub.f32 %v1474_v33, %v1484_v3 }
 0xb22   :  { %v1490_v31 = vpop.xlane.xlu0 %1489  ;;  %v1483_v63 = vpop.xlane.xlu1 %1482 }
 0xb23   :  { %v1494_v49 = vmul.f32 0.03125, %v1490_v31  ;;  %v1485_v59 = vmul.f32 0.03125, %v1483_v63  ;;  %v3144_v31 = vld [vmem:[#allocation8 + $0x9] ss:$0 sm:$0xff] }
 0xb25   :  { %v1498_v29 = vsub.f32 %v1494_v49, %v1496_v10  ;;  %v1497_v23 = vmul.f32 %v1485_v59, %v1485_v59  ;;  %v1501_v63 = vsub.f32 %v1475_v13, %v1485_v59 }
 0xb26   :  { %v1493_v14 = vpop.xlane.xlu0 %1492  ;;  %v1597_v58 = vpop.permute.xlu1 %1596 }
 0xb27   :  { %v1502_v30 = vadd.f32 1e-05, %v1498_v29  ;;  %v1495_v38 = vmul.f32 0.03125, %v1493_v14  ;;  %v1605_v52 = vsel %vm5747_vm10, %v1597_v58, 0 }
 0xb28   :  { %3662 = vmatpush3.bf16.xpose.msra.mxu0 %v1605_v52 }
 0xb29   :  { %3934 = vrsqrt.f32 %v1502_v30  ;;  %v1499_v62 = vsub.f32 %v1495_v38, %v1497_v23  ;;  %3663 = vmatprep.subr.bf16.mxu0 %v5678_v16 }
 0xb2a   :  { %v1595_v58 = vpop.permute.xlu0 %1594 }
 0xb2b   :  { %v1503_v6 = vadd.f32 1e-05, %v1499_v62 }
 0xb2d   :  { %3936 = vrsqrt.f32 %v1503_v6  ;;  %v1602_v6 = vsel %vm5748_vm3, %v1595_v58, 0 }
 0xb30   :  { %3664 = vmatpush3.bf16.xpose.msra.mxu0 %v1602_v6 }
 0xb31   :  { %3696 = vmatprep.subr.msk.mxu0 %vm4331_vm11, %v5687_v54 }
 0xb36   :  { %v3935_v47 = vpop.eup %3934 }
 0xb37   :  { %v1506_v19 = vmul.f32 %v3935_v47, %v1500_v35  ;;  %v3146_v47 = vld [vmem:[#allocation8 + $0x5] ss:$0 sm:$0xff] }
 0xb39   :  { %v1512_v29 = vmul.f32 %v3144_v31, %v1506_v19 }
 0xb3a   :  { %v3937_v10 = vpop.eup %3936 }
 0xb3b   :  { %v1507_v49 = vmul.f32 %v3937_v10, %v1501_v63  ;;  %v1518_v30 = vadd.f32 %v3145_v2, %v1512_v29 }
 0xb3d   :  { %v1513_v14 = vmul.f32 %v3144_v31, %v1507_v49 }
 0xb3f   :  { %v1519_v23 = vadd.f32 %v3145_v2, %v1513_v14 }
 0xb41   :  { %v1524_v38 = vpack.c.bf16 %v1519_v23, %v1518_v30 }
 0xb43   :  { %3658 = vmatmul.mubr.msk.bf16.vlgmr.msra.gmra.mxu1 %vm5744_vm2, %v1524_v38 }
 0xb44   :  { %3673 = vmatprep.mubr.msk.bf16.mxu1 %vm5741_vm0, %v5678_v16 }
 0xc03   :  { %v1579_v19 = vpop.f32.mrf.mxu1 }
 0xc04   :  { %v1580_v13 = vadd.f32 %v3146_v47, %v1579_v19 }
 0xc05   :  { %v3659_v33 = vpop.f32.mrf.mxu1 }
 0xc06   :  { %v1586_v62 = vmax.f32 %v1580_v13, 0.0 }
 0xc07   :  { %v1582_v3 = vpop.f32.mrf.mxu1 }
 0xc08   :  { %v1583_v2 = vadd.f32 %v3146_v47, %v1582_v3 }
 0xc09   :  { %v3660_v59 = vpop.f32.mrf.mxu1 }
 0xc0a   :  { %v1587_v52 = vmax.f32 %v1583_v2, 0.0 }
 0xc0c   :  { %v1588_v35 = vpack.c.bf16 %v1587_v52, %v1586_v62 }
 0xc0e   :  { %3666 = vmatmul.mubr.msk.bf16.vlgmr.msra.gmra.mxu0 %vm5749_vm6, %v1588_v35 }
 0xc0f   :  { %3697 = vmatpush3.msk.msra.mxu0 %vm4331_vm11, %v5687_v54  ;;  %vm5750_vm11 = vcmp.eq.s32.totalorder %v4404_v55, %v4154_v5 }
 0xc10   :  { %3698 = vmatprep.subr.msk.mxu0 %vm4345_vm12, %v5687_v54 }
 0xc11   :  { %3699 = vmatpush3.msk.msra.mxu0 %vm4345_vm12, %v5687_v54  ;;  %vm5751_vm12 = vmmov %vm5750_vm11 }
 0xc12   :  { %3700 = vmatprep.subr.msk.mxu0 %vm4357_vm13, %v5687_v54 }
 0xc13   :  { %3701 = vmatpush3.msk.msra.mxu0 %vm4357_vm13, %v5687_v54  ;;  %vm5752_vm13 = vcmp.eq.s32.totalorder %v4417_v28, %v4154_v5  ;;  %v5151_v28 = vld [vmem:[#allocation7 + $0x48] ss:$12 sps:$4 sm:$0xff]  }
 0xc14   :  { %3702 = vmatprep.subr.msk.mxu0 %vm4371_vm14, %v5687_v54  ;;  %3670 = vmatpush3.bf16.msra.mxu1 %v5151_v28 }
 0xc15   :  { %3703 = vmatpush3.msk.msra.mxu0 %vm4371_vm14, %v5687_v54  ;;  %vm5753_vm14 = vmmov %vm5752_vm13  ;;  %3671 = vmatprep.subr.bf16.mxu1 %v5678_v16 }
 0xc16   :  { %3704 = vmatprep.subr.msk.mxu0 %vm4385_vm15, %v5687_v54 }
 0xc17   :  { %3705 = vmatpush3.msk.msra.mxu0 %vm4385_vm15, %v5687_v54  ;;  %vm5754_vm15 = vmmov %vm5744_vm2 }
 0xc18   :  { %3706 = vmatprep.subr.msk.mxu0 %vm4399_vm1, %v5687_v54 }
 0xc19   :  { %3707 = vmatpush3.msk.msra.mxu0 %vm4399_vm1, %v5687_v54  ;;  %vm5755_vm1 = vmmov %vm5744_vm2 }
 0xc1a   :  { %3708 = vmatprep.subr.msk.mxu0 %vm5750_vm11, %v5687_v54  ;;  %vm5756_vm10 = vmmov %vm5755_vm1 }
 0xc1b   :  { %3709 = vmatpush3.msk.msra.mxu0 %vm5751_vm12, %v5687_v54  ;;  %vm5757_vm2 = vmmov %vm5755_vm1 }
 0xc1c   :  { %3710 = vmatprep.subr.msk.mxu0 %vm5752_vm13, %v5687_v54  ;;  %vm5758_vm3 = vmmov %vm5755_vm1 }
 0xc1d   :  { %3711 = vmatpush3.msk.msra.mxu0 %vm5753_vm14, %v5687_v54  ;;  %vm5759_vm6 = vmmov %vm5755_vm1 }
 0xc1e   :  { %vm5765_vm11 = vmmov %vm5755_vm1 }
 0xc1f   :  { %vm5766_vm12 = vmmov %vm5755_vm1 }
 0xc20   :  { %vm5767_vm13 = vmmov %vm5755_vm1 }
 0xc21   :  { %vm5768_vm14 = vmmov %vm5755_vm1 }
 0xcce   :  { %v1641_v46 = vpop.f32.mrf.mxu0 }
 0xccf   :  { %v1642_v27 = vadd.f32 %v3150_v41, %v1641_v46 }
 0xcd0   :  { %v3667_v50 = vpop.f32.mrf.mxu0 }
 0xcd1   :  { %v1648_v26 = vadd.f32 %v1642_v27, %v1518_v30  ;;  %v5154_v30 = vld [vmem:[#allocation7 + $0x30] ss:$12 sps:$4 sm:$0xff]  }
 0xcd2   :  { %v1644_v18 = vpop.f32.mrf.mxu0  ;;  %3672 = vmatpush3.bf16.msra.mxu1 %v5154_v30 }
 0xcd3   :  { %v1645_v31 = vadd.f32 %v3150_v41, %v1644_v18  ;;  %v1652_v55 = vsel %vm5754_vm15, %v1648_v26, 0.0  ;;  %v1660_v63 = vmul.f32 %v1648_v26, %v1648_v26  ;;  %v3152_v18 = vld [vmem:[#allocation8 + $0xb] ss:$0 sm:$0xff]  ;;  %vm5769_vm15 = vmmov %vm5755_vm1 }
 0xcd4   :  { %1653 = vadd.xlane.f32.xlu1 %v1652_v55  ;;  %v3668_v10 = vpop.f32.mrf.mxu0 }
 0xcd5   :  { %v1649_v49 = vadd.f32 %v1645_v31, %v1519_v23  ;;  %v1662_v29 = vsel %vm5755_vm1, %v1660_v63, 0.0 }
 0xcd7   :  { %v1655_v14 = vsel %vm5756_vm10, %v1649_v49, 0.0  ;;  %v1661_v38 = vmul.f32 %v1649_v49, %v1649_v49  ;;  %vm5770_vm10 = vmmov %vm5755_vm1 }
 0xcd8   :  { %1663 = vadd.xlane.f32.xlu1 %v1662_v29  ;;  %1656 = vadd.xlane.f32.xlu0 %v1655_v14  ;;  %v3153_v29 = vld [vmem:[#allocation8 + $0xc] ss:$0 sm:$0xff] }
 0xcd9   :  { %v1665_v5 = vsel %vm5757_vm2, %v1661_v38, 0.0  ;;  %vm5771_vm2 = vmmov %vm5755_vm1 }
 0xcdc   :  { %1666 = vadd.xlane.f32.xlu0 %v1665_v5 }
 0xd5d   :  { %v1654_v23 = vpop.xlane.xlu1 %1653 }
 0xd5e   :  { %v1658_v58 = vmul.f32 0.03125, %v1654_v23 }
 0xd60   :  { %v1670_v19 = vmul.f32 %v1658_v58, %v1658_v58  ;;  %v1674_v46 = vsub.f32 %v1648_v26, %v1658_v58 }
 0xd61   :  { %v1664_v6 = vpop.xlane.xlu1 %1663  ;;  %v1657_v47 = vpop.xlane.xlu0 %1656 }
 0xd62   :  { %v1668_v33 = vmul.f32 0.03125, %v1664_v6  ;;  %v1659_v13 = vmul.f32 0.03125, %v1657_v47  ;;  %v3154_v6 = vld [vmem:[#allocation8 + $0x10] ss:$0 sm:$0xff] }
 0xd64   :  { %v1672_v3 = vsub.f32 %v1668_v33, %v1670_v19  ;;  %v1671_v62 = vmul.f32 %v1659_v13, %v1659_v13  ;;  %v1675_v31 = vsub.f32 %v1649_v49, %v1659_v13 }
 0xd65   :  { %v1667_v2 = vpop.xlane.xlu0 %1666 }
 0xd66   :  { %v1676_v59 = vadd.f32 1e-05, %v1672_v3  ;;  %v1669_v52 = vmul.f32 0.03125, %v1667_v2 }
 0xd68   :  { %3938 = vrsqrt.f32 %v1676_v59  ;;  %v1673_v35 = vsub.f32 %v1669_v52, %v1671_v62  ;;  %v5760_v59 = vld [vmem:[#allocation15_spill] sm:$0xff] }
 0xd6a   :  { %v1677_v41 = vadd.f32 1e-05, %v1673_v35  ;;  %v5762_v35 = vld [vmem:[#allocation16_spill] sm:$0xff] }
 0xd6c   :  { %3940 = vrsqrt.f32 %v1677_v41 }
 0xd75   :  { %v3939_v27 = vpop.eup %3938 }
 0xd76   :  { %v1680_v50 = vmul.f32 %v3939_v27, %v1674_v46  ;;  %v5764_v46 = vld [vmem:[#allocation18_spill] sm:$0xff] }
 0xd78   :  { %v1686_v10 = vmul.f32 %v3152_v18, %v1680_v50 }
 0xd79   :  { %v3941_v55 = vpop.eup %3940 }
 0xd7a   :  { %v1681_v63 = vmul.f32 %v3941_v55, %v1675_v31  ;;  %v5158_v38 = vadd.f32 %v3153_v29, %v1686_v10 }
 0xd7c   :  { %v1687_v14 = vmul.f32 %v3152_v18, %v1681_v63 }
 0xd7e   :  { %v5160_v5 = vadd.f32 %v3153_v29, %v1687_v14 }
 0xd80   :  { %v1699_v23 = vpack.c.bf16 %v5160_v5, %v5158_v38 }
 0xd82   :  { %3674 = vmatmul.mubr.msk.bf16.vlgmr.msra.gmra.mxu1 %vm5758_vm3, %v1699_v23  ;;  %vm5772_vm3 = vmmov %vm5755_vm1 }
 0xe42   :  { %v1755_v26 = vpop.f32.mrf.mxu1 }
 0xe43   :  { %v5165_v58 = vadd.f32 %v3154_v6, %v1755_v26 }
 0xe44   :  { %v3675_v47 = vpop.f32.mrf.mxu1 }
 0xe45   :  { %3693 = vmatprep.mubr.msk.f32.mxu1 %vm5759_vm6, %v5165_v58  ;;  %v1768_v49 = vmul.f32 %v5165_v58, %v4268_v39  ;;  %v5761_v39 = vld [vmem:[#allocation19_spill] sm:$0xff]  ;;  %v1762_v27 = vmul.f32 %v5165_v58, %v5764_v46  ;;  %vm5773_vm6 = vmmov %vm5755_vm1 }
 0xe46   :  { %v1758_v19 = vpop.f32.mrf.mxu1 }
 0xe47   :  { %v5171_v33 = vadd.f32 %v3154_v6, %v1758_v19  ;;  %1798 = vrot.lane.b32.xlu0 %v1768_v49, %s4093_s3  ;;  %v5782_v49 = vld [vmem:[#allocation20_spill] sm:$0xff] }
 0xe48   :  { %v3676_v13 = vpop.f32.mrf.mxu1  ;;  %v1776_v19 = vmul.f32 %v5165_v58, %v5782_v49  ;;  %v5791_v49 = vld [vmem:[#allocation29_spill] sm:$0xff] }
 0xe49   :  { %v1769_v3 = vmul.f32 %v5171_v33, %v4262_v34  ;;  %v1765_v2 = vmul.f32 %v5171_v33, %v4285_v48  ;;  %v1767_v62 = vmul.f32 %v5171_v33, %v5760_v59  ;;  %v1763_v52 = vmul.f32 %v5171_v33, %v5761_v39  ;;  %v5763_v48 = vld [vmem:[#allocation17_spill] sm:$0xff]  ;;  %v5783_v13 = vld [vmem:[#allocation22_spill] sm:$0xff] }
 0xe4a   :  { %v1766_v34 = vmul.f32 %v5165_v58, %v5762_v35  ;;  %v1764_v41 = vmul.f32 %v5165_v58, %v5763_v48 }
 0xe4b   :  { %1800 = vrot.lane.b32.xlu1 %v1769_v3, %s4093_s3  ;;  %1792 = vrot.lane.b32.xlu0 %v1765_v2, %s4093_s3  ;;  %v1774_v3 = vmul.f32 %v5165_v58, %v5783_v13  ;;  %v5784_v2 = vld [vmem:[#allocation21_spill] sm:$0xff] }
 0xe4c   :  { %v1777_v59 = vmul.f32 %v5171_v33, %v5784_v2 }
 0xe4f   :  { %1796 = vrot.lane.b32.xlu1 %v1767_v62, %s4093_s3  ;;  %1788 = vrot.lane.b32.xlu0 %v1763_v52, %s4093_s3  ;;  %v5785_v62 = vld [vmem:[#allocation24_spill] sm:$0xff]  ;;  %v5786_v52 = vld [vmem:[#allocation23_spill] sm:$0xff] }
 0xe50   :  { %v1772_v39 = vmul.f32 %v5165_v58, %v5785_v62  ;;  %v1775_v35 = vmul.f32 %v5171_v33, %v5786_v52  ;;  %v5253_v62 = vld [vmem:[#allocation7 + $0x34] ss:$12 sps:$4 sm:$0xff]  }
 0xe53   :  { %1794 = vrot.lane.b32.xlu1 %v1766_v34, %s4093_s3  ;;  %v5787_v34 = vld [vmem:[#allocation26_spill] sm:$0xff] }
 0xe54   :  { %v1770_v48 = vmul.f32 %v5165_v58, %v5787_v34 }
 0xe57   :  { %1790 = vrot.lane.b32.xlu1 %v1764_v41, %s4093_s3  ;;  %v5788_v41 = vld [vmem:[#allocation25_spill] sm:$0xff] }
 0xe58   :  { %v1773_v46 = vmul.f32 %v5171_v33, %v5788_v41 }
 0xe5b   :  { %1786 = vrot.lane.b32.xlu1 %v1762_v27, %s4093_s3  ;;  %v5789_v27 = vld [vmem:[#allocation27_spill] sm:$0xff] }
 0xeb9   :  { %v1799_v18 = vpop.permute.xlu0 %1798 }
 0xebd   :  { %v1801_v50 = vpop.permute.xlu1 %1800  ;;  %v1793_v63 = vpop.permute.xlu0 %1792 }
 0xebe   :  { %3677 = vmatprep.subr.msk.mxu1 %vm5765_vm11, %v1801_v50  ;;  %vm5774_vm11 = vmmov %vm5755_vm1 }
 0xebf   :  { %3678 = vmatpush3.xpose.msk.msra.mxu1 %vm5766_vm12, %v1801_v50  ;;  %vm5775_vm12 = vmmov %vm5755_vm1  ;;  %v1771_v50 = vmul.f32 %v5171_v33, %v5789_v27 }
 0xec0   :  { %3679 = vmatprep.subr.msk.mxu1 %vm5767_vm13, %v1799_v18  ;;  %vm5776_vm13 = vmmov %vm5755_vm1 }
 0xec1   :  { %v1797_v31 = vpop.permute.xlu1 %1796  ;;  %v1789_v29 = vpop.permute.xlu0 %1788 }
 0xec3   :  { %3680 = vmatpush3.xpose.msk.msra.mxu1 %vm5768_vm14, %v1799_v18  ;;  %vm5777_vm14 = vmmov %vm5755_vm1 }
 0xec4   :  { %3681 = vmatprep.subr.msk.mxu1 %vm5769_vm15, %v1797_v31  ;;  %vm5778_vm15 = vmmov %vm5755_vm1 }
 0xec5   :  { %v1795_v55 = vpop.permute.xlu1 %1794 }
 0xec7   :  { %3682 = vmatpush3.xpose.msk.msra.mxu1 %vm5755_vm1, %v1797_v31 }
 0xec8   :  { %3683 = vmatprep.subr.msk.mxu1 %vm5770_vm10, %v1795_v55  ;;  %vm5779_vm10 = vmmov %vm5755_vm1 }
 0xec9   :  { %v1791_v10 = vpop.permute.xlu1 %1790 }
 0xecb   :  { %3684 = vmatpush3.xpose.msk.msra.mxu1 %vm5771_vm2, %v1795_v55  ;;  %vm5780_vm2 = vcmask 523264  }
 0xecc   :  { %3685 = vmatprep.subr.msk.mxu1 %vm5772_vm3, %v1793_v63  ;;  %vm5781_vm3 = vmmov %vm5780_vm2 }
 0xecd   :  { %v1787_v14 = vpop.permute.xlu1 %1786 }
 0xecf   :  { %3686 = vmatpush3.xpose.msk.msra.mxu1 %vm5773_vm6, %v1793_v63  ;;  %vm5792_vm6 = vmmov %vm5780_vm2 }
 0xed0   :  { %3687 = vmatprep.subr.msk.mxu1 %vm5774_vm11, %v1791_v10  ;;  %vm5793_vm11 = vmmov %vm5780_vm2 }
 0xed3   :  { %3688 = vmatpush3.xpose.msk.msra.mxu1 %vm5775_vm12, %v1791_v10  ;;  %vm5796_vm12 = vmmov %vm5780_vm2 }
 0xed4   :  { %3689 = vmatprep.subr.msk.mxu1 %vm5776_vm13, %v1789_v29  ;;  %vm5797_vm13 = vmmov %vm5780_vm2 }
 0xed7   :  { %3690 = vmatpush3.xpose.msk.msra.mxu1 %vm5777_vm14, %v1789_v29  ;;  %vm5798_vm14 = vmmov %vm5755_vm1 }
 0xed8   :  { %3691 = vmatprep.subr.msk.mxu1 %vm5778_vm15, %v1787_v14  ;;  %vm5800_vm15 = vmmov %vm5755_vm1 }
 0xedb   :  { %3692 = vmatpush3.xpose.msk.msra.mxu1 %vm5755_vm1, %v1787_v14 }
 0xedc   :  { %3734 = vmatprep.subr.bf16.mxu1 %v5678_v16 }
 0xede   :  { %3694 = vmatmul.mubr.msk.f32.vlgmr.msra.gmra.mxu1 %vm5779_vm10, %v5171_v33  ;;  %vm5807_vm10 = vnez %v5708_v8  ;;  %v3188_v8 = vld [vmem:[#allocation8 + $0x13] ss:$0 sm:$0xff] }
 0xedf   :  { %3738 = vmatprep.mubr.msk.bf16.mxu1 %vm5741_vm0, %v5678_v16 }
 0xf9e   :  { %v3695_v23 = vpop.f32.mrf.mxu1 }
 0xf9f   :  { %v1902_v6 = vsel %vm5780_vm2, %v3695_v23, -inf  ;;  %vm5808_vm2 = vnez %v5711_v4 }
 0xfa0   :  { %1903 = vmax.xlane.f32.xlu1 %v1902_v6  ;;  %v1890_v26 = vpop.f32.mrf.mxu1 }
 0xfa1   :  { %v1899_v47 = vsel %vm5781_vm3, %v1890_v26, -inf  ;;  %vm5809_vm3 = vnez %v5714_v7 }
 0xfa2   :  { %1900 = vmax.xlane.f32.xlu0 %v1899_v47  ;;  %v5790_v47 = vld [vmem:[#allocation28_spill] sm:$0xff] }
 0xfa3   :  { %v5795_v41 = vsub.f32 1.0, %v5790_v47 }
 0xfb1   :  { %2018 = vrot.lane.b32.xlu1 %v1776_v19, %s4094_s11 }
 0xfb5   :  { %2014 = vrot.lane.b32.xlu1 %v1774_v3, %s4094_s11 }
 0xfb8   :  { %2020 = vrot.lane.b32.xlu0 %v1777_v59, %s4094_s11  ;;  %v5251_v59 = vld [vmem:[#allocation7 + $0x4c] ss:$12 sps:$4 sm:$0xff]  }
 0xfb9   :  { %2010 = vrot.lane.b32.xlu1 %v1772_v39, %s4094_s11 }
 0xfbc   :  { %2016 = vrot.lane.b32.xlu0 %v1775_v35, %s4094_s11  ;;  %v5794_v35 = vsub.f32 1.0, %v5791_v49 }
 0xfbd   :  { %2006 = vrot.lane.b32.xlu1 %v1770_v48, %s4094_s11 }
 0xfc0   :  { %2012 = vrot.lane.b32.xlu0 %v1773_v46, %s4094_s11 }
 0xfc1   :  { %2117 = vrot.lane.b32.xlu1 %v5154_v30, %s4092_s2 }
 0xfc4   :  { %2008 = vrot.lane.b32.xlu0 %v1771_v50, %s4094_s11 }
 0xfc5   :  { %2284 = vrot.lane.b32.xlu1 %v5253_v62, %s4093_s3 }
 0xfc8   :  { %2119 = vrot.lane.b32.xlu0 %v5151_v28, %s4092_s2 }
 0xfcc   :  { %2286 = vrot.lane.b32.xlu0 %v5251_v59, %s4093_s3 }
0x1029   :  { %v1904_v58 = vpop.xlane.xlu1 %1903 }
0x102a   :  { %v1906_v18 = vsub.f32 %v3695_v23, %v1904_v58 }
0x102b   :  { %v1901_v31 = vpop.xlane.xlu0 %1900 }
0x102c   :  { %v1909_v55 = vmul.f32 1.442695, %v1906_v18  ;;  %v1905_v63 = vsub.f32 %v1890_v26, %v1901_v31 }
0x102d   :  { %v2019_v30 = vpop.permute.xlu1 %2018 }
0x102e   :  { %v1907_v10 = vmul.f32 1.442695, %v1905_v63  ;;  %3942 = vpow2.f32 %v1909_v55 }
0x102f   :  { %v2021_v29 = vpop.permute.xlu0 %2020 }
0x1030   :  { %3944 = vpow2.f32 %v1907_v10  ;;  %3715 = vmatprep.subr.mxu0 %v2021_v29 }
0x1031   :  { %v2015_v28 = vpop.permute.xlu1 %2014 }
0x1033   :  { %v2017_v13 = vpop.permute.xlu0 %2016 }
0x1035   :  { %v2011_v26 = vpop.permute.xlu1 %2010 }
0x1037   :  { %v2013_v23 = vpop.permute.xlu0 %2012 }
0x1039   :  { %v2007_v2 = vpop.permute.xlu1 %2006 }
0x103b   :  { %v3943_v14 = vpop.eup %3942  ;;  %v2009_v3 = vpop.permute.xlu0 %2008 }
0x103c   :  { %v1912_v19 = vmul.f32 %v3943_v14, %v5791_v49 }
0x103d   :  { %v3945_v6 = vpop.eup %3944  ;;  %v2118_v31 = vpop.permute.xlu1 %2117 }
0x103e   :  { %v1911_v33 = vmul.f32 %v3945_v6, %v5790_v47  ;;  %v5801_v6 = vld [vmem:[#allocation31_spill] sm:$0xff] }
0x103f   :  { %v2120_v39 = vpop.permute.xlu0 %2119 }
0x1040   :  { %3712 = vmatprep.mubr.msk.f32.mxu0 %vm5792_vm6, %v1911_v33  ;;  %3735 = vmatpush3.bf16.msra.mxu1 %v2120_v39  ;;  %vm5810_vm6 = vnez %v5717_v12 }
0x1041   :  { %3713 = vmatmul.mubr.msk.f32.vlgmr.msra.gmra.mxu0 %vm5793_vm11, %v1912_v19  ;;  %3736 = vmatprep.subr.bf16.mxu1 %v5678_v16  ;;  %v2285_v14 = vpop.permute.xlu1 %2284  ;;  %vm5811_vm11 = vnez %v5720_v11 }
0x1042   :  { %3716 = vmatpush3.msra.mxu0 %v2021_v29 }
0x1043   :  { %3717 = vmatprep.subr.mxu0 %v2019_v30  ;;  %v2287_v55 = vpop.permute.xlu0 %2286 }
0x1044   :  { %3718 = vmatpush3.msra.mxu0 %v2019_v30  ;;  %3737 = vmatpush3.bf16.msra.mxu1 %v2118_v31  ;;  %v5799_v30 = vld [vmem:[#allocation30_spill] sm:$0xff] }
0x1045   :  { %3719 = vmatprep.subr.mxu0 %v2017_v13  ;;  %3750 = vmatprep.subr.bf16.mxu1 %v2287_v55 }
0x1046   :  { %3720 = vmatpush3.msra.mxu0 %v2017_v13 }
0x1047   :  { %3721 = vmatprep.subr.mxu0 %v2015_v28 }
0x1048   :  { %3722 = vmatpush3.msra.mxu0 %v2015_v28 }
0x1049   :  { %3723 = vmatprep.subr.mxu0 %v2013_v23 }
0x104a   :  { %3724 = vmatpush3.msra.mxu0 %v2013_v23 }
0x104b   :  { %3725 = vmatprep.subr.mxu0 %v2011_v26 }
0x104c   :  { %3726 = vmatpush3.msra.mxu0 %v2011_v26 }
0x104d   :  { %3727 = vmatprep.subr.mxu0 %v2009_v3 }
0x104e   :  { %3728 = vmatpush3.msra.mxu0 %v2009_v3 }
0x104f   :  { %3729 = vmatprep.subr.mxu0 %v2007_v2 }
0x1050   :  { %3730 = vmatpush3.msra.mxu0 %v2007_v2 }
0x1051   :  { %3742 = vmatprep.subr.bf16.mxu0 %v5678_v16 }
0x1101   :  { %v3714_v52 = vpop.f32.mrf.mxu0 }
0x1102   :  { %v1991_v34 = vadd.f32 %v3714_v52, %v5794_v35 }
0x1103   :  { %v1985_v48 = vpop.f32.mrf.mxu0 }
0x1104   :  { %v1986_v46 = vadd.f32 %v1985_v48, %v5795_v41  ;;  %3946 = vrcp.f32 %v1991_v34 }
0x1106   :  { %3948 = vrcp.f32 %v1986_v46 }
0x1111   :  { %v3947_v27 = vpop.eup %3946 }
0x1112   :  { %v1997_v18 = vmul.f32 %v3947_v27, %v1912_v19 }
0x1113   :  { %v3949_v50 = vpop.eup %3948 }
0x1114   :  { %v1996_v58 = vmul.f32 %v3949_v50, %v1911_v33 }
0x1116   :  { %3731 = vmatprep.mubr.msk.f32.mxu0 %vm5796_vm12, %v1996_v58  ;;  %vm5812_vm12 = vnez %v5723_v24 }
0x1117   :  { %3732 = vmatmul.mubr.msk.f32.vlgmr.msra.gmra.mxu0 %vm5797_vm13, %v1997_v18  ;;  %vm5813_vm13 = vmmov %vm5755_vm1  ;;  %v3182_v18 = vld [vmem:[#allocation8 + $0x17] ss:$0 sm:$0xff] }
0x1118   :  { %3743 = vmatpush3.bf16.msra.mxu0 %v5251_v59  ;;  %3746 = vmatprep.mubr.msk.bf16.mxu0 %vm5741_vm0, %v5678_v16 }
0x1119   :  { %3744 = vmatprep.subr.bf16.mxu0 %v5678_v16 }
0x111c   :  { %3745 = vmatpush3.bf16.msra.mxu0 %v5253_v62 }
0x11d7   :  { %v3733_v63 = vpop.f32.mrf.mxu0 }
0x11d9   :  { %v2102_v10 = vpop.f32.mrf.mxu0 }
0x11da   :  { %v2111_v29 = vpack.c.bf16 %v3733_v63, %v2102_v10 }
0x11dc   :  { %3739 = vmatmul.mubr.msk.bf16.vlgmr.msra.gmra.mxu1 %vm5798_vm14, %v2111_v29  ;;  %vm5814_vm14 = vmmov %vm5755_vm1  ;;  %v3183_v29 = vld [vmem:[#allocation8 + $0x18] ss:$0 sm:$0xff] }
0x11dd   :  { %3751 = vmatpush3.bf16.msra.mxu1 %v2287_v55  ;;  %3754 = vmatprep.mubr.msk.bf16.mxu1 %vm5800_vm15, %v5799_v30  ;;  %vm5815_vm15 = vmmov %vm5755_vm1 }
0x11de   :  { %3752 = vmatprep.subr.bf16.mxu1 %v2285_v14 }
0x11e1   :  { %3753 = vmatpush3.bf16.msra.mxu1 %v2285_v14 }
0x11e2   :  { %3793 = vmatprep.subr.msk.mxu1 %vm4733_vm8, %v5687_v54 }
0x11e4   :  { %3755 = vmatmul.mubr.msk.bf16.vlgmr.msra.gmra.mxu1 %vm5755_vm1, %v5801_v6 }
0x11e5   :  { %3794 = vmatpush3.msk.msra.mxu1 %vm4733_vm8, %v5687_v54  ;;  %vm5802_vm8 = vnez %v5695_v37 }
0x11e6   :  { %3795 = vmatprep.subr.msk.mxu1 %vm4738_vm9, %v5687_v54 }
0x11e7   :  { %3796 = vmatpush3.msk.msra.mxu1 %vm4738_vm9, %v5687_v54  ;;  %vm5803_vm9 = vnez %v5697_v25 }
0x11e8   :  { %3797 = vmatprep.subr.msk.mxu1 %vm4750_vm4, %v5687_v54 }
0x11e9   :  { %3798 = vmatpush3.msk.msra.mxu1 %vm4750_vm4, %v5687_v54  ;;  %vm5804_vm4 = vnez %v5699_v45 }
0x11ea   :  { %3799 = vmatprep.subr.msk.mxu1 %vm4762_vm5, %v5687_v54 }
0x11eb   :  { %3800 = vmatpush3.msk.msra.mxu1 %vm4762_vm5, %v5687_v54  ;;  %vm5805_vm5 = vnez %v5702_v51 }
0x11ec   :  { %3801 = vmatprep.subr.msk.mxu1 %vm4773_vm7, %v5687_v54 }
0x11ed   :  { %3802 = vmatpush3.msk.msra.mxu1 %vm4773_vm7, %v5687_v54  ;;  %vm5806_vm7 = vnez %v5705_v32 }
0x11ee   :  { %3803 = vmatprep.subr.msk.mxu1 %vm5802_vm8, %v5687_v54 }
0x11ef   :  { %3804 = vmatpush3.msk.msra.mxu1 %vm5802_vm8, %v5687_v54  ;;  %vm5816_vm8 = vmmov %vm5755_vm1 }
0x11f0   :  { %3805 = vmatprep.subr.msk.mxu1 %vm5803_vm9, %v5687_v54 }
0x11f1   :  { %3806 = vmatpush3.msk.msra.mxu1 %vm5803_vm9, %v5687_v54  ;;  %vm5817_vm9 = vmmov %vm5755_vm1 }
0x11f2   :  { %3807 = vmatprep.subr.msk.mxu1 %vm5804_vm4, %v5687_v54 }
0x11f3   :  { %3808 = vmatpush3.msk.msra.mxu1 %vm5804_vm4, %v5687_v54  ;;  %vm5818_vm4 = vmmov %vm5755_vm1 }
0x11f4   :  { %3809 = vmatprep.subr.msk.mxu1 %vm5805_vm5, %v5687_v54 }
0x11f5   :  { %3810 = vmatpush3.msk.msra.mxu1 %vm5805_vm5, %v5687_v54  ;;  %vm5819_vm5 = vmmov %vm5755_vm1 }
0x11f6   :  { %3811 = vmatprep.subr.msk.mxu1 %vm5806_vm7, %v5687_v54 }
0x11f7   :  { %3812 = vmatpush3.msk.msra.mxu1 %vm5806_vm7, %v5687_v54  ;;  %vm5820_vm7 = vmmov %vm5755_vm1 }
0x11f8   :  { %3813 = vmatprep.subr.msk.mxu1 %vm5807_vm10, %v5687_v54 }
0x11f9   :  { %3814 = vmatpush3.msk.msra.mxu1 %vm5807_vm10, %v5687_v54  ;;  %vm5821_vm10 = vmmov %vm5755_vm1 }
0x11fa   :  { %3815 = vmatprep.subr.msk.mxu1 %vm5808_vm2, %v5687_v54 }
0x11fb   :  { %3816 = vmatpush3.msk.msra.mxu1 %vm5808_vm2, %v5687_v54  ;;  %vm5822_vm2 = vmmov %vm5755_vm1 }
0x11fc   :  { %3817 = vmatprep.subr.msk.mxu1 %vm5809_vm3, %v5687_v54 }
0x11fd   :  { %3818 = vmatpush3.msk.msra.mxu1 %vm5809_vm3, %v5687_v54  ;;  %vm5823_vm3 = vmmov %vm5755_vm1 }
0x11fe   :  { %3819 = vmatprep.subr.msk.mxu1 %vm5810_vm6, %v5687_v54 }
0x11ff   :  { %3820 = vmatpush3.msk.msra.mxu1 %vm5810_vm6, %v5687_v54  ;;  %vm5824_vm6 = vmmov %vm5755_vm1 }
0x1200   :  { %3821 = vmatprep.subr.msk.mxu1 %vm5811_vm11, %v5687_v54 }
0x1201   :  { %3822 = vmatpush3.msk.msra.mxu1 %vm5811_vm11, %v5687_v54  ;;  %vm5825_vm11 = vmmov %vm5755_vm1 }
0x1202   :  { %3823 = vmatprep.subr.msk.mxu1 %vm5812_vm12, %v5687_v54 }
0x1203   :  { %3824 = vmatpush3.msk.msra.mxu1 %vm5812_vm12, %v5687_v54  ;;  %vm5826_vm12 = vmmov %vm5755_vm1 }
0x129c   :  { %v2160_v36 = vpop.f32.mrf.mxu1 }
0x129d   :  { %v2161_v1 = vadd.f32 %v3180_v44, %v2160_v36 }
0x129e   :  { %v3740_v15 = vpop.f32.mrf.mxu1 }
0x129f   :  { %v2167_v57 = vadd.f32 %v2161_v1, %v5158_v38 }
0x12a0   :  { %v2163_v37 = vpop.f32.mrf.mxu1 }
0x12a1   :  { %v2164_v25 = vadd.f32 %v3180_v44, %v2163_v37  ;;  %v2171_v45 = vsel %vm5813_vm13, %v2167_v57, 0.0  ;;  %v2179_v51 = vmul.f32 %v2167_v57, %v2167_v57  ;;  %vm5827_vm13 = vmmov %vm5755_vm1 }
0x12a2   :  { %2172 = vadd.xlane.f32.xlu0 %v2171_v45  ;;  %v3741_v32 = vpop.f32.mrf.mxu1  ;;  %v5840_v45 = vld [vmem:[#allocation33_spill] sm:$0xff] }
0x12a3   :  { %v2168_v4 = vadd.f32 %v2164_v25, %v5160_v5  ;;  %v2181_v54 = vsel %vm5814_vm14, %v2179_v51, 0.0  ;;  %vm5828_vm14 = vmmov %vm5755_vm1  ;;  %v5837_v25 = vld [vmem:[#allocation32_spill] sm:$0xff]  ;;  %v5845_v51 = vld [vmem:[#allocation34_spill] sm:$0xff] }
0x12a4   :  { %v3756_v7 = vpop.f32.mrf.mxu1 }
0x12a5   :  { %v5375_v12 = vadd.f32 %v3756_v7, %v3188_v8  ;;  %v2174_v11 = vsel %vm5815_vm15, %v2168_v4, 0.0  ;;  %v2180_v24 = vmul.f32 %v2168_v4, %v2168_v4  ;;  %vm5829_vm15 = vmmov %vm5755_vm1 }
0x12a6   :  { %2182 = vadd.xlane.f32.xlu0 %v2181_v54  ;;  %2175 = vadd.xlane.f32.xlu1 %v2174_v11  ;;  %v2324_v38 = vpop.f32.mrf.mxu1 }
0x12a7   :  { %v5379_v47 = vadd.f32 %v3188_v8, %v2324_v38  ;;  %v2184_v33 = vsel %vm5755_vm1, %v2180_v24, 0.0  ;;  %v2353_v1 = vmul.f32 %v5375_v12, %v4568_v42 }
0x12a8   :  { %v3757_v49 = vpop.f32.mrf.mxu1 }
0x12a9   :  { %v5382_v19 = vadd.f32 %v3757_v49, %v3188_v8  ;;  %v2351_v37 = vmul.f32 %v5379_v47, %v4599_v20 }
0x12aa   :  { %2185 = vadd.xlane.f32.xlu0 %v2184_v33  ;;  %v2327_v44 = vpop.f32.mrf.mxu1 }
0x12ab   :  { %v2354_v5 = vmul.f32 %v5382_v19, %v4548_v43  ;;  %v5395_v15 = vadd.f32 %v3188_v8, %v2327_v44  ;;  %v2350_v42 = vmul.f32 %v5382_v19, %v4611_v60  ;;  %v2347_v60 = vmul.f32 %v5379_v47, %v4641_v56  ;;  %v5847_v8 = vld [vmem:[#allocation35_spill] sm:$0xff]  ;;  %v5865_v44 = vld [vmem:[#allocation50_spill] sm:$0xff] }
0x12ad   :  { %3758 = vmatprep.subr.msk.mxu0 %vm5816_vm8, %v2354_v5  ;;  %v2348_v20 = vmul.f32 %v5395_v15, %v4632_v53  ;;  %vm5830_vm8 = vmmov %vm5755_vm1  ;;  %v2345_v53 = vmul.f32 %v5375_v12, %v4659_v9  ;;  %v2344_v56 = vmul.f32 %v5395_v15, %v4668_v0  ;;  %v2342_v9 = vmul.f32 %v5382_v19, %v5840_v45  ;;  %v5868_v45 = vld [vmem:[#allocation43_spill] sm:$0xff] }
0x12ae   :  { %v2341_v0 = vmul.f32 %v5375_v12, %v4695_v17  ;;  %v2340_v32 = vmul.f32 %v5395_v15, %v5845_v51  ;;  %v3184_v17 = vld [vmem:[#allocation8 + $0x12] ss:$0 sm:$0xff] }
0x132b   :  { %v2173_v13 = vpop.xlane.xlu0 %2172 }
0x132c   :  { %v2177_v28 = vmul.f32 0.03125, %v2173_v13  ;;  %v2370_v13 = vmul.f32 %v5382_v19, %v4965_v61  ;;  %v5857_v61 = vld [vmem:[#allocation39_spill] sm:$0xff] }
0x132e   :  { %v2189_v3 = vmul.f32 %v2177_v28, %v2177_v28  ;;  %v2193_v50 = vsub.f32 %v2167_v57, %v2177_v28  ;;  %v2352_v57 = vmul.f32 %v5395_v15, %v4586_v22  ;;  %v2349_v22 = vmul.f32 %v5375_v12, %v4623_v21  ;;  %v5853_v28 = vld [vmem:[#allocation36_spill] sm:$0xff] }
0x132f   :  { %v2183_v23 = vpop.xlane.xlu0 %2182  ;;  %v2176_v26 = vpop.xlane.xlu1 %2175  ;;  %v2346_v21 = vmul.f32 %v5382_v19, %v4650_v40  ;;  %v2343_v40 = vmul.f32 %v5379_v47, %v5837_v25 }
0x1330   :  { %v2187_v2 = vmul.f32 0.03125, %v2183_v23  ;;  %v2178_v39 = vmul.f32 0.03125, %v2176_v26  ;;  %v2369_v23 = vmul.f32 %v5375_v12, %v5853_v28  ;;  %v5854_v26 = vld [vmem:[#allocation38_spill] sm:$0xff] }
0x1332   :  { %v2191_v52 = vsub.f32 %v2187_v2, %v2189_v3  ;;  %v2190_v48 = vmul.f32 %v2178_v39, %v2178_v39  ;;  %v2194_v31 = vsub.f32 %v2168_v4, %v2178_v39  ;;  %v2339_v4 = vmul.f32 %v5379_v47, %v5847_v8  ;;  %v5855_v2 = vld [vmem:[#allocation37_spill] sm:$0xff] }
0x1333   :  { %v2186_v35 = vpop.xlane.xlu0 %2185  ;;  %v2368_v3 = vmul.f32 %v5395_v15, %v5854_v26  ;;  %v2366_v39 = vmul.f32 %v5382_v19, %v5855_v2  ;;  %v5871_v26 = vsub.f32 1.0, %v5868_v45 }
0x1334   :  { %v2195_v34 = vadd.f32 1e-05, %v2191_v52  ;;  %v2188_v41 = vmul.f32 0.03125, %v2186_v35  ;;  %v5856_v52 = vld [vmem:[#allocation40_spill] sm:$0xff] }
0x1335   :  { %v2367_v35 = vmul.f32 %v5379_v47, %v5856_v52 }
0x1336   :  { %3950 = vrsqrt.f32 %v2195_v34  ;;  %v2192_v46 = vsub.f32 %v2188_v41, %v2190_v48  ;;  %v2364_v34 = vmul.f32 %v5395_v15, %v5857_v61  ;;  %v5858_v48 = vld [vmem:[#allocation42_spill] sm:$0xff] }
0x1337   :  { %v2365_v41 = vmul.f32 %v5375_v12, %v5858_v48 }
0x1338   :  { %v2196_v27 = vadd.f32 1e-05, %v2192_v46  ;;  %v5859_v46 = vld [vmem:[#allocation41_spill] sm:$0xff] }
0x133a   :  { %3952 = vrsqrt.f32 %v2196_v27  ;;  %v2362_v27 = vmul.f32 %v5382_v19, %v5859_v46  ;;  %v3225_v46 = vld [vmem:[#allocation8 + $0x14] ss:$0 sm:$0xff] }
0x1343   :  { %v3951_v43 = vpop.eup %3950 }
0x1344   :  { %v2199_v58 = vmul.f32 %v3951_v43, %v2193_v50  ;;  %v5860_v50 = vld [vmem:[#allocation46_spill] sm:$0xff] }
0x1345   :  { %v2363_v43 = vmul.f32 %v5379_v47, %v5860_v50 }
0x1346   :  { %v2205_v10 = vmul.f32 %v3182_v18, %v2199_v58  ;;  %v5861_v58 = vld [vmem:[#allocation45_spill] sm:$0xff] }
0x1347   :  { %v3953_v55 = vpop.eup %3952 }
0x1348   :  { %v2200_v63 = vmul.f32 %v3953_v55, %v2194_v31  ;;  %v5387_v30 = vadd.f32 %v3183_v29, %v2205_v10  ;;  %v5862_v31 = vld [vmem:[#allocation48_spill] sm:$0xff] }
0x1349   :  { %v2361_v55 = vmul.f32 %v5375_v12, %v5862_v31 }
0x134a   :  { %v2206_v14 = vmul.f32 %v3182_v18, %v2200_v63  ;;  %v2360_v18 = vmul.f32 %v5395_v15, %v5861_v58  ;;  %v5863_v63 = vld [vmem:[#allocation47_spill] sm:$0xff] }
0x134b   :  { %v2358_v10 = vmul.f32 %v5382_v19, %v5863_v63 }
0x134c   :  { %v5389_v6 = vadd.f32 %v3183_v29, %v2206_v14  ;;  %v5864_v29 = vld [vmem:[#allocation49_spill] sm:$0xff] }
0x134d   :  { %v2359_v14 = vmul.f32 %v5379_v47, %v5864_v29 }
0x134e   :  { %v2217_v36 = vpack.c.bf16 %v5389_v6, %v5387_v30 }
0x1350   :  { %3747 = vmatmul.mubr.msk.bf16.vlgmr.msra.gmra.mxu0 %vm5817_vm9, %v2217_v36  ;;  %vm5831_vm9 = vmmov %vm5755_vm1  ;;  %v2356_v36 = vmul.f32 %v5395_v15, %v5865_v44 }
0x1351   :  { %3759 = vmatpush3.xpose.msk.msra.mxu0 %vm5818_vm4, %v2354_v5  ;;  %vm5832_vm4 = vmmov %vm5755_vm1 }
0x1352   :  { %3760 = vmatprep.subr.msk.mxu0 %vm5819_vm5, %v2353_v1  ;;  %vm5833_vm5 = vmmov %vm5755_vm1 }
0x1355   :  { %3761 = vmatpush3.xpose.msk.msra.mxu0 %vm5820_vm7, %v2353_v1  ;;  %vm5834_vm7 = vmmov %vm5755_vm1  ;;  %v5866_v1 = vld [vmem:[#allocation51_spill] sm:$0xff] }
0x1356   :  { %3762 = vmatprep.subr.msk.mxu0 %vm5821_vm10, %v2352_v57  ;;  %vm5835_vm10 = vmmov %vm5755_vm1 }
0x1359   :  { %3763 = vmatpush3.xpose.msk.msra.mxu0 %vm5822_vm2, %v2352_v57  ;;  %vm5836_vm2 = vmmov %vm5755_vm1  ;;  %v2357_v57 = vmul.f32 %v5375_v12, %v5866_v1 }
0x135a   :  { %3764 = vmatprep.subr.msk.mxu0 %vm5823_vm3, %v2351_v37  ;;  %vm5838_vm3 = vmmov %vm5755_vm1 }
0x135d   :  { %3765 = vmatpush3.xpose.msk.msra.mxu0 %vm5824_vm6, %v2351_v37  ;;  %vm5839_vm6 = vmmov %vm5755_vm1  ;;  %v5867_v37 = vld [vmem:[#allocation52_spill] sm:$0xff] }
0x135e   :  { %3766 = vmatprep.subr.msk.mxu0 %vm5825_vm11, %v2350_v42  ;;  %vm5841_vm11 = vmmov %vm5755_vm1  ;;  %v2355_v19 = vmul.f32 %v5379_v47, %v5867_v37 }
0x1361   :  { %3767 = vmatpush3.xpose.msk.msra.mxu0 %vm5826_vm12, %v2350_v42  ;;  %vm5842_vm12 = vmmov %vm5755_vm1 }
0x1362   :  { %3768 = vmatprep.subr.msk.mxu0 %vm5827_vm13, %v2349_v22  ;;  %vm5843_vm13 = vmmov %vm5755_vm1 }
0x1365   :  { %3769 = vmatpush3.xpose.msk.msra.mxu0 %vm5828_vm14, %v2349_v22  ;;  %vm5844_vm14 = vmmov %vm5755_vm1 }
0x1366   :  { %3770 = vmatprep.subr.msk.mxu0 %vm5829_vm15, %v2348_v20  ;;  %vm5846_vm15 = vmmov %vm5755_vm1 }
0x1369   :  { %3771 = vmatpush3.xpose.msk.msra.mxu0 %vm5755_vm1, %v2348_v20 }
0x136a   :  { %3772 = vmatprep.subr.msk.mxu0 %vm5830_vm8, %v2347_v60  ;;  %vm5848_vm8 = vmmov %vm5755_vm1 }
0x136d   :  { %3773 = vmatpush3.xpose.msk.msra.mxu0 %vm5831_vm9, %v2347_v60  ;;  %vm5849_vm9 = vmmov %vm5755_vm1 }
0x136e   :  { %3774 = vmatprep.subr.msk.mxu0 %vm5832_vm4, %v2346_v21  ;;  %vm5850_vm4 = vmmov %vm5755_vm1 }
0x1371   :  { %3775 = vmatpush3.xpose.msk.msra.mxu0 %vm5833_vm5, %v2346_v21  ;;  %vm5851_vm5 = vmmov %vm5755_vm1 }
0x1372   :  { %3776 = vmatprep.subr.msk.mxu0 %vm5834_vm7, %v2345_v53  ;;  %vm5852_vm7 = vmmov %vm5755_vm1 }
0x1375   :  { %3777 = vmatpush3.xpose.msk.msra.mxu0 %vm5835_vm10, %v2345_v53  ;;  %vm5872_vm10 = vmmov %vm5755_vm1 }
0x1376   :  { %3778 = vmatprep.subr.msk.mxu0 %vm5836_vm2, %v2344_v56  ;;  %vm5873_vm2 = vmmov %vm5755_vm1 }
0x1379   :  { %3779 = vmatpush3.xpose.msk.msra.mxu0 %vm5838_vm3, %v2344_v56  ;;  %vm5874_vm3 = vmmov %vm5755_vm1 }
0x137a   :  { %3780 = vmatprep.subr.msk.mxu0 %vm5839_vm6, %v2343_v40  ;;  %vm5875_vm6 = vmmov %vm5755_vm1 }
0x137d   :  { %3781 = vmatpush3.xpose.msk.msra.mxu0 %vm5841_vm11, %v2343_v40  ;;  %vm5877_vm11 = vcmask 523264  }
0x137e   :  { %3782 = vmatprep.subr.msk.mxu0 %vm5842_vm12, %v2342_v9 }
0x1381   :  { %3783 = vmatpush3.xpose.msk.msra.mxu0 %vm5843_vm13, %v2342_v9  ;;  %vm5879_vm13 = vmmov %vm5877_vm11 }
0x1382   :  { %3784 = vmatprep.subr.msk.mxu0 %vm5844_vm14, %v2341_v0  ;;  %vm5880_vm14 = vmmov %vm5877_vm11 }
0x1385   :  { %3785 = vmatpush3.xpose.msk.msra.mxu0 %vm5846_vm15, %v2341_v0  ;;  %v5869_v0 = vld [vmem:[#allocation44_spill] sm:$0xff] }
0x1386   :  { %3786 = vmatprep.subr.msk.mxu0 %vm5755_vm1, %v2340_v32 }
0x1389   :  { %3787 = vmatpush3.xpose.msk.msra.mxu0 %vm5848_vm8, %v2340_v32 }
0x138a   :  { %3788 = vmatprep.subr.msk.mxu0 %vm5849_vm9, %v2339_v4 }
0x138d   :  { %3789 = vmatpush3.xpose.msk.msra.mxu0 %vm5850_vm4, %v2339_v4 }
0x138e   :  { %3863 = vmatprep.subr.bf16.mxu0 %v5678_v16 }
0x1410   :  { %v2272_v7 = vpop.f32.mrf.mxu0 }
0x1411   :  { %v2273_v54 = vadd.f32 %v3184_v17, %v2272_v7 }
0x1412   :  { %v3748_v11 = vpop.f32.mrf.mxu0 }
0x1413   :  { %3790 = vmatprep.mubr.msk.f32.mxu0 %vm5851_vm5, %v2273_v54 }
0x1414   :  { %v2275_v24 = vpop.f32.mrf.mxu0 }
0x1415   :  { %v2276_v38 = vadd.f32 %v3184_v17, %v2275_v24 }
0x1416   :  { %v3749_v33 = vpop.f32.mrf.mxu0 }
0x1417   :  { %3791 = vmatmul.mubr.msk.f32.vlgmr.msra.gmra.mxu0 %vm5852_vm7, %v2276_v38 }
0x1418   :  { %3867 = vmatprep.mubr.msk.bf16.mxu0 %vm5741_vm0, %v5678_v16 }
0x14d7   :  { %v3792_v49 = vpop.f32.mrf.mxu0 }
0x14d8   :  { %2502 = vmax.xlane.f32.xlu0 %v3792_v49 }
0x14d9   :  { %v2491_v5 = vpop.f32.mrf.mxu0 }
0x14da   :  { %2500 = vmax.xlane.f32.xlu1 %v2491_v5 }
0x14eb   :  { %2637 = vrot.lane.b32.xlu1 %v2370_v13, %s4093_s3  ;;  %v5870_v13 = vsub.f32 1.0, %v5869_v0 }
0x14ee   :  { %2635 = vrot.lane.b32.xlu0 %v2369_v23, %s4093_s3 }
0x14ef   :  { %2633 = vrot.lane.b32.xlu1 %v2368_v3, %s4093_s3 }
0x14f2   :  { %2629 = vrot.lane.b32.xlu0 %v2366_v39, %s4093_s3 }
0x14f3   :  { %2631 = vrot.lane.b32.xlu1 %v2367_v35, %s4093_s3 }
0x14f6   :  { %2625 = vrot.lane.b32.xlu0 %v2364_v34, %s4093_s3 }
0x14f7   :  { %2627 = vrot.lane.b32.xlu1 %v2365_v41, %s4093_s3 }
0x14fa   :  { %2621 = vrot.lane.b32.xlu0 %v2362_v27, %s4093_s3 }
0x14fb   :  { %2623 = vrot.lane.b32.xlu1 %v2363_v43, %s4093_s3 }
0x14fe   :  { %2617 = vrot.lane.b32.xlu0 %v2360_v18, %s4093_s3 }
0x14ff   :  { %2619 = vrot.lane.b32.xlu1 %v2361_v55, %s4093_s3 }
0x1502   :  { %2613 = vrot.lane.b32.xlu0 %v2358_v10, %s4093_s3 }
0x1503   :  { %2615 = vrot.lane.b32.xlu1 %v2359_v14, %s4093_s3 }
0x1506   :  { %2609 = vrot.lane.b32.xlu0 %v2356_v36, %s4093_s3 }
0x1507   :  { %2611 = vrot.lane.b32.xlu1 %v2357_v57, %s4093_s3  ;;  %v3913_v57 = vld [vmem:[#allocation7 + $0x38] ss:$12 sps:$4 sm:$0xff]  }
0x150a   :  { %2738 = vrot.lane.b32.xlu0 %v5251_v59, %s4092_s2 }
0x150b   :  { %2607 = vrot.lane.b32.xlu1 %v2355_v19, %s4093_s3 }
0x150f   :  { %2736 = vrot.lane.b32.xlu1 %v5253_v62, %s4092_s2 }
0x1561   :  { %v2503_v42 = vpop.xlane.xlu0 %2502 }
0x1562   :  { %v2505_v15 = vsub.f32 %v3792_v49, %v2503_v42 }
0x1563   :  { %v2501_v22 = vpop.xlane.xlu1 %2500 }
0x1564   :  { %v2508_v20 = vmul.f32 1.442695, %v2505_v15  ;;  %v2504_v12 = vsub.f32 %v2491_v5, %v2501_v22 }
0x1565   :  { %v2636_v47 = vpop.permute.xlu0 %2635 }
0x1566   :  { %v2506_v60 = vmul.f32 1.442695, %v2504_v12  ;;  %3954 = vpow2.f32 %v2508_v20 }
0x1567   :  { %v2638_v21 = vpop.permute.xlu1 %2637 }
0x1568   :  { %3956 = vpow2.f32 %v2506_v60  ;;  %3828 = vmatprep.subr.mxu1 %v2638_v21 }
0x1569   :  { %v2630_v40 = vpop.permute.xlu0 %2629 }
0x156b   :  { %v2634_v53 = vpop.permute.xlu1 %2633 }
0x156d   :  { %v2626_v32 = vpop.permute.xlu0 %2625 }
0x156f   :  { %v2632_v56 = vpop.permute.xlu1 %2631 }
0x1571   :  { %v2622_v4 = vpop.permute.xlu0 %2621 }
0x1573   :  { %v3955_v25 = vpop.eup %3954  ;;  %v2628_v51 = vpop.permute.xlu1 %2627 }
0x1574   :  { %v2511_v62 = vmul.f32 %v3955_v25, %v5869_v0 }
0x1575   :  { %v3957_v59 = vpop.eup %3956  ;;  %v2618_v7 = vpop.permute.xlu0 %2617 }
0x1576   :  { %v2510_v9 = vmul.f32 %v3957_v59, %v5868_v45 }
0x1577   :  { %v2624_v8 = vpop.permute.xlu1 %2623 }
0x1578   :  { %3825 = vmatprep.mubr.f32.mxu1 %v2510_v9 }
0x1579   :  { %3826 = vmatmul.mubr.f32.vlgmr.msra.gmra.mxu1 %v2511_v62  ;;  %v2614_v11 = vpop.permute.xlu0 %2613 }
0x157a   :  { %3829 = vmatpush3.msra.mxu1 %v2638_v21 }
0x157b   :  { %3830 = vmatprep.subr.mxu1 %v2636_v47  ;;  %v2620_v17 = vpop.permute.xlu1 %2619 }
0x157c   :  { %3831 = vmatpush3.msra.mxu1 %v2636_v47 }
0x157d   :  { %3832 = vmatprep.subr.mxu1 %v2634_v53  ;;  %v2610_v38 = vpop.permute.xlu0 %2609 }
0x157e   :  { %3833 = vmatpush3.msra.mxu1 %v2634_v53 }
0x157f   :  { %3834 = vmatprep.subr.mxu1 %v2632_v56  ;;  %v2616_v54 = vpop.permute.xlu1 %2615 }
0x1580   :  { %3835 = vmatpush3.msra.mxu1 %v2632_v56 }
0x1581   :  { %3836 = vmatprep.subr.mxu1 %v2630_v40  ;;  %v2739_v49 = vpop.permute.xlu0 %2738 }
0x1582   :  { %3837 = vmatpush3.msra.mxu1 %v2630_v40  ;;  %3864 = vmatpush3.bf16.msra.mxu0 %v2739_v49 }
0x1583   :  { %3838 = vmatprep.subr.mxu1 %v2628_v51  ;;  %v2612_v24 = vpop.permute.xlu1 %2611  ;;  %3865 = vmatprep.subr.bf16.mxu0 %v5678_v16 }
0x1584   :  { %3839 = vmatpush3.msra.mxu1 %v2628_v51 }
0x1585   :  { %3840 = vmatprep.subr.mxu1 %v2626_v32 }
0x1586   :  { %3841 = vmatpush3.msra.mxu1 %v2626_v32 }
0x1587   :  { %3842 = vmatprep.subr.mxu1 %v2624_v8  ;;  %v2608_v33 = vpop.permute.xlu1 %2607 }
0x1588   :  { %3843 = vmatpush3.msra.mxu1 %v2624_v8 }
0x1589   :  { %3844 = vmatprep.subr.mxu1 %v2622_v4 }
0x158a   :  { %3845 = vmatpush3.msra.mxu1 %v2622_v4 }
0x158b   :  { %3846 = vmatprep.subr.mxu1 %v2620_v17  ;;  %v2737_v61 = vpop.permute.xlu1 %2736 }
0x158c   :  { %3847 = vmatpush3.msra.mxu1 %v2620_v17  ;;  %3866 = vmatpush3.bf16.msra.mxu0 %v2737_v61  ;;  %v3228_v17 = vld [vmem:[#allocation8 + $0x1a] ss:$0 sm:$0xff] }
0x158d   :  { %3848 = vmatprep.subr.mxu1 %v2618_v7  ;;  %3879 = vmatprep.subr.bf16.mxu0 %v5678_v16 }
0x158e   :  { %3849 = vmatpush3.msra.mxu1 %v2618_v7 }
0x158f   :  { %3850 = vmatprep.subr.mxu1 %v2616_v54 }
0x1590   :  { %3851 = vmatpush3.msra.mxu1 %v2616_v54 }
0x1591   :  { %3852 = vmatprep.subr.mxu1 %v2614_v11 }
0x1592   :  { %3853 = vmatpush3.msra.mxu1 %v2614_v11 }
0x1593   :  { %3854 = vmatprep.subr.mxu1 %v2612_v24 }
0x1594   :  { %3855 = vmatpush3.msra.mxu1 %v2612_v24 }
0x1595   :  { %3856 = vmatprep.subr.mxu1 %v2610_v38 }
0x1596   :  { %3857 = vmatpush3.msra.mxu1 %v2610_v38 }
0x1597   :  { %3858 = vmatprep.subr.mxu1 %v2608_v33 }
0x1598   :  { %3859 = vmatpush3.msra.mxu1 %v2608_v33 }
0x1599   :  { %3871 = vmatprep.subr.bf16.mxu1 %v5678_v16 }
0x1639   :  { %v3827_v5 = vpop.f32.mrf.mxu1 }
0x163a   :  { %v2584_v28 = vadd.f32 %v3827_v5, %v5870_v13 }
0x163b   :  { %v2578_v23 = vpop.f32.mrf.mxu1 }
0x163c   :  { %v2579_v3 = vadd.f32 %v2578_v23, %v5871_v26  ;;  %3958 = vrcp.f32 %v2584_v28 }
0x163e   :  { %3960 = vrcp.f32 %v2579_v3 }
0x1649   :  { %v3959_v2 = vpop.eup %3958 }
0x164a   :  { %v2590_v35 = vmul.f32 %v3959_v2, %v2511_v62  ;;  %v3227_v62 = vld [vmem:[#allocation8 + $0x19] ss:$0 sm:$0xff] }
0x164b   :  { %v3961_v39 = vpop.eup %3960 }
0x164c   :  { %v2589_v52 = vmul.f32 %v3961_v39, %v2510_v9 }
0x164e   :  { %3860 = vmatprep.mubr.f32.mxu1 %v2589_v52  ;;  %v3233_v52 = vld [vmem:[#allocation8 + $0x16] ss:$0 sm:$0xff] }
0x164f   :  { %3861 = vmatmul.mubr.f32.vlgmr.msra.gmra.mxu1 %v2590_v35 }
0x1650   :  { %3875 = vmatprep.mubr.msk.bf16.mxu1 %vm5741_vm0, %v5678_v16 }
0x170f   :  { %v3862_v34 = vpop.f32.mrf.mxu1 }
0x1711   :  { %v2721_v48 = vpop.f32.mrf.mxu1 }
0x1712   :  { %v2730_v41 = vpack.c.bf16 %v3862_v34, %v2721_v48 }
0x1714   :  { %3868 = vmatmul.mubr.msk.bf16.vlgmr.msra.gmra.mxu0 %vm5872_vm10, %v2730_v41 }
0x1715   :  { %3883 = vmatprep.mubr.msk.bf16.mxu0 %vm5741_vm0, %v5678_v16  ;;  %vm5876_vm0 = vmmov %vm5755_vm1 }
0x1716   :  { %vm5878_vm12 = vmmov %vm5876_vm0 }
0x1717   :  { %vm5881_vm15 = vmmov %vm5876_vm0 }
0x1718   :  { %vm5882_vm1 = vmmov %vm5876_vm0 }
0x1719   :  { %vm5883_vm8 = vmmov %vm5876_vm0 }
0x171a   :  { %vm5884_vm9 = vmmov %vm5876_vm0 }
0x171b   :  { %vm5885_vm4 = vmmov %vm5876_vm0 }
0x171c   :  { %vm5886_vm5 = vmmov %vm5876_vm0 }
0x171d   :  { %vm5887_vm7 = vmmov %vm5876_vm0 }
0x171e   :  { %vm5888_vm10 = vmmov %vm5876_vm0 }
0x17d4   :  { %v2779_v27 = vpop.f32.mrf.mxu0 }
0x17d5   :  { %v2780_v50 = vadd.f32 %v3225_v46, %v2779_v27 }
0x17d6   :  { %v3869_v43 = vpop.f32.mrf.mxu0 }
0x17d7   :  { %v2786_v58 = vadd.f32 %v2780_v50, %v5387_v30  ;;  %v3912_v30 = vld [vmem:[#allocation7 + $0x50] ss:$12 sps:$4 sm:$0xff]  }
0x17d8   :  { %v2782_v18 = vpop.f32.mrf.mxu0  ;;  %3872 = vmatpush3.bf16.msra.mxu1 %v3912_v30 }
0x17d9   :  { %v2783_v31 = vadd.f32 %v3225_v46, %v2782_v18  ;;  %v2790_v55 = vsel %vm5873_vm2, %v2786_v58, 0.0  ;;  %v2798_v63 = vmul.f32 %v2786_v58, %v2786_v58  ;;  %3873 = vmatprep.subr.bf16.mxu1 %v5678_v16  ;;  %vm5889_vm2 = vmmov %vm5876_vm0 }
0x17da   :  { %2791 = vadd.xlane.f32.xlu0 %v2790_v55  ;;  %v3870_v10 = vpop.f32.mrf.mxu0 }
0x17db   :  { %v2787_v29 = vadd.f32 %v2783_v31, %v5389_v6  ;;  %v2800_v14 = vsel %vm5874_vm3, %v2798_v63, 0.0  ;;  %vm5890_vm3 = vmmov %vm5876_vm0 }
0x17dc   :  { %3874 = vmatpush3.bf16.msra.mxu1 %v3913_v57 }
0x17dd   :  { %v2793_v44 = vsel %vm5875_vm6, %v2787_v29, 0.0  ;;  %v2799_v36 = vmul.f32 %v2787_v29, %v2787_v29 }
0x17de   :  { %2801 = vadd.xlane.f32.xlu0 %v2800_v14  ;;  %2794 = vadd.xlane.f32.xlu1 %v2793_v44 }
0x17df   :  { %v2803_v1 = vsel %vm5876_vm0, %v2799_v36, 0.0 }
0x17e2   :  { %2804 = vadd.xlane.f32.xlu0 %v2803_v1 }
0x17ef   :  { %2908 = vrot.lane.b32.xlu1 %v3912_v30, %s4094_s11 }
0x17f8   :  { %2906 = vrot.lane.b32.xlu0 %v3913_v57, %s4094_s11 }
0x1863   :  { %v2792_v6 = vpop.xlane.xlu0 %2791 }
0x1864   :  { %v2796_v37 = vmul.f32 0.03125, %v2792_v6 }
0x1866   :  { %v2808_v15 = vmul.f32 %v2796_v37, %v2796_v37  ;;  %v2812_v45 = vsub.f32 %v2786_v58, %v2796_v37 }
0x1867   :  { %v2802_v19 = vpop.xlane.xlu0 %2801  ;;  %v2795_v42 = vpop.xlane.xlu1 %2794 }
0x1868   :  { %v2806_v22 = vmul.f32 0.03125, %v2802_v19  ;;  %v2797_v20 = vmul.f32 0.03125, %v2795_v42 }
0x186a   :  { %v2810_v12 = vsub.f32 %v2806_v22, %v2808_v15  ;;  %v2809_v53 = vmul.f32 %v2797_v20, %v2797_v20  ;;  %v2813_v51 = vsub.f32 %v2787_v29, %v2797_v20 }
0x186b   :  { %v2805_v60 = vpop.xlane.xlu0 %2804  ;;  %v2909_v59 = vpop.permute.xlu1 %2908 }
0x186c   :  { %v2814_v21 = vadd.f32 1e-05, %v2810_v12  ;;  %v2807_v47 = vmul.f32 0.03125, %v2805_v60  ;;  %v2917_v40 = vsel %vm5877_vm11, %v2909_v59, 0  ;;  %v3235_v60 = vld [vmem:[#allocation8 + $0x1b] ss:$0 sm:$0xff] }
0x186d   :  { %3880 = vmatpush3.bf16.xpose.msra.mxu0 %v2917_v40 }
0x186e   :  { %3962 = vrsqrt.f32 %v2814_v21  ;;  %v2811_v56 = vsub.f32 %v2807_v47, %v2809_v53  ;;  %3881 = vmatprep.subr.bf16.mxu0 %v5678_v16  ;;  %v3229_v16 = vld [vmem:[#allocation8 + $0x15] ss:$0 sm:$0xff]  ;;  %v3236_v53 = vld [vmem:[#allocation8 + $0x1c] ss:$0 sm:$0xff] }
0x186f   :  { %v2907_v38 = vpop.permute.xlu0 %2906 }
0x1870   :  { %v2815_v25 = vadd.f32 1e-05, %v2811_v56  ;;  %v2914_v33 = vsel %vm5879_vm13, %v2907_v38, 0 }
0x1872   :  { %3964 = vrsqrt.f32 %v2815_v25 }
0x1875   :  { %3882 = vmatpush3.bf16.xpose.msra.mxu0 %v2914_v33 }
0x187b   :  { %v3963_v9 = vpop.eup %3962 }
0x187c   :  { %v2818_v0 = vmul.f32 %v3963_v9, %v2812_v45 }
0x187e   :  { %v2824_v4 = vmul.f32 %v3227_v62, %v2818_v0 }
0x187f   :  { %v3965_v32 = vpop.eup %3964 }
0x1880   :  { %v2819_v8 = vmul.f32 %v3965_v32, %v2813_v51  ;;  %v2830_v54 = vadd.f32 %v3228_v17, %v2824_v4 }
0x1882   :  { %v2825_v7 = vmul.f32 %v3227_v62, %v2819_v8 }
0x1884   :  { %v2831_v11 = vadd.f32 %v3228_v17, %v2825_v7 }
0x1886   :  { %v2836_v24 = vpack.c.bf16 %v2831_v11, %v2830_v54 }
0x1888   :  { %3876 = vmatmul.mubr.msk.bf16.vlgmr.msra.gmra.mxu1 %vm5878_vm12, %v2836_v24 }
0x1948   :  { %v2891_v49 = vpop.f32.mrf.mxu1 }
0x1949   :  { %v2892_v13 = vadd.f32 %v3229_v16, %v2891_v49 }
0x194a   :  { %v3877_v5 = vpop.f32.mrf.mxu1 }
0x194b   :  { %v2898_v3 = vmax.f32 %v2892_v13, 0.0 }
0x194c   :  { %v2894_v28 = vpop.f32.mrf.mxu1 }
0x194d   :  { %v2895_v23 = vadd.f32 %v3229_v16, %v2894_v28 }
0x194e   :  { %v3878_v26 = vpop.f32.mrf.mxu1 }
0x194f   :  { %v2899_v2 = vmax.f32 %v2895_v23, 0.0 }
0x1951   :  { %v2900_v39 = vpack.c.bf16 %v2899_v2, %v2898_v3 }
0x1953   :  { %3884 = vmatmul.mubr.msk.bf16.vlgmr.msra.gmra.mxu0 %vm5880_vm14, %v2900_v39  ;;  %v3237_v39 = vld [vmem:[#allocation8 + $0xd] ss:$0 sm:$0xff] }
0x1a13   :  { %v2953_v35 = vpop.f32.mrf.mxu0 }
0x1a14   :  { %v2954_v61 = vadd.f32 %v3233_v52, %v2953_v35  ;;  %v3238_v35 = vld [vmem:[#allocation8 + $0xe] ss:$0 sm:$0xff] }
0x1a15   :  { %v3885_v34 = vpop.f32.mrf.mxu0 }
0x1a16   :  { %v2960_v48 = vadd.f32 %v2954_v61, %v2830_v54 }
0x1a17   :  { %v2956_v41 = vpop.f32.mrf.mxu0 }
0x1a18   :  { %v2957_v46 = vadd.f32 %v3233_v52, %v2956_v41  ;;  %v2964_v27 = vsel %vm5881_vm15, %v2960_v48, 0.0  ;;  %v2972_v50 = vmul.f32 %v2960_v48, %v2960_v48 }
0x1a19   :  { %2965 = vadd.xlane.f32.xlu1 %v2964_v27  ;;  %v3886_v43 = vpop.f32.mrf.mxu0 }
0x1a1a   :  { %v2961_v58 = vadd.f32 %v2957_v46, %v2831_v11  ;;  %v2974_v18 = vsel %vm5882_vm1, %v2972_v50, 0.0 }
0x1a1c   :  { %v2967_v31 = vsel %vm5883_vm8, %v2961_v58, 0.0  ;;  %v2973_v55 = vmul.f32 %v2961_v58, %v2961_v58 }
0x1a1d   :  { %2975 = vadd.xlane.f32.xlu1 %v2974_v18  ;;  %2968 = vadd.xlane.f32.xlu0 %v2967_v31 }
0x1a1e   :  { %v2977_v63 = vsel %vm5884_vm9, %v2973_v55, 0.0 }
0x1a21   :  { %2978 = vadd.xlane.f32.xlu0 %v2977_v63 }
0x1aa2   :  { %v2966_v10 = vpop.xlane.xlu1 %2965 }
0x1aa3   :  { %v2970_v29 = vmul.f32 0.03125, %v2966_v10 }
0x1aa5   :  { %v2982_v36 = vmul.f32 %v2970_v29, %v2970_v29  ;;  %v2986_v20 = vsub.f32 %v2960_v48, %v2970_v29 }
0x1aa6   :  { %v2976_v14 = vpop.xlane.xlu1 %2975  ;;  %v2969_v44 = vpop.xlane.xlu0 %2968 }
0x1aa7   :  { %v2980_v1 = vmul.f32 0.03125, %v2976_v14  ;;  %v2971_v30 = vmul.f32 0.03125, %v2969_v44 }
0x1aa9   :  { %v2984_v57 = vsub.f32 %v2980_v1, %v2982_v36  ;;  %v2983_v19 = vmul.f32 %v2971_v30, %v2971_v30  ;;  %v2987_v47 = vsub.f32 %v2961_v58, %v2971_v30 }
0x1aaa   :  { %v2979_v6 = vpop.xlane.xlu0 %2978 }
0x1aab   :  { %v2988_v37 = vadd.f32 1e-05, %v2984_v57  ;;  %v2981_v42 = vmul.f32 0.03125, %v2979_v6 }
0x1aad   :  { %3966 = vrsqrt.f32 %v2988_v37  ;;  %v2985_v15 = vsub.f32 %v2981_v42, %v2983_v19 }
0x1aaf   :  { %v2989_v22 = vadd.f32 1e-05, %v2985_v15 }
0x1ab1   :  { %3968 = vrsqrt.f32 %v2989_v22 }
0x1aba   :  { %v3967_v12 = vpop.eup %3966 }
0x1abb   :  { %v2992_v21 = vmul.f32 %v3967_v12, %v2986_v20 }
0x1abd   :  { %v2998_v56 = vmul.f32 %v3235_v60, %v2992_v21 }
0x1abe   :  { %v3969_v25 = vpop.eup %3968 }
0x1abf   :  { %v3004_v59 = vadd.f32 %v3236_v53, %v2998_v56  ;;  %v2993_v40 = vmul.f32 %v3969_v25, %v2987_v47 }
0x1ac1   :  { %v3008_v45 = vsel %vm5885_vm4, %v3004_v59, 0.0  ;;  %v3016_v9 = vmul.f32 %v3004_v59, %v3004_v59  ;;  %v2999_v0 = vmul.f32 %v3235_v60, %v2993_v40 }
0x1ac2   :  { %3009 = vadd.xlane.f32.xlu1 %v3008_v45 }
0x1ac3   :  { %v3005_v62 = vadd.f32 %v3236_v53, %v2999_v0  ;;  %v3018_v51 = vsel %vm5886_vm5, %v3016_v9, 0.0 }
0x1ac5   :  { %v3011_v32 = vsel %vm5887_vm7, %v3005_v62, 0.0  ;;  %v3017_v8 = vmul.f32 %v3005_v62, %v3005_v62 }
0x1ac6   :  { %3019 = vadd.xlane.f32.xlu1 %v3018_v51  ;;  %3012 = vadd.xlane.f32.xlu0 %v3011_v32 }
0x1ac7   :  { %v3021_v4 = vsel %vm5888_vm10, %v3017_v8, 0.0 }
0x1aca   :  { %3022 = vadd.xlane.f32.xlu0 %v3021_v4 }
0x1b4b   :  { %v3010_v17 = vpop.xlane.xlu1 %3009 }
0x1b4c   :  { %v3014_v7 = vmul.f32 0.03125, %v3010_v17 }
0x1b4e   :  { %v3026_v24 = vmul.f32 %v3014_v7, %v3014_v7  ;;  %v3030_v3 = vsub.f32 %v3004_v59, %v3014_v7 }
0x1b4f   :  { %v3020_v54 = vpop.xlane.xlu1 %3019  ;;  %v3013_v11 = vpop.xlane.xlu0 %3012 }
0x1b50   :  { %v3024_v38 = vmul.f32 0.03125, %v3020_v54  ;;  %v3015_v33 = vmul.f32 0.03125, %v3013_v11 }
0x1b52   :  { %v3028_v16 = vsub.f32 %v3024_v38, %v3026_v24  ;;  %v3027_v13 = vmul.f32 %v3015_v33, %v3015_v33  ;;  %v3031_v61 = vsub.f32 %v3005_v62, %v3015_v33 }
0x1b53   :  { %v3023_v49 = vpop.xlane.xlu0 %3022 }
0x1b54   :  { %v3032_v5 = vadd.f32 1e-05, %v3028_v16  ;;  %v3025_v28 = vmul.f32 0.03125, %v3023_v49 }
0x1b56   :  { %3970 = vrsqrt.f32 %v3032_v5  ;;  %v3029_v23 = vsub.f32 %v3025_v28, %v3027_v13 }
0x1b58   :  { %v3033_v26 = vadd.f32 1e-05, %v3029_v23 }
0x1b5a   :  { %3972 = vrsqrt.f32 %v3033_v26 }
0x1b63   :  { %v3971_v2 = vpop.eup %3970 }
0x1b64   :  { %v3036_v52 = vmul.f32 %v3971_v2, %v3030_v3 }
0x1b66   :  { %v3042_v34 = vmul.f32 %v3237_v39, %v3036_v52 }
0x1b67   :  { %v3973_v48 = vpop.eup %3972 }
0x1b68   :  { %v3037_v41 = vmul.f32 %v3973_v48, %v3031_v61  ;;  %v3048_v46 = vadd.f32 %v3238_v35, %v3042_v34 }
0x1b6a   :  { %v3043_v27 = vmul.f32 %v3237_v39, %v3037_v41  ;;  %3050 = vst.msk [vmem:[#allocation10] sm:$0xff] %vm5889_vm2, %v3048_v46 }
0x1b6c   :  { %v3049_v50 = vadd.f32 %v3238_v35, %v3043_v27 }
0x1b6e   :  { %3051 = vst.msk [vmem:[#allocation10 + $0x8] sm:$0xff] %vm5890_vm3, %v3049_v50 }
0x1b6f   :  { %4065 = shalt.err (!%p4062_p10)
}
0x1b70   :  { %3063 = dma.vmem_to_hbm [thread:$0]  %s3058_s13, 256, %s5562_s4, [#allocation4], %s4084_s20, %s4084_s20, %s4085_s21  }
0x1b71   :  { %4080 = dma.done.wait [#allocation4], 256  }
0x1b72   :  { %4081 = vsyncadd [#allocation4], 4294967040 }
0x1b73   :  { %3067 = vsyncpa [#allocation3], 1 }
0x1b74   :  { %3068 = vsyncpa [#allocation6], 1 }
0x1b75   :  { %3069 = vsyncpa [#allocation9], 1 }
0x1b76   :  { %3070 = vsyncpa [#allocation4], 1 }

</bundles_post_ra>
